<compile_context>
chip_gen: v7x
topology: tpu7x:2x2x1
jax: 0.10.0
libtpu: 0.0.40
codegen_flags: <defaults>
</compile_context>

<pallas_src>
import functools
import math

import jax
import jax.numpy as jnp
from jax.experimental import pallas as pl
from jax.experimental.pallas import tpu as pltpu

# ----------------------------- config ---------------------------------------
D_MODEL = 32
N_HEADS = 4
NUM_ENC_LAYERS = 2
NUM_DEC_LAYERS = 2
DIM_FF = 64
LN_EPS = 1e-5
NEG_INF = -1e30

# TODO(synk): src_mask / tgt_mask / memory_mask support (module defaults are
# None, so the unmasked path below matches the reference forward exactly).


# ------------------------ in-kernel math helpers -----------------------------
def _softmax_last(s):
    m = jnp.max(s, axis=-1, keepdims=True)
    e = jnp.exp(s - m)
    # approx reciprocal lowers to the (otherwise idle) EUP slot.
    return e * pl.reciprocal(jnp.sum(e, axis=-1, keepdims=True), approx=True)


def _layernorm(x, gamma, beta):
    mu = jnp.mean(x, axis=-1, keepdims=True)
    var = jnp.mean((x - mu) * (x - mu), axis=-1, keepdims=True)
    return (x - mu) * jax.lax.rsqrt(var + LN_EPS) * gamma + beta


def _attend(Q, K, V, Wo, bo, mask, n_heads):
    """Multi-head attention core on batch-folded rows.

    Q: (Mq, D); K, V: (Mk, D); mask: (Mq, Mk) additive block-diagonal mask
    (0 inside a batch element, -1e30 across batch elements) so every batch
    element only attends to its own rows.
    concat(heads) @ Wo == sum_h head_h @ Wo[h*dh:(h+1)*dh, :].
    """
    d = Wo.shape[0]
    dh = d // n_heads
    scale = 1.0 / math.sqrt(dh)
    out = jnp.zeros((Q.shape[0], d), jnp.float32)
    for h in range(n_heads):
        lo = h * dh
        q = Q[:, lo:lo + dh]
        k = K[:, lo:lo + dh]
        v = V[:, lo:lo + dh]
        s = jnp.dot(q, k.T, preferred_element_type=jnp.float32) * scale + mask
        p = _softmax_last(s)
        ctx = jnp.dot(p, v, preferred_element_type=jnp.float32)
        out = out + jnp.dot(ctx, Wo[lo:lo + dh, :],
                            preferred_element_type=jnp.float32)
    return out + bo


def _ffn(x, W1, b1, W2, b2):
    h = jnp.dot(x, W1, preferred_element_type=jnp.float32) + b1
    h = jnp.maximum(h, 0.0)
    return jnp.dot(h, W2, preferred_element_type=jnp.float32) + b2


# ------------------------------- fused kernel --------------------------------
def transformer_kernel(src_ref, tgt_ref, msrc_ref, mtgt_ref, mx_ref,
                       e_qkv_w, e_qkv_b, e_o_w, e_o_b,
                       e_ff1_w, e_ff1_b, e_ff2_w, e_ff2_b, e_ln,
                       d_sqkv_w, d_sqkv_b, d_so_w, d_so_b,
                       d_cq_w, d_cq_b, d_ckv_w, d_ckv_b, d_co_w, d_co_b,
                       d_ff1_w, d_ff1_b, d_ff2_w, d_ff2_b, d_ln,
                       o_ref, *, n_heads, n_enc, n_dec, d_model):
    D = d_model
    m_src = msrc_ref[...]
    m_tgt = mtgt_ref[...]
    m_x = mx_ref[...]

    # ------------------------- encoder stack (fused) -------------------------
    x = src_ref[...]
    for li in range(n_enc):
        qkv = jnp.dot(x, e_qkv_w[li],
                      preferred_element_type=jnp.float32) + e_qkv_b[li]
        a = _attend(qkv[:, 0:D], qkv[:, D:2 * D], qkv[:, 2 * D:3 * D],
                    e_o_w[li], e_o_b[li], m_src, n_heads)
        lnp = e_ln[li]                              # (4, D) = [g1, b1, g2, b2]
        x = _layernorm(x + a, lnp[0:1, :], lnp[1:2, :])
        f = _ffn(x, e_ff1_w[li], e_ff1_b[li], e_ff2_w[li], e_ff2_b[li])
        x = _layernorm(x + f, lnp[2:3, :], lnp[3:4, :])
    mem = x

    # ------------------------- decoder stack (fused) -------------------------
    t = tgt_ref[...]
    for li in range(n_dec):
        lnp = d_ln[li]                              # (6, D)
        qkv = jnp.dot(t, d_sqkv_w[li],
                      preferred_element_type=jnp.float32) + d_sqkv_b[li]
        a = _attend(qkv[:, 0:D], qkv[:, D:2 * D], qkv[:, 2 * D:3 * D],
                    d_so_w[li], d_so_b[li], m_tgt, n_heads)
        t = _layernorm(t + a, lnp[0:1, :], lnp[1:2, :])
        # cross-attention over encoder memory (fused K|V projection)
        q = jnp.dot(t, d_cq_w[li],
                    preferred_element_type=jnp.float32) + d_cq_b[li]
        kv = jnp.dot(mem, d_ckv_w[li],
                     preferred_element_type=jnp.float32) + d_ckv_b[li]
        c = _attend(q, kv[:, 0:D], kv[:, D:2 * D],
                    d_co_w[li], d_co_b[li], m_x, n_heads)
        t = _layernorm(t + c, lnp[2:3, :], lnp[3:4, :])
        f = _ffn(t, d_ff1_w[li], d_ff1_b[li], d_ff2_w[li], d_ff2_b[li])
        t = _layernorm(t + f, lnp[4:5, :], lnp[5:6, :])

    o_ref[...] = t


# ------------------------------ host wrapper ---------------------------------
PACKED_KEYS = [
    "e_qkv_w", "e_qkv_b", "e_o_w", "e_o_b",
    "e_ff1_w", "e_ff1_b", "e_ff2_w", "e_ff2_b", "e_ln",
    "d_sqkv_w", "d_sqkv_b", "d_so_w", "d_so_b",
    "d_cq_w", "d_cq_b", "d_ckv_w", "d_ckv_b", "d_co_w", "d_co_b",
    "d_ff1_w", "d_ff1_b", "d_ff2_w", "d_ff2_b", "d_ln",
]


def _block_diag_mask(b, sq, sk):
    """(b*sq, b*sk) additive mask: 0 within a batch element, -1e30 across."""
    rb = jnp.repeat(jnp.arange(b), sq)[:, None]
    cb = jnp.repeat(jnp.arange(b), sk)[None, :]
    return jnp.where(rb == cb, 0.0, NEG_INF).astype(jnp.float32)


def transformer_forward(src, tgt, params,
                        src_mask=None, tgt_mask=None, memory_mask=None):
    assert src_mask is None and tgt_mask is None and memory_mask is None
    B, Ss, D = src.shape
    _, St, _ = tgt.shape
    src2 = src.reshape(B * Ss, D)
    tgt2 = tgt.reshape(B * St, D)
    m_src = _block_diag_mask(B, Ss, Ss)
    m_tgt = _block_diag_mask(B, St, St)
    m_x = _block_diag_mask(B, St, Ss)
    args = [params[k] for k in PACKED_KEYS]
    n_in = 5 + len(args)

    kernel = functools.partial(
        transformer_kernel, n_heads=N_HEADS, d_model=D,
        n_enc=params["e_qkv_w"].shape[0], n_dec=params["d_sqkv_w"].shape[0])

    out2 = pl.pallas_call(
        kernel,
        out_shape=jax.ShapeDtypeStruct((B * St, D), jnp.float32),
        in_specs=[pl.BlockSpec(memory_space=pltpu.MemorySpace.VMEM)] * n_in,
        out_specs=pl.BlockSpec(memory_space=pltpu.MemorySpace.VMEM),
    )(src2, tgt2, m_src, m_tgt, m_x, *args)
    return out2.reshape(B, St, D)


# ----------------------------- parameter init --------------------------------
def _lin(key, fan_in, fan_out):
    w = 0.02 * jax.random.normal(key, (fan_in, fan_out), jnp.float32)
    b = jnp.zeros((1, fan_out), jnp.float32)
    return w, b


def init_params(key, d_model, dim_ff, n_enc, n_dec):
    ones = jnp.ones((1, d_model), jnp.float32)
    zeros = jnp.zeros((1, d_model), jnp.float32)
    keys = jax.random.split(key, n_enc + n_dec)

    enc = {k: [] for k in ["qkv_w", "qkv_b", "o_w", "o_b",
                           "ff1_w", "ff1_b", "ff2_w", "ff2_b", "ln"]}
    for li in range(n_enc):
        ks = jax.random.split(keys[li], 6)
        Wq, bq = _lin(ks[0], d_model, d_model)
        Wk, bk = _lin(ks[1], d_model, d_model)
        Wv, bv = _lin(ks[2], d_model, d_model)
        Wo, bo = _lin(ks[3], d_model, d_model)
        W1, b1 = _lin(ks[4], d_model, dim_ff)
        W2, b2 = _lin(ks[5], dim_ff, d_model)
        enc["qkv_w"].append(jnp.concatenate([Wq, Wk, Wv], axis=1))
        enc["qkv_b"].append(jnp.concatenate([bq, bk, bv], axis=1))
        enc["o_w"].append(Wo)
        enc["o_b"].append(bo)
        enc["ff1_w"].append(W1)
        enc["ff1_b"].append(b1)
        enc["ff2_w"].append(W2)
        enc["ff2_b"].append(b2)
        enc["ln"].append(jnp.concatenate([ones, zeros, ones, zeros], axis=0))

    dec = {k: [] for k in ["sqkv_w", "sqkv_b", "so_w", "so_b",
                           "cq_w", "cq_b", "ckv_w", "ckv_b", "co_w", "co_b",
                           "ff1_w", "ff1_b", "ff2_w", "ff2_b", "ln"]}
    for li in range(n_dec):
        ks = jax.random.split(keys[n_enc + li], 10)
        sWq, sbq = _lin(ks[0], d_model, d_model)
        sWk, sbk = _lin(ks[1], d_model, d_model)
        sWv, sbv = _lin(ks[2], d_model, d_model)
        sWo, sbo = _lin(ks[3], d_model, d_model)
        cWq, cbq = _lin(ks[4], d_model, d_model)
        cWk, cbk = _lin(ks[5], d_model, d_model)
        cWv, cbv = _lin(ks[6], d_model, d_model)
        cWo, cbo = _lin(ks[7], d_model, d_model)
        W1, b1 = _lin(ks[8], d_model, dim_ff)
        W2, b2 = _lin(ks[9], dim_ff, d_model)
        dec["sqkv_w"].append(jnp.concatenate([sWq, sWk, sWv], axis=1))
        dec["sqkv_b"].append(jnp.concatenate([sbq, sbk, sbv], axis=1))
        dec["so_w"].append(sWo)
        dec["so_b"].append(sbo)
        dec["cq_w"].append(cWq)
        dec["cq_b"].append(cbq)
        dec["ckv_w"].append(jnp.concatenate([cWk, cWv], axis=1))
        dec["ckv_b"].append(jnp.concatenate([cbk, cbv], axis=1))
        dec["co_w"].append(cWo)
        dec["co_b"].append(cbo)
        dec["ff1_w"].append(W1)
        dec["ff1_b"].append(b1)
        dec["ff2_w"].append(W2)
        dec["ff2_b"].append(b2)
        dec["ln"].append(jnp.concatenate(
            [ones, zeros, ones, zeros, ones, zeros], axis=0))

    params = {}
    for k, v in enc.items():
        params["e_" + k] = jnp.stack(v, axis=0)
    for k, v in dec.items():
        params["d_" + k] = jnp.stack(v, axis=0)
    return params


# --------------------------------- main ---------------------------------------
if __name__ == "__main__":
    key = jax.random.PRNGKey(0)
    k_src, k_tgt, k_par = jax.random.split(key, 3)

    B, S_SRC, S_TGT = 2, 8, 8
    src = jax.random.normal(k_src, (B, S_SRC, D_MODEL), jnp.float32)
    tgt = jax.random.normal(k_tgt, (B, S_TGT, D_MODEL), jnp.float32)

    params = init_params(k_par, D_MODEL, DIM_FF, NUM_ENC_LAYERS, NUM_DEC_LAYERS)

    out = transformer_forward(src, tgt, params)
    out = jax.block_until_ready(out)

    assert out.shape == (B, S_TGT, D_MODEL)
    assert bool(jnp.all(jnp.isfinite(out)))
    print("KERNEL_OK")
</pallas_src>

<mosaic_0001>
module attributes {stable_mosaic.version = 11 : i64} {
  func.func @transformer_kernel(%arg0: memref<16x32xf32, #tpu.memory_space<vmem>>, %arg1: memref<16x32xf32, #tpu.memory_space<vmem>>, %arg2: memref<16x16xf32, #tpu.memory_space<vmem>>, %arg3: memref<16x16xf32, #tpu.memory_space<vmem>>, %arg4: memref<16x16xf32, #tpu.memory_space<vmem>>, %arg5: memref<2x32x96xf32, #tpu.memory_space<vmem>>, %arg6: memref<2x1x96xf32, #tpu.memory_space<vmem>>, %arg7: memref<2x32x32xf32, #tpu.memory_space<vmem>>, %arg8: memref<2x1x32xf32, #tpu.memory_space<vmem>>, %arg9: memref<2x32x64xf32, #tpu.memory_space<vmem>>, %arg10: memref<2x1x64xf32, #tpu.memory_space<vmem>>, %arg11: memref<2x64x32xf32, #tpu.memory_space<vmem>>, %arg12: memref<2x1x32xf32, #tpu.memory_space<vmem>>, %arg13: memref<2x4x32xf32, #tpu.memory_space<vmem>>, %arg14: memref<2x32x96xf32, #tpu.memory_space<vmem>>, %arg15: memref<2x1x96xf32, #tpu.memory_space<vmem>>, %arg16: memref<2x32x32xf32, #tpu.memory_space<vmem>>, %arg17: memref<2x1x32xf32, #tpu.memory_space<vmem>>, %arg18: memref<2x32x32xf32, #tpu.memory_space<vmem>>, %arg19: memref<2x1x32xf32, #tpu.memory_space<vmem>>, %arg20: memref<2x32x64xf32, #tpu.memory_space<vmem>>, %arg21: memref<2x1x64xf32, #tpu.memory_space<vmem>>, %arg22: memref<2x32x32xf32, #tpu.memory_space<vmem>>, %arg23: memref<2x1x32xf32, #tpu.memory_space<vmem>>, %arg24: memref<2x32x64xf32, #tpu.memory_space<vmem>>, %arg25: memref<2x1x64xf32, #tpu.memory_space<vmem>>, %arg26: memref<2x64x32xf32, #tpu.memory_space<vmem>>, %arg27: memref<2x1x32xf32, #tpu.memory_space<vmem>>, %arg28: memref<2x6x32xf32, #tpu.memory_space<vmem>>, %arg29: memref<16x32xf32, #tpu.memory_space<vmem>>) attributes {dimension_semantics = [], scalar_prefetch = 0 : i64, scratch_operands = 0 : i64, tpu.core_type = #tpu.core_type<tc>} {
    %c0 = arith.constant 0 : index
    %c0_0 = arith.constant 0 : index
    %0 = vector.load %arg2[%c0, %c0_0] : memref<16x16xf32, #tpu.memory_space<vmem>>, vector<16x16xf32>
    %c0_1 = arith.constant 0 : index
    %c0_2 = arith.constant 0 : index
    %1 = vector.load %arg3[%c0_1, %c0_2] : memref<16x16xf32, #tpu.memory_space<vmem>>, vector<16x16xf32>
    %c0_3 = arith.constant 0 : index
    %c0_4 = arith.constant 0 : index
    %2 = vector.load %arg4[%c0_3, %c0_4] : memref<16x16xf32, #tpu.memory_space<vmem>>, vector<16x16xf32>
    %c0_5 = arith.constant 0 : index
    %c0_6 = arith.constant 0 : index
    %3 = vector.load %arg0[%c0_5, %c0_6] : memref<16x32xf32, #tpu.memory_space<vmem>>, vector<16x32xf32>
    %c0_7 = arith.constant 0 : index
    %c0_8 = arith.constant 0 : index
    %c0_9 = arith.constant 0 : index
    %4 = vector.load %arg5[%c0_7, %c0_8, %c0_9] : memref<2x32x96xf32, #tpu.memory_space<vmem>>, vector<1x32x96xf32>
    %5 = vector.shape_cast %4 : vector<1x32x96xf32> to vector<32x96xf32>
    %cst = arith.constant dense<0.000000e+00> : vector<16x96xf32>
    %6 = tpu.matmul %3, %5, %cst {dimension_numbers = #tpu.dot_dimension_numbers<[1], [0], [0], [1], [0, 0, 1, 1], [], []>} : vector<16x32xf32>, vector<32x96xf32>, vector<16x96xf32> -> vector<16x96xf32>
    %c0_10 = arith.constant 0 : index
    %c0_11 = arith.constant 0 : index
    %c0_12 = arith.constant 0 : index
    %7 = vector.load %arg6[%c0_10, %c0_11, %c0_12] : memref<2x1x96xf32, #tpu.memory_space<vmem>>, vector<1x1x96xf32>
    %8 = vector.shape_cast %7 : vector<1x1x96xf32> to vector<1x96xf32>
    %9 = vector.broadcast %8 : vector<1x96xf32> to vector<16x96xf32>
    %10 = arith.addf %6, %9 : vector<16x96xf32>
    %11 = vector.extract_strided_slice %10 {offsets = [0, 0], sizes = [16, 32], strides = [1, 1]} : vector<16x96xf32> to vector<16x32xf32>
    %12 = vector.extract_strided_slice %10 {offsets = [0, 32], sizes = [16, 32], strides = [1, 1]} : vector<16x96xf32> to vector<16x32xf32>
    %13 = vector.extract_strided_slice %10 {offsets = [0, 64], sizes = [16, 32], strides = [1, 1]} : vector<16x96xf32> to vector<16x32xf32>
    %c0_13 = arith.constant 0 : index
    %c0_14 = arith.constant 0 : index
    %c0_15 = arith.constant 0 : index
    %14 = vector.load %arg7[%c0_13, %c0_14, %c0_15] : memref<2x32x32xf32, #tpu.memory_space<vmem>>, vector<1x32x32xf32>
    %15 = vector.shape_cast %14 : vector<1x32x32xf32> to vector<32x32xf32>
    %c0_16 = arith.constant 0 : index
    %c0_17 = arith.constant 0 : index
    %c0_18 = arith.constant 0 : index
    %16 = vector.load %arg8[%c0_16, %c0_17, %c0_18] : memref<2x1x32xf32, #tpu.memory_space<vmem>>, vector<1x1x32xf32>
    %17 = vector.shape_cast %16 : vector<1x1x32xf32> to vector<1x32xf32>
    %cst_19 = arith.constant 0.000000e+00 : f32
    %18 = vector.broadcast %cst_19 : f32 to vector<16x32xf32>
    %19 = vector.extract_strided_slice %11 {offsets = [0, 0], sizes = [16, 8], strides = [1, 1]} : vector<16x32xf32> to vector<16x8xf32>
    %20 = vector.extract_strided_slice %12 {offsets = [0, 0], sizes = [16, 8], strides = [1, 1]} : vector<16x32xf32> to vector<16x8xf32>
    %21 = vector.extract_strided_slice %13 {offsets = [0, 0], sizes = [16, 8], strides = [1, 1]} : vector<16x32xf32> to vector<16x8xf32>
    %22 = tpu.transpose %20, [1, 0] : vector<16x8xf32> -> vector<8x16xf32>
    %cst_20 = arith.constant dense<0.000000e+00> : vector<16x16xf32>
    %23 = tpu.matmul %19, %22, %cst_20 {dimension_numbers = #tpu.dot_dimension_numbers<[1], [0], [0], [1], [0, 0, 1, 1], [], []>} : vector<16x8xf32>, vector<8x16xf32>, vector<16x16xf32> -> vector<16x16xf32>
    %cst_21 = arith.constant 0.353553385 : f32
    %24 = vector.broadcast %cst_21 : f32 to vector<16x16xf32>
    %25 = arith.mulf %23, %24 : vector<16x16xf32>
    %26 = arith.addf %25, %0 : vector<16x16xf32>
    %cst_22 = arith.constant dense<0xFF800000> : vector<16xf32>
    %27 = vector.multi_reduction <maximumf>, %26, %cst_22 [1] : vector<16x16xf32> to vector<16xf32>
    %28 = vector.shape_cast %27 : vector<16xf32> to vector<16x1xf32>
    %29 = vector.broadcast %28 : vector<16x1xf32> to vector<16x16xf32>
    %30 = arith.subf %26, %29 : vector<16x16xf32>
    %31 = math.exp %30 : vector<16x16xf32>
    %cst_23 = arith.constant dense<0.000000e+00> : vector<16xf32>
    %32 = vector.multi_reduction <add>, %31, %cst_23 [1] : vector<16x16xf32> to vector<16xf32>
    %33 = vector.shape_cast %32 : vector<16xf32> to vector<16x1xf32>
    %34 = tpu.reciprocal %33 {approx = true} : vector<16x1xf32> -> vector<16x1xf32>
    %35 = vector.broadcast %34 : vector<16x1xf32> to vector<16x16xf32>
    %36 = arith.mulf %31, %35 : vector<16x16xf32>
    %cst_24 = arith.constant dense<0.000000e+00> : vector<16x8xf32>
    %37 = tpu.matmul %36, %21, %cst_24 {dimension_numbers = #tpu.dot_dimension_numbers<[1], [0], [0], [1], [0, 0, 1, 1], [], []>} : vector<16x16xf32>, vector<16x8xf32>, vector<16x8xf32> -> vector<16x8xf32>
    %38 = vector.extract_strided_slice %15 {offsets = [0, 0], sizes = [8, 32], strides = [1, 1]} : vector<32x32xf32> to vector<8x32xf32>
    %cst_25 = arith.constant dense<0.000000e+00> : vector<16x32xf32>
    %39 = tpu.matmul %37, %38, %cst_25 {dimension_numbers = #tpu.dot_dimension_numbers<[1], [0], [0], [1], [0, 0, 1, 1], [], []>} : vector<16x8xf32>, vector<8x32xf32>, vector<16x32xf32> -> vector<16x32xf32>
    %40 = arith.addf %18, %39 : vector<16x32xf32>
    %41 = vector.extract_strided_slice %11 {offsets = [0, 8], sizes = [16, 8], strides = [1, 1]} : vector<16x32xf32> to vector<16x8xf32>
    %42 = vector.extract_strided_slice %12 {offsets = [0, 8], sizes = [16, 8], strides = [1, 1]} : vector<16x32xf32> to vector<16x8xf32>
    %43 = vector.extract_strided_slice %13 {offsets = [0, 8], sizes = [16, 8], strides = [1, 1]} : vector<16x32xf32> to vector<16x8xf32>
    %44 = tpu.transpose %42, [1, 0] : vector<16x8xf32> -> vector<8x16xf32>
    %cst_26 = arith.constant dense<0.000000e+00> : vector<16x16xf32>
    %45 = tpu.matmul %41, %44, %cst_26 {dimension_numbers = #tpu.dot_dimension_numbers<[1], [0], [0], [1], [0, 0, 1, 1], [], []>} : vector<16x8xf32>, vector<8x16xf32>, vector<16x16xf32> -> vector<16x16xf32>
    %cst_27 = arith.constant 0.353553385 : f32
    %46 = vector.broadcast %cst_27 : f32 to vector<16x16xf32>
    %47 = arith.mulf %45, %46 : vector<16x16xf32>
    %48 = arith.addf %47, %0 : vector<16x16xf32>
    %cst_28 = arith.constant dense<0xFF800000> : vector<16xf32>
    %49 = vector.multi_reduction <maximumf>, %48, %cst_28 [1] : vector<16x16xf32> to vector<16xf32>
    %50 = vector.shape_cast %49 : vector<16xf32> to vector<16x1xf32>
    %51 = vector.broadcast %50 : vector<16x1xf32> to vector<16x16xf32>
    %52 = arith.subf %48, %51 : vector<16x16xf32>
    %53 = math.exp %52 : vector<16x16xf32>
    %cst_29 = arith.constant dense<0.000000e+00> : vector<16xf32>
    %54 = vector.multi_reduction <add>, %53, %cst_29 [1] : vector<16x16xf32> to vector<16xf32>
    %55 = vector.shape_cast %54 : vector<16xf32> to vector<16x1xf32>
    %56 = tpu.reciprocal %55 {approx = true} : vector<16x1xf32> -> vector<16x1xf32>
    %57 = vector.broadcast %56 : vector<16x1xf32> to vector<16x16xf32>
    %58 = arith.mulf %53, %57 : vector<16x16xf32>
    %cst_30 = arith.constant dense<0.000000e+00> : vector<16x8xf32>
    %59 = tpu.matmul %58, %43, %cst_30 {dimension_numbers = #tpu.dot_dimension_numbers<[1], [0], [0], [1], [0, 0, 1, 1], [], []>} : vector<16x16xf32>, vector<16x8xf32>, vector<16x8xf32> -> vector<16x8xf32>
    %60 = vector.extract_strided_slice %15 {offsets = [8, 0], sizes = [8, 32], strides = [1, 1]} : vector<32x32xf32> to vector<8x32xf32>
    %cst_31 = arith.constant dense<0.000000e+00> : vector<16x32xf32>
    %61 = tpu.matmul %59, %60, %cst_31 {dimension_numbers = #tpu.dot_dimension_numbers<[1], [0], [0], [1], [0, 0, 1, 1], [], []>} : vector<16x8xf32>, vector<8x32xf32>, vector<16x32xf32> -> vector<16x32xf32>
    %62 = arith.addf %40, %61 : vector<16x32xf32>
    %63 = vector.extract_strided_slice %11 {offsets = [0, 16], sizes = [16, 8], strides = [1, 1]} : vector<16x32xf32> to vector<16x8xf32>
    %64 = vector.extract_strided_slice %12 {offsets = [0, 16], sizes = [16, 8], strides = [1, 1]} : vector<16x32xf32> to vector<16x8xf32>
    %65 = vector.extract_strided_slice %13 {offsets = [0, 16], sizes = [16, 8], strides = [1, 1]} : vector<16x32xf32> to vector<16x8xf32>
    %66 = tpu.transpose %64, [1, 0] : vector<16x8xf32> -> vector<8x16xf32>
    %cst_32 = arith.constant dense<0.000000e+00> : vector<16x16xf32>
    %67 = tpu.matmul %63, %66, %cst_32 {dimension_numbers = #tpu.dot_dimension_numbers<[1], [0], [0], [1], [0, 0, 1, 1], [], []>} : vector<16x8xf32>, vector<8x16xf32>, vector<16x16xf32> -> vector<16x16xf32>
    %cst_33 = arith.constant 0.353553385 : f32
    %68 = vector.broadcast %cst_33 : f32 to vector<16x16xf32>
    %69 = arith.mulf %67, %68 : vector<16x16xf32>
    %70 = arith.addf %69, %0 : vector<16x16xf32>
    %cst_34 = arith.constant dense<0xFF800000> : vector<16xf32>
    %71 = vector.multi_reduction <maximumf>, %70, %cst_34 [1] : vector<16x16xf32> to vector<16xf32>
    %72 = vector.shape_cast %71 : vector<16xf32> to vector<16x1xf32>
    %73 = vector.broadcast %72 : vector<16x1xf32> to vector<16x16xf32>
    %74 = arith.subf %70, %73 : vector<16x16xf32>
    %75 = math.exp %74 : vector<16x16xf32>
    %cst_35 = arith.constant dense<0.000000e+00> : vector<16xf32>
    %76 = vector.multi_reduction <add>, %75, %cst_35 [1] : vector<16x16xf32> to vector<16xf32>
    %77 = vector.shape_cast %76 : vector<16xf32> to vector<16x1xf32>
    %78 = tpu.reciprocal %77 {approx = true} : vector<16x1xf32> -> vector<16x1xf32>
    %79 = vector.broadcast %78 : vector<16x1xf32> to vector<16x16xf32>
    %80 = arith.mulf %75, %79 : vector<16x16xf32>
    %cst_36 = arith.constant dense<0.000000e+00> : vector<16x8xf32>
    %81 = tpu.matmul %80, %65, %cst_36 {dimension_numbers = #tpu.dot_dimension_numbers<[1], [0], [0], [1], [0, 0, 1, 1], [], []>} : vector<16x16xf32>, vector<16x8xf32>, vector<16x8xf32> -> vector<16x8xf32>
    %82 = vector.extract_strided_slice %15 {offsets = [16, 0], sizes = [8, 32], strides = [1, 1]} : vector<32x32xf32> to vector<8x32xf32>
    %cst_37 = arith.constant dense<0.000000e+00> : vector<16x32xf32>
    %83 = tpu.matmul %81, %82, %cst_37 {dimension_numbers = #tpu.dot_dimension_numbers<[1], [0], [0], [1], [0, 0, 1, 1], [], []>} : vector<16x8xf32>, vector<8x32xf32>, vector<16x32xf32> -> vector<16x32xf32>
    %84 = arith.addf %62, %83 : vector<16x32xf32>
    %85 = vector.extract_strided_slice %11 {offsets = [0, 24], sizes = [16, 8], strides = [1, 1]} : vector<16x32xf32> to vector<16x8xf32>
    %86 = vector.extract_strided_slice %12 {offsets = [0, 24], sizes = [16, 8], strides = [1, 1]} : vector<16x32xf32> to vector<16x8xf32>
    %87 = vector.extract_strided_slice %13 {offsets = [0, 24], sizes = [16, 8], strides = [1, 1]} : vector<16x32xf32> to vector<16x8xf32>
    %88 = tpu.transpose %86, [1, 0] : vector<16x8xf32> -> vector<8x16xf32>
    %cst_38 = arith.constant dense<0.000000e+00> : vector<16x16xf32>
    %89 = tpu.matmul %85, %88, %cst_38 {dimension_numbers = #tpu.dot_dimension_numbers<[1], [0], [0], [1], [0, 0, 1, 1], [], []>} : vector<16x8xf32>, vector<8x16xf32>, vector<16x16xf32> -> vector<16x16xf32>
    %cst_39 = arith.constant 0.353553385 : f32
    %90 = vector.broadcast %cst_39 : f32 to vector<16x16xf32>
    %91 = arith.mulf %89, %90 : vector<16x16xf32>
    %92 = arith.addf %91, %0 : vector<16x16xf32>
    %cst_40 = arith.constant dense<0xFF800000> : vector<16xf32>
    %93 = vector.multi_reduction <maximumf>, %92, %cst_40 [1] : vector<16x16xf32> to vector<16xf32>
    %94 = vector.shape_cast %93 : vector<16xf32> to vector<16x1xf32>
    %95 = vector.broadcast %94 : vector<16x1xf32> to vector<16x16xf32>
    %96 = arith.subf %92, %95 : vector<16x16xf32>
    %97 = math.exp %96 : vector<16x16xf32>
    %cst_41 = arith.constant dense<0.000000e+00> : vector<16xf32>
    %98 = vector.multi_reduction <add>, %97, %cst_41 [1] : vector<16x16xf32> to vector<16xf32>
    %99 = vector.shape_cast %98 : vector<16xf32> to vector<16x1xf32>
    %100 = tpu.reciprocal %99 {approx = true} : vector<16x1xf32> -> vector<16x1xf32>
    %101 = vector.broadcast %100 : vector<16x1xf32> to vector<16x16xf32>
    %102 = arith.mulf %97, %101 : vector<16x16xf32>
    %cst_42 = arith.constant dense<0.000000e+00> : vector<16x8xf32>
    %103 = tpu.matmul %102, %87, %cst_42 {dimension_numbers = #tpu.dot_dimension_numbers<[1], [0], [0], [1], [0, 0, 1, 1], [], []>} : vector<16x16xf32>, vector<16x8xf32>, vector<16x8xf32> -> vector<16x8xf32>
    %104 = vector.extract_strided_slice %15 {offsets = [24, 0], sizes = [8, 32], strides = [1, 1]} : vector<32x32xf32> to vector<8x32xf32>
    %cst_43 = arith.constant dense<0.000000e+00> : vector<16x32xf32>
    %105 = tpu.matmul %103, %104, %cst_43 {dimension_numbers = #tpu.dot_dimension_numbers<[1], [0], [0], [1], [0, 0, 1, 1], [], []>} : vector<16x8xf32>, vector<8x32xf32>, vector<16x32xf32> -> vector<16x32xf32>
    %106 = arith.addf %84, %105 : vector<16x32xf32>
    %107 = vector.broadcast %17 : vector<1x32xf32> to vector<16x32xf32>
    %108 = arith.addf %106, %107 : vector<16x32xf32>
    %c0_44 = arith.constant 0 : index
    %c0_45 = arith.constant 0 : index
    %c0_46 = arith.constant 0 : index
    %109 = vector.load %arg13[%c0_44, %c0_45, %c0_46] : memref<2x4x32xf32, #tpu.memory_space<vmem>>, vector<1x4x32xf32>
    %110 = vector.shape_cast %109 : vector<1x4x32xf32> to vector<4x32xf32>
    %111 = arith.addf %3, %108 : vector<16x32xf32>
    %112 = vector.extract_strided_slice %110 {offsets = [0, 0], sizes = [1, 32], strides = [1, 1]} : vector<4x32xf32> to vector<1x32xf32>
    %113 = vector.extract_strided_slice %110 {offsets = [1, 0], sizes = [1, 32], strides = [1, 1]} : vector<4x32xf32> to vector<1x32xf32>
    %cst_47 = arith.constant dense<0.000000e+00> : vector<16xf32>
    %114 = vector.multi_reduction <add>, %111, %cst_47 [1] : vector<16x32xf32> to vector<16xf32>
    %115 = vector.shape_cast %114 : vector<16xf32> to vector<16x1xf32>
    %cst_48 = arith.constant 3.200000e+01 : f32
    %116 = vector.broadcast %cst_48 : f32 to vector<16x1xf32>
    %117 = arith.divf %115, %116 : vector<16x1xf32>
    %118 = vector.broadcast %117 : vector<16x1xf32> to vector<16x32xf32>
    %119 = arith.subf %111, %118 : vector<16x32xf32>
    %120 = vector.broadcast %117 : vector<16x1xf32> to vector<16x32xf32>
    %121 = arith.subf %111, %120 : vector<16x32xf32>
    %122 = arith.mulf %119, %121 : vector<16x32xf32>
    %cst_49 = arith.constant dense<0.000000e+00> : vector<16xf32>
    %123 = vector.multi_reduction <add>, %122, %cst_49 [1] : vector<16x32xf32> to vector<16xf32>
    %124 = vector.shape_cast %123 : vector<16xf32> to vector<16x1xf32>
    %cst_50 = arith.constant 3.200000e+01 : f32
    %125 = vector.broadcast %cst_50 : f32 to vector<16x1xf32>
    %126 = arith.divf %124, %125 : vector<16x1xf32>
    %127 = vector.broadcast %117 : vector<16x1xf32> to vector<16x32xf32>
    %128 = arith.subf %111, %127 : vector<16x32xf32>
    %cst_51 = arith.constant 9.99999974E-6 : f32
    %129 = vector.broadcast %cst_51 : f32 to vector<16x1xf32>
    %130 = arith.addf %126, %129 : vector<16x1xf32>
    %131 = math.rsqrt %130 : vector<16x1xf32>
    %132 = vector.broadcast %131 : vector<16x1xf32> to vector<16x32xf32>
    %133 = arith.mulf %128, %132 : vector<16x32xf32>
    %134 = vector.broadcast %112 : vector<1x32xf32> to vector<16x32xf32>
    %135 = arith.mulf %133, %134 : vector<16x32xf32>
    %136 = vector.broadcast %113 : vector<1x32xf32> to vector<16x32xf32>
    %137 = arith.addf %135, %136 : vector<16x32xf32>
    %c0_52 = arith.constant 0 : index
    %c0_53 = arith.constant 0 : index
    %c0_54 = arith.constant 0 : index
    %138 = vector.load %arg9[%c0_52, %c0_53, %c0_54] : memref<2x32x64xf32, #tpu.memory_space<vmem>>, vector<1x32x64xf32>
    %139 = vector.shape_cast %138 : vector<1x32x64xf32> to vector<32x64xf32>
    %c0_55 = arith.constant 0 : index
    %c0_56 = arith.constant 0 : index
    %c0_57 = arith.constant 0 : index
    %140 = vector.load %arg10[%c0_55, %c0_56, %c0_57] : memref<2x1x64xf32, #tpu.memory_space<vmem>>, vector<1x1x64xf32>
    %141 = vector.shape_cast %140 : vector<1x1x64xf32> to vector<1x64xf32>
    %c0_58 = arith.constant 0 : index
    %c0_59 = arith.constant 0 : index
    %c0_60 = arith.constant 0 : index
    %142 = vector.load %arg11[%c0_58, %c0_59, %c0_60] : memref<2x64x32xf32, #tpu.memory_space<vmem>>, vector<1x64x32xf32>
    %143 = vector.shape_cast %142 : vector<1x64x32xf32> to vector<64x32xf32>
    %c0_61 = arith.constant 0 : index
    %c0_62 = arith.constant 0 : index
    %c0_63 = arith.constant 0 : index
    %144 = vector.load %arg12[%c0_61, %c0_62, %c0_63] : memref<2x1x32xf32, #tpu.memory_space<vmem>>, vector<1x1x32xf32>
    %145 = vector.shape_cast %144 : vector<1x1x32xf32> to vector<1x32xf32>
    %cst_64 = arith.constant dense<0.000000e+00> : vector<16x64xf32>
    %146 = tpu.matmul %137, %139, %cst_64 {dimension_numbers = #tpu.dot_dimension_numbers<[1], [0], [0], [1], [0, 0, 1, 1], [], []>} : vector<16x32xf32>, vector<32x64xf32>, vector<16x64xf32> -> vector<16x64xf32>
    %147 = vector.broadcast %141 : vector<1x64xf32> to vector<16x64xf32>
    %148 = arith.addf %146, %147 : vector<16x64xf32>
    %cst_65 = arith.constant 0.000000e+00 : f32
    %149 = vector.broadcast %cst_65 : f32 to vector<16x64xf32>
    %150 = arith.maximumf %148, %149 : vector<16x64xf32>
    %cst_66 = arith.constant dense<0.000000e+00> : vector<16x32xf32>
    %151 = tpu.matmul %150, %143, %cst_66 {dimension_numbers = #tpu.dot_dimension_numbers<[1], [0], [0], [1], [0, 0, 1, 1], [], []>} : vector<16x64xf32>, vector<64x32xf32>, vector<16x32xf32> -> vector<16x32xf32>
    %152 = vector.broadcast %145 : vector<1x32xf32> to vector<16x32xf32>
    %153 = arith.addf %151, %152 : vector<16x32xf32>
    %154 = arith.addf %137, %153 : vector<16x32xf32>
    %155 = vector.extract_strided_slice %110 {offsets = [2, 0], sizes = [1, 32], strides = [1, 1]} : vector<4x32xf32> to vector<1x32xf32>
    %156 = vector.extract_strided_slice %110 {offsets = [3, 0], sizes = [1, 32], strides = [1, 1]} : vector<4x32xf32> to vector<1x32xf32>
    %cst_67 = arith.constant dense<0.000000e+00> : vector<16xf32>
    %157 = vector.multi_reduction <add>, %154, %cst_67 [1] : vector<16x32xf32> to vector<16xf32>
    %158 = vector.shape_cast %157 : vector<16xf32> to vector<16x1xf32>
    %cst_68 = arith.constant 3.200000e+01 : f32
    %159 = vector.broadcast %cst_68 : f32 to vector<16x1xf32>
    %160 = arith.divf %158, %159 : vector<16x1xf32>
    %161 = vector.broadcast %160 : vector<16x1xf32> to vector<16x32xf32>
    %162 = arith.subf %154, %161 : vector<16x32xf32>
    %163 = vector.broadcast %160 : vector<16x1xf32> to vector<16x32xf32>
    %164 = arith.subf %154, %163 : vector<16x32xf32>
    %165 = arith.mulf %162, %164 : vector<16x32xf32>
    %cst_69 = arith.constant dense<0.000000e+00> : vector<16xf32>
    %166 = vector.multi_reduction <add>, %165, %cst_69 [1] : vector<16x32xf32> to vector<16xf32>
    %167 = vector.shape_cast %166 : vector<16xf32> to vector<16x1xf32>
    %cst_70 = arith.constant 3.200000e+01 : f32
    %168 = vector.broadcast %cst_70 : f32 to vector<16x1xf32>
    %169 = arith.divf %167, %168 : vector<16x1xf32>
    %170 = vector.broadcast %160 : vector<16x1xf32> to vector<16x32xf32>
    %171 = arith.subf %154, %170 : vector<16x32xf32>
    %cst_71 = arith.constant 9.99999974E-6 : f32
    %172 = vector.broadcast %cst_71 : f32 to vector<16x1xf32>
    %173 = arith.addf %169, %172 : vector<16x1xf32>
    %174 = math.rsqrt %173 : vector<16x1xf32>
    %175 = vector.broadcast %174 : vector<16x1xf32> to vector<16x32xf32>
    %176 = arith.mulf %171, %175 : vector<16x32xf32>
    %177 = vector.broadcast %155 : vector<1x32xf32> to vector<16x32xf32>
    %178 = arith.mulf %176, %177 : vector<16x32xf32>
    %179 = vector.broadcast %156 : vector<1x32xf32> to vector<16x32xf32>
    %180 = arith.addf %178, %179 : vector<16x32xf32>
    %c1 = arith.constant 1 : index
    %c0_72 = arith.constant 0 : index
    %c0_73 = arith.constant 0 : index
    %181 = vector.load %arg5[%c1, %c0_72, %c0_73] : memref<2x32x96xf32, #tpu.memory_space<vmem>>, vector<1x32x96xf32>
    %182 = vector.shape_cast %181 : vector<1x32x96xf32> to vector<32x96xf32>
    %cst_74 = arith.constant dense<0.000000e+00> : vector<16x96xf32>
    %183 = tpu.matmul %180, %182, %cst_74 {dimension_numbers = #tpu.dot_dimension_numbers<[1], [0], [0], [1], [0, 0, 1, 1], [], []>} : vector<16x32xf32>, vector<32x96xf32>, vector<16x96xf32> -> vector<16x96xf32>
    %c1_75 = arith.constant 1 : index
    %c0_76 = arith.constant 0 : index
    %c0_77 = arith.constant 0 : index
    %184 = vector.load %arg6[%c1_75, %c0_76, %c0_77] : memref<2x1x96xf32, #tpu.memory_space<vmem>>, vector<1x1x96xf32>
    %185 = vector.shape_cast %184 : vector<1x1x96xf32> to vector<1x96xf32>
    %186 = vector.broadcast %185 : vector<1x96xf32> to vector<16x96xf32>
    %187 = arith.addf %183, %186 : vector<16x96xf32>
    %188 = vector.extract_strided_slice %187 {offsets = [0, 0], sizes = [16, 32], strides = [1, 1]} : vector<16x96xf32> to vector<16x32xf32>
    %189 = vector.extract_strided_slice %187 {offsets = [0, 32], sizes = [16, 32], strides = [1, 1]} : vector<16x96xf32> to vector<16x32xf32>
    %190 = vector.extract_strided_slice %187 {offsets = [0, 64], sizes = [16, 32], strides = [1, 1]} : vector<16x96xf32> to vector<16x32xf32>
    %c1_78 = arith.constant 1 : index
    %c0_79 = arith.constant 0 : index
    %c0_80 = arith.constant 0 : index
    %191 = vector.load %arg7[%c1_78, %c0_79, %c0_80] : memref<2x32x32xf32, #tpu.memory_space<vmem>>, vector<1x32x32xf32>
    %192 = vector.shape_cast %191 : vector<1x32x32xf32> to vector<32x32xf32>
    %c1_81 = arith.constant 1 : index
    %c0_82 = arith.constant 0 : index
    %c0_83 = arith.constant 0 : index
    %193 = vector.load %arg8[%c1_81, %c0_82, %c0_83] : memref<2x1x32xf32, #tpu.memory_space<vmem>>, vector<1x1x32xf32>
    %194 = vector.shape_cast %193 : vector<1x1x32xf32> to vector<1x32xf32>
    %cst_84 = arith.constant 0.000000e+00 : f32
    %195 = vector.broadcast %cst_84 : f32 to vector<16x32xf32>
    %196 = vector.extract_strided_slice %188 {offsets = [0, 0], sizes = [16, 8], strides = [1, 1]} : vector<16x32xf32> to vector<16x8xf32>
    %197 = vector.extract_strided_slice %189 {offsets = [0, 0], sizes = [16, 8], strides = [1, 1]} : vector<16x32xf32> to vector<16x8xf32>
    %198 = vector.extract_strided_slice %190 {offsets = [0, 0], sizes = [16, 8], strides = [1, 1]} : vector<16x32xf32> to vector<16x8xf32>
    %199 = tpu.transpose %197, [1, 0] : vector<16x8xf32> -> vector<8x16xf32>
    %cst_85 = arith.constant dense<0.000000e+00> : vector<16x16xf32>
    %200 = tpu.matmul %196, %199, %cst_85 {dimension_numbers = #tpu.dot_dimension_numbers<[1], [0], [0], [1], [0, 0, 1, 1], [], []>} : vector<16x8xf32>, vector<8x16xf32>, vector<16x16xf32> -> vector<16x16xf32>
    %cst_86 = arith.constant 0.353553385 : f32
    %201 = vector.broadcast %cst_86 : f32 to vector<16x16xf32>
    %202 = arith.mulf %200, %201 : vector<16x16xf32>
    %203 = arith.addf %202, %0 : vector<16x16xf32>
    %cst_87 = arith.constant dense<0xFF800000> : vector<16xf32>
    %204 = vector.multi_reduction <maximumf>, %203, %cst_87 [1] : vector<16x16xf32> to vector<16xf32>
    %205 = vector.shape_cast %204 : vector<16xf32> to vector<16x1xf32>
    %206 = vector.broadcast %205 : vector<16x1xf32> to vector<16x16xf32>
    %207 = arith.subf %203, %206 : vector<16x16xf32>
    %208 = math.exp %207 : vector<16x16xf32>
    %cst_88 = arith.constant dense<0.000000e+00> : vector<16xf32>
    %209 = vector.multi_reduction <add>, %208, %cst_88 [1] : vector<16x16xf32> to vector<16xf32>
    %210 = vector.shape_cast %209 : vector<16xf32> to vector<16x1xf32>
    %211 = tpu.reciprocal %210 {approx = true} : vector<16x1xf32> -> vector<16x1xf32>
    %212 = vector.broadcast %211 : vector<16x1xf32> to vector<16x16xf32>
    %213 = arith.mulf %208, %212 : vector<16x16xf32>
    %cst_89 = arith.constant dense<0.000000e+00> : vector<16x8xf32>
    %214 = tpu.matmul %213, %198, %cst_89 {dimension_numbers = #tpu.dot_dimension_numbers<[1], [0], [0], [1], [0, 0, 1, 1], [], []>} : vector<16x16xf32>, vector<16x8xf32>, vector<16x8xf32> -> vector<16x8xf32>
    %215 = vector.extract_strided_slice %192 {offsets = [0, 0], sizes = [8, 32], strides = [1, 1]} : vector<32x32xf32> to vector<8x32xf32>
    %cst_90 = arith.constant dense<0.000000e+00> : vector<16x32xf32>
    %216 = tpu.matmul %214, %215, %cst_90 {dimension_numbers = #tpu.dot_dimension_numbers<[1], [0], [0], [1], [0, 0, 1, 1], [], []>} : vector<16x8xf32>, vector<8x32xf32>, vector<16x32xf32> -> vector<16x32xf32>
    %217 = arith.addf %195, %216 : vector<16x32xf32>
    %218 = vector.extract_strided_slice %188 {offsets = [0, 8], sizes = [16, 8], strides = [1, 1]} : vector<16x32xf32> to vector<16x8xf32>
    %219 = vector.extract_strided_slice %189 {offsets = [0, 8], sizes = [16, 8], strides = [1, 1]} : vector<16x32xf32> to vector<16x8xf32>
    %220 = vector.extract_strided_slice %190 {offsets = [0, 8], sizes = [16, 8], strides = [1, 1]} : vector<16x32xf32> to vector<16x8xf32>
    %221 = tpu.transpose %219, [1, 0] : vector<16x8xf32> -> vector<8x16xf32>
    %cst_91 = arith.constant dense<0.000000e+00> : vector<16x16xf32>
    %222 = tpu.matmul %218, %221, %cst_91 {dimension_numbers = #tpu.dot_dimension_numbers<[1], [0], [0], [1], [0, 0, 1, 1], [], []>} : vector<16x8xf32>, vector<8x16xf32>, vector<16x16xf32> -> vector<16x16xf32>
    %cst_92 = arith.constant 0.353553385 : f32
    %223 = vector.broadcast %cst_92 : f32 to vector<16x16xf32>
    %224 = arith.mulf %222, %223 : vector<16x16xf32>
    %225 = arith.addf %224, %0 : vector<16x16xf32>
    %cst_93 = arith.constant dense<0xFF800000> : vector<16xf32>
    %226 = vector.multi_reduction <maximumf>, %225, %cst_93 [1] : vector<16x16xf32> to vector<16xf32>
    %227 = vector.shape_cast %226 : vector<16xf32> to vector<16x1xf32>
    %228 = vector.broadcast %227 : vector<16x1xf32> to vector<16x16xf32>
    %229 = arith.subf %225, %228 : vector<16x16xf32>
    %230 = math.exp %229 : vector<16x16xf32>
    %cst_94 = arith.constant dense<0.000000e+00> : vector<16xf32>
    %231 = vector.multi_reduction <add>, %230, %cst_94 [1] : vector<16x16xf32> to vector<16xf32>
    %232 = vector.shape_cast %231 : vector<16xf32> to vector<16x1xf32>
    %233 = tpu.reciprocal %232 {approx = true} : vector<16x1xf32> -> vector<16x1xf32>
    %234 = vector.broadcast %233 : vector<16x1xf32> to vector<16x16xf32>
    %235 = arith.mulf %230, %234 : vector<16x16xf32>
    %cst_95 = arith.constant dense<0.000000e+00> : vector<16x8xf32>
    %236 = tpu.matmul %235, %220, %cst_95 {dimension_numbers = #tpu.dot_dimension_numbers<[1], [0], [0], [1], [0, 0, 1, 1], [], []>} : vector<16x16xf32>, vector<16x8xf32>, vector<16x8xf32> -> vector<16x8xf32>
    %237 = vector.extract_strided_slice %192 {offsets = [8, 0], sizes = [8, 32], strides = [1, 1]} : vector<32x32xf32> to vector<8x32xf32>
    %cst_96 = arith.constant dense<0.000000e+00> : vector<16x32xf32>
    %238 = tpu.matmul %236, %237, %cst_96 {dimension_numbers = #tpu.dot_dimension_numbers<[1], [0], [0], [1], [0, 0, 1, 1], [], []>} : vector<16x8xf32>, vector<8x32xf32>, vector<16x32xf32> -> vector<16x32xf32>
    %239 = arith.addf %217, %238 : vector<16x32xf32>
    %240 = vector.extract_strided_slice %188 {offsets = [0, 16], sizes = [16, 8], strides = [1, 1]} : vector<16x32xf32> to vector<16x8xf32>
    %241 = vector.extract_strided_slice %189 {offsets = [0, 16], sizes = [16, 8], strides = [1, 1]} : vector<16x32xf32> to vector<16x8xf32>
    %242 = vector.extract_strided_slice %190 {offsets = [0, 16], sizes = [16, 8], strides = [1, 1]} : vector<16x32xf32> to vector<16x8xf32>
    %243 = tpu.transpose %241, [1, 0] : vector<16x8xf32> -> vector<8x16xf32>
    %cst_97 = arith.constant dense<0.000000e+00> : vector<16x16xf32>
    %244 = tpu.matmul %240, %243, %cst_97 {dimension_numbers = #tpu.dot_dimension_numbers<[1], [0], [0], [1], [0, 0, 1, 1], [], []>} : vector<16x8xf32>, vector<8x16xf32>, vector<16x16xf32> -> vector<16x16xf32>
    %cst_98 = arith.constant 0.353553385 : f32
    %245 = vector.broadcast %cst_98 : f32 to vector<16x16xf32>
    %246 = arith.mulf %244, %245 : vector<16x16xf32>
    %247 = arith.addf %246, %0 : vector<16x16xf32>
    %cst_99 = arith.constant dense<0xFF800000> : vector<16xf32>
    %248 = vector.multi_reduction <maximumf>, %247, %cst_99 [1] : vector<16x16xf32> to vector<16xf32>
    %249 = vector.shape_cast %248 : vector<16xf32> to vector<16x1xf32>
    %250 = vector.broadcast %249 : vector<16x1xf32> to vector<16x16xf32>
    %251 = arith.subf %247, %250 : vector<16x16xf32>
    %252 = math.exp %251 : vector<16x16xf32>
    %cst_100 = arith.constant dense<0.000000e+00> : vector<16xf32>
    %253 = vector.multi_reduction <add>, %252, %cst_100 [1] : vector<16x16xf32> to vector<16xf32>
    %254 = vector.shape_cast %253 : vector<16xf32> to vector<16x1xf32>
    %255 = tpu.reciprocal %254 {approx = true} : vector<16x1xf32> -> vector<16x1xf32>
    %256 = vector.broadcast %255 : vector<16x1xf32> to vector<16x16xf32>
    %257 = arith.mulf %252, %256 : vector<16x16xf32>
    %cst_101 = arith.constant dense<0.000000e+00> : vector<16x8xf32>
    %258 = tpu.matmul %257, %242, %cst_101 {dimension_numbers = #tpu.dot_dimension_numbers<[1], [0], [0], [1], [0, 0, 1, 1], [], []>} : vector<16x16xf32>, vector<16x8xf32>, vector<16x8xf32> -> vector<16x8xf32>
    %259 = vector.extract_strided_slice %192 {offsets = [16, 0], sizes = [8, 32], strides = [1, 1]} : vector<32x32xf32> to vector<8x32xf32>
    %cst_102 = arith.constant dense<0.000000e+00> : vector<16x32xf32>
    %260 = tpu.matmul %258, %259, %cst_102 {dimension_numbers = #tpu.dot_dimension_numbers<[1], [0], [0], [1], [0, 0, 1, 1], [], []>} : vector<16x8xf32>, vector<8x32xf32>, vector<16x32xf32> -> vector<16x32xf32>
    %261 = arith.addf %239, %260 : vector<16x32xf32>
    %262 = vector.extract_strided_slice %188 {offsets = [0, 24], sizes = [16, 8], strides = [1, 1]} : vector<16x32xf32> to vector<16x8xf32>
    %263 = vector.extract_strided_slice %189 {offsets = [0, 24], sizes = [16, 8], strides = [1, 1]} : vector<16x32xf32> to vector<16x8xf32>
    %264 = vector.extract_strided_slice %190 {offsets = [0, 24], sizes = [16, 8], strides = [1, 1]} : vector<16x32xf32> to vector<16x8xf32>
    %265 = tpu.transpose %263, [1, 0] : vector<16x8xf32> -> vector<8x16xf32>
    %cst_103 = arith.constant dense<0.000000e+00> : vector<16x16xf32>
    %266 = tpu.matmul %262, %265, %cst_103 {dimension_numbers = #tpu.dot_dimension_numbers<[1], [0], [0], [1], [0, 0, 1, 1], [], []>} : vector<16x8xf32>, vector<8x16xf32>, vector<16x16xf32> -> vector<16x16xf32>
    %cst_104 = arith.constant 0.353553385 : f32
    %267 = vector.broadcast %cst_104 : f32 to vector<16x16xf32>
    %268 = arith.mulf %266, %267 : vector<16x16xf32>
    %269 = arith.addf %268, %0 : vector<16x16xf32>
    %cst_105 = arith.constant dense<0xFF800000> : vector<16xf32>
    %270 = vector.multi_reduction <maximumf>, %269, %cst_105 [1] : vector<16x16xf32> to vector<16xf32>
    %271 = vector.shape_cast %270 : vector<16xf32> to vector<16x1xf32>
    %272 = vector.broadcast %271 : vector<16x1xf32> to vector<16x16xf32>
    %273 = arith.subf %269, %272 : vector<16x16xf32>
    %274 = math.exp %273 : vector<16x16xf32>
    %cst_106 = arith.constant dense<0.000000e+00> : vector<16xf32>
    %275 = vector.multi_reduction <add>, %274, %cst_106 [1] : vector<16x16xf32> to vector<16xf32>
    %276 = vector.shape_cast %275 : vector<16xf32> to vector<16x1xf32>
    %277 = tpu.reciprocal %276 {approx = true} : vector<16x1xf32> -> vector<16x1xf32>
    %278 = vector.broadcast %277 : vector<16x1xf32> to vector<16x16xf32>
    %279 = arith.mulf %274, %278 : vector<16x16xf32>
    %cst_107 = arith.constant dense<0.000000e+00> : vector<16x8xf32>
    %280 = tpu.matmul %279, %264, %cst_107 {dimension_numbers = #tpu.dot_dimension_numbers<[1], [0], [0], [1], [0, 0, 1, 1], [], []>} : vector<16x16xf32>, vector<16x8xf32>, vector<16x8xf32> -> vector<16x8xf32>
    %281 = vector.extract_strided_slice %192 {offsets = [24, 0], sizes = [8, 32], strides = [1, 1]} : vector<32x32xf32> to vector<8x32xf32>
    %cst_108 = arith.constant dense<0.000000e+00> : vector<16x32xf32>
    %282 = tpu.matmul %280, %281, %cst_108 {dimension_numbers = #tpu.dot_dimension_numbers<[1], [0], [0], [1], [0, 0, 1, 1], [], []>} : vector<16x8xf32>, vector<8x32xf32>, vector<16x32xf32> -> vector<16x32xf32>
    %283 = arith.addf %261, %282 : vector<16x32xf32>
    %284 = vector.broadcast %194 : vector<1x32xf32> to vector<16x32xf32>
    %285 = arith.addf %283, %284 : vector<16x32xf32>
    %c1_109 = arith.constant 1 : index
    %c0_110 = arith.constant 0 : index
    %c0_111 = arith.constant 0 : index
    %286 = vector.load %arg13[%c1_109, %c0_110, %c0_111] : memref<2x4x32xf32, #tpu.memory_space<vmem>>, vector<1x4x32xf32>
    %287 = vector.shape_cast %286 : vector<1x4x32xf32> to vector<4x32xf32>
    %288 = arith.addf %180, %285 : vector<16x32xf32>
    %289 = vector.extract_strided_slice %287 {offsets = [0, 0], sizes = [1, 32], strides = [1, 1]} : vector<4x32xf32> to vector<1x32xf32>
    %290 = vector.extract_strided_slice %287 {offsets = [1, 0], sizes = [1, 32], strides = [1, 1]} : vector<4x32xf32> to vector<1x32xf32>
    %cst_112 = arith.constant dense<0.000000e+00> : vector<16xf32>
    %291 = vector.multi_reduction <add>, %288, %cst_112 [1] : vector<16x32xf32> to vector<16xf32>
    %292 = vector.shape_cast %291 : vector<16xf32> to vector<16x1xf32>
    %cst_113 = arith.constant 3.200000e+01 : f32
    %293 = vector.broadcast %cst_113 : f32 to vector<16x1xf32>
    %294 = arith.divf %292, %293 : vector<16x1xf32>
    %295 = vector.broadcast %294 : vector<16x1xf32> to vector<16x32xf32>
    %296 = arith.subf %288, %295 : vector<16x32xf32>
    %297 = vector.broadcast %294 : vector<16x1xf32> to vector<16x32xf32>
    %298 = arith.subf %288, %297 : vector<16x32xf32>
    %299 = arith.mulf %296, %298 : vector<16x32xf32>
    %cst_114 = arith.constant dense<0.000000e+00> : vector<16xf32>
    %300 = vector.multi_reduction <add>, %299, %cst_114 [1] : vector<16x32xf32> to vector<16xf32>
    %301 = vector.shape_cast %300 : vector<16xf32> to vector<16x1xf32>
    %cst_115 = arith.constant 3.200000e+01 : f32
    %302 = vector.broadcast %cst_115 : f32 to vector<16x1xf32>
    %303 = arith.divf %301, %302 : vector<16x1xf32>
    %304 = vector.broadcast %294 : vector<16x1xf32> to vector<16x32xf32>
    %305 = arith.subf %288, %304 : vector<16x32xf32>
    %cst_116 = arith.constant 9.99999974E-6 : f32
    %306 = vector.broadcast %cst_116 : f32 to vector<16x1xf32>
    %307 = arith.addf %303, %306 : vector<16x1xf32>
    %308 = math.rsqrt %307 : vector<16x1xf32>
    %309 = vector.broadcast %308 : vector<16x1xf32> to vector<16x32xf32>
    %310 = arith.mulf %305, %309 : vector<16x32xf32>
    %311 = vector.broadcast %289 : vector<1x32xf32> to vector<16x32xf32>
    %312 = arith.mulf %310, %311 : vector<16x32xf32>
    %313 = vector.broadcast %290 : vector<1x32xf32> to vector<16x32xf32>
    %314 = arith.addf %312, %313 : vector<16x32xf32>
    %c1_117 = arith.constant 1 : index
    %c0_118 = arith.constant 0 : index
    %c0_119 = arith.constant 0 : index
    %315 = vector.load %arg9[%c1_117, %c0_118, %c0_119] : memref<2x32x64xf32, #tpu.memory_space<vmem>>, vector<1x32x64xf32>
    %316 = vector.shape_cast %315 : vector<1x32x64xf32> to vector<32x64xf32>
    %c1_120 = arith.constant 1 : index
    %c0_121 = arith.constant 0 : index
    %c0_122 = arith.constant 0 : index
    %317 = vector.load %arg10[%c1_120, %c0_121, %c0_122] : memref<2x1x64xf32, #tpu.memory_space<vmem>>, vector<1x1x64xf32>
    %318 = vector.shape_cast %317 : vector<1x1x64xf32> to vector<1x64xf32>
    %c1_123 = arith.constant 1 : index
    %c0_124 = arith.constant 0 : index
    %c0_125 = arith.constant 0 : index
    %319 = vector.load %arg11[%c1_123, %c0_124, %c0_125] : memref<2x64x32xf32, #tpu.memory_space<vmem>>, vector<1x64x32xf32>
    %320 = vector.shape_cast %319 : vector<1x64x32xf32> to vector<64x32xf32>
    %c1_126 = arith.constant 1 : index
    %c0_127 = arith.constant 0 : index
    %c0_128 = arith.constant 0 : index
    %321 = vector.load %arg12[%c1_126, %c0_127, %c0_128] : memref<2x1x32xf32, #tpu.memory_space<vmem>>, vector<1x1x32xf32>
    %322 = vector.shape_cast %321 : vector<1x1x32xf32> to vector<1x32xf32>
    %cst_129 = arith.constant dense<0.000000e+00> : vector<16x64xf32>
    %323 = tpu.matmul %314, %316, %cst_129 {dimension_numbers = #tpu.dot_dimension_numbers<[1], [0], [0], [1], [0, 0, 1, 1], [], []>} : vector<16x32xf32>, vector<32x64xf32>, vector<16x64xf32> -> vector<16x64xf32>
    %324 = vector.broadcast %318 : vector<1x64xf32> to vector<16x64xf32>
    %325 = arith.addf %323, %324 : vector<16x64xf32>
    %cst_130 = arith.constant 0.000000e+00 : f32
    %326 = vector.broadcast %cst_130 : f32 to vector<16x64xf32>
    %327 = arith.maximumf %325, %326 : vector<16x64xf32>
    %cst_131 = arith.constant dense<0.000000e+00> : vector<16x32xf32>
    %328 = tpu.matmul %327, %320, %cst_131 {dimension_numbers = #tpu.dot_dimension_numbers<[1], [0], [0], [1], [0, 0, 1, 1], [], []>} : vector<16x64xf32>, vector<64x32xf32>, vector<16x32xf32> -> vector<16x32xf32>
    %329 = vector.broadcast %322 : vector<1x32xf32> to vector<16x32xf32>
    %330 = arith.addf %328, %329 : vector<16x32xf32>
    %331 = arith.addf %314, %330 : vector<16x32xf32>
    %332 = vector.extract_strided_slice %287 {offsets = [2, 0], sizes = [1, 32], strides = [1, 1]} : vector<4x32xf32> to vector<1x32xf32>
    %333 = vector.extract_strided_slice %287 {offsets = [3, 0], sizes = [1, 32], strides = [1, 1]} : vector<4x32xf32> to vector<1x32xf32>
    %cst_132 = arith.constant dense<0.000000e+00> : vector<16xf32>
    %334 = vector.multi_reduction <add>, %331, %cst_132 [1] : vector<16x32xf32> to vector<16xf32>
    %335 = vector.shape_cast %334 : vector<16xf32> to vector<16x1xf32>
    %cst_133 = arith.constant 3.200000e+01 : f32
    %336 = vector.broadcast %cst_133 : f32 to vector<16x1xf32>
    %337 = arith.divf %335, %336 : vector<16x1xf32>
    %338 = vector.broadcast %337 : vector<16x1xf32> to vector<16x32xf32>
    %339 = arith.subf %331, %338 : vector<16x32xf32>
    %340 = vector.broadcast %337 : vector<16x1xf32> to vector<16x32xf32>
    %341 = arith.subf %331, %340 : vector<16x32xf32>
    %342 = arith.mulf %339, %341 : vector<16x32xf32>
    %cst_134 = arith.constant dense<0.000000e+00> : vector<16xf32>
    %343 = vector.multi_reduction <add>, %342, %cst_134 [1] : vector<16x32xf32> to vector<16xf32>
    %344 = vector.shape_cast %343 : vector<16xf32> to vector<16x1xf32>
    %cst_135 = arith.constant 3.200000e+01 : f32
    %345 = vector.broadcast %cst_135 : f32 to vector<16x1xf32>
    %346 = arith.divf %344, %345 : vector<16x1xf32>
    %347 = vector.broadcast %337 : vector<16x1xf32> to vector<16x32xf32>
    %348 = arith.subf %331, %347 : vector<16x32xf32>
    %cst_136 = arith.constant 9.99999974E-6 : f32
    %349 = vector.broadcast %cst_136 : f32 to vector<16x1xf32>
    %350 = arith.addf %346, %349 : vector<16x1xf32>
    %351 = math.rsqrt %350 : vector<16x1xf32>
    %352 = vector.broadcast %351 : vector<16x1xf32> to vector<16x32xf32>
    %353 = arith.mulf %348, %352 : vector<16x32xf32>
    %354 = vector.broadcast %332 : vector<1x32xf32> to vector<16x32xf32>
    %355 = arith.mulf %353, %354 : vector<16x32xf32>
    %356 = vector.broadcast %333 : vector<1x32xf32> to vector<16x32xf32>
    %357 = arith.addf %355, %356 : vector<16x32xf32>
    %c0_137 = arith.constant 0 : index
    %c0_138 = arith.constant 0 : index
    %358 = vector.load %arg1[%c0_137, %c0_138] : memref<16x32xf32, #tpu.memory_space<vmem>>, vector<16x32xf32>
    %c0_139 = arith.constant 0 : index
    %c0_140 = arith.constant 0 : index
    %c0_141 = arith.constant 0 : index
    %359 = vector.load %arg28[%c0_139, %c0_140, %c0_141] : memref<2x6x32xf32, #tpu.memory_space<vmem>>, vector<1x6x32xf32>
    %360 = vector.shape_cast %359 : vector<1x6x32xf32> to vector<6x32xf32>
    %c0_142 = arith.constant 0 : index
    %c0_143 = arith.constant 0 : index
    %c0_144 = arith.constant 0 : index
    %361 = vector.load %arg14[%c0_142, %c0_143, %c0_144] : memref<2x32x96xf32, #tpu.memory_space<vmem>>, vector<1x32x96xf32>
    %362 = vector.shape_cast %361 : vector<1x32x96xf32> to vector<32x96xf32>
    %cst_145 = arith.constant dense<0.000000e+00> : vector<16x96xf32>
    %363 = tpu.matmul %358, %362, %cst_145 {dimension_numbers = #tpu.dot_dimension_numbers<[1], [0], [0], [1], [0, 0, 1, 1], [], []>} : vector<16x32xf32>, vector<32x96xf32>, vector<16x96xf32> -> vector<16x96xf32>
    %c0_146 = arith.constant 0 : index
    %c0_147 = arith.constant 0 : index
    %c0_148 = arith.constant 0 : index
    %364 = vector.load %arg15[%c0_146, %c0_147, %c0_148] : memref<2x1x96xf32, #tpu.memory_space<vmem>>, vector<1x1x96xf32>
    %365 = vector.shape_cast %364 : vector<1x1x96xf32> to vector<1x96xf32>
    %366 = vector.broadcast %365 : vector<1x96xf32> to vector<16x96xf32>
    %367 = arith.addf %363, %366 : vector<16x96xf32>
    %368 = vector.extract_strided_slice %367 {offsets = [0, 0], sizes = [16, 32], strides = [1, 1]} : vector<16x96xf32> to vector<16x32xf32>
    %369 = vector.extract_strided_slice %367 {offsets = [0, 32], sizes = [16, 32], strides = [1, 1]} : vector<16x96xf32> to vector<16x32xf32>
    %370 = vector.extract_strided_slice %367 {offsets = [0, 64], sizes = [16, 32], strides = [1, 1]} : vector<16x96xf32> to vector<16x32xf32>
    %c0_149 = arith.constant 0 : index
    %c0_150 = arith.constant 0 : index
    %c0_151 = arith.constant 0 : index
    %371 = vector.load %arg16[%c0_149, %c0_150, %c0_151] : memref<2x32x32xf32, #tpu.memory_space<vmem>>, vector<1x32x32xf32>
    %372 = vector.shape_cast %371 : vector<1x32x32xf32> to vector<32x32xf32>
    %c0_152 = arith.constant 0 : index
    %c0_153 = arith.constant 0 : index
    %c0_154 = arith.constant 0 : index
    %373 = vector.load %arg17[%c0_152, %c0_153, %c0_154] : memref<2x1x32xf32, #tpu.memory_space<vmem>>, vector<1x1x32xf32>
    %374 = vector.shape_cast %373 : vector<1x1x32xf32> to vector<1x32xf32>
    %cst_155 = arith.constant 0.000000e+00 : f32
    %375 = vector.broadcast %cst_155 : f32 to vector<16x32xf32>
    %376 = vector.extract_strided_slice %368 {offsets = [0, 0], sizes = [16, 8], strides = [1, 1]} : vector<16x32xf32> to vector<16x8xf32>
    %377 = vector.extract_strided_slice %369 {offsets = [0, 0], sizes = [16, 8], strides = [1, 1]} : vector<16x32xf32> to vector<16x8xf32>
    %378 = vector.extract_strided_slice %370 {offsets = [0, 0], sizes = [16, 8], strides = [1, 1]} : vector<16x32xf32> to vector<16x8xf32>
    %379 = tpu.transpose %377, [1, 0] : vector<16x8xf32> -> vector<8x16xf32>
    %cst_156 = arith.constant dense<0.000000e+00> : vector<16x16xf32>
    %380 = tpu.matmul %376, %379, %cst_156 {dimension_numbers = #tpu.dot_dimension_numbers<[1], [0], [0], [1], [0, 0, 1, 1], [], []>} : vector<16x8xf32>, vector<8x16xf32>, vector<16x16xf32> -> vector<16x16xf32>
    %cst_157 = arith.constant 0.353553385 : f32
    %381 = vector.broadcast %cst_157 : f32 to vector<16x16xf32>
    %382 = arith.mulf %380, %381 : vector<16x16xf32>
    %383 = arith.addf %382, %1 : vector<16x16xf32>
    %cst_158 = arith.constant dense<0xFF800000> : vector<16xf32>
    %384 = vector.multi_reduction <maximumf>, %383, %cst_158 [1] : vector<16x16xf32> to vector<16xf32>
    %385 = vector.shape_cast %384 : vector<16xf32> to vector<16x1xf32>
    %386 = vector.broadcast %385 : vector<16x1xf32> to vector<16x16xf32>
    %387 = arith.subf %383, %386 : vector<16x16xf32>
    %388 = math.exp %387 : vector<16x16xf32>
    %cst_159 = arith.constant dense<0.000000e+00> : vector<16xf32>
    %389 = vector.multi_reduction <add>, %388, %cst_159 [1] : vector<16x16xf32> to vector<16xf32>
    %390 = vector.shape_cast %389 : vector<16xf32> to vector<16x1xf32>
    %391 = tpu.reciprocal %390 {approx = true} : vector<16x1xf32> -> vector<16x1xf32>
    %392 = vector.broadcast %391 : vector<16x1xf32> to vector<16x16xf32>
    %393 = arith.mulf %388, %392 : vector<16x16xf32>
    %cst_160 = arith.constant dense<0.000000e+00> : vector<16x8xf32>
    %394 = tpu.matmul %393, %378, %cst_160 {dimension_numbers = #tpu.dot_dimension_numbers<[1], [0], [0], [1], [0, 0, 1, 1], [], []>} : vector<16x16xf32>, vector<16x8xf32>, vector<16x8xf32> -> vector<16x8xf32>
    %395 = vector.extract_strided_slice %372 {offsets = [0, 0], sizes = [8, 32], strides = [1, 1]} : vector<32x32xf32> to vector<8x32xf32>
    %cst_161 = arith.constant dense<0.000000e+00> : vector<16x32xf32>
    %396 = tpu.matmul %394, %395, %cst_161 {dimension_numbers = #tpu.dot_dimension_numbers<[1], [0], [0], [1], [0, 0, 1, 1], [], []>} : vector<16x8xf32>, vector<8x32xf32>, vector<16x32xf32> -> vector<16x32xf32>
    %397 = arith.addf %375, %396 : vector<16x32xf32>
    %398 = vector.extract_strided_slice %368 {offsets = [0, 8], sizes = [16, 8], strides = [1, 1]} : vector<16x32xf32> to vector<16x8xf32>
    %399 = vector.extract_strided_slice %369 {offsets = [0, 8], sizes = [16, 8], strides = [1, 1]} : vector<16x32xf32> to vector<16x8xf32>
    %400 = vector.extract_strided_slice %370 {offsets = [0, 8], sizes = [16, 8], strides = [1, 1]} : vector<16x32xf32> to vector<16x8xf32>
    %401 = tpu.transpose %399, [1, 0] : vector<16x8xf32> -> vector<8x16xf32>
    %cst_162 = arith.constant dense<0.000000e+00> : vector<16x16xf32>
    %402 = tpu.matmul %398, %401, %cst_162 {dimension_numbers = #tpu.dot_dimension_numbers<[1], [0], [0], [1], [0, 0, 1, 1], [], []>} : vector<16x8xf32>, vector<8x16xf32>, vector<16x16xf32> -> vector<16x16xf32>
    %cst_163 = arith.constant 0.353553385 : f32
    %403 = vector.broadcast %cst_163 : f32 to vector<16x16xf32>
    %404 = arith.mulf %402, %403 : vector<16x16xf32>
    %405 = arith.addf %404, %1 : vector<16x16xf32>
    %cst_164 = arith.constant dense<0xFF800000> : vector<16xf32>
    %406 = vector.multi_reduction <maximumf>, %405, %cst_164 [1] : vector<16x16xf32> to vector<16xf32>
    %407 = vector.shape_cast %406 : vector<16xf32> to vector<16x1xf32>
    %408 = vector.broadcast %407 : vector<16x1xf32> to vector<16x16xf32>
    %409 = arith.subf %405, %408 : vector<16x16xf32>
    %410 = math.exp %409 : vector<16x16xf32>
    %cst_165 = arith.constant dense<0.000000e+00> : vector<16xf32>
    %411 = vector.multi_reduction <add>, %410, %cst_165 [1] : vector<16x16xf32> to vector<16xf32>
    %412 = vector.shape_cast %411 : vector<16xf32> to vector<16x1xf32>
    %413 = tpu.reciprocal %412 {approx = true} : vector<16x1xf32> -> vector<16x1xf32>
    %414 = vector.broadcast %413 : vector<16x1xf32> to vector<16x16xf32>
    %415 = arith.mulf %410, %414 : vector<16x16xf32>
    %cst_166 = arith.constant dense<0.000000e+00> : vector<16x8xf32>
    %416 = tpu.matmul %415, %400, %cst_166 {dimension_numbers = #tpu.dot_dimension_numbers<[1], [0], [0], [1], [0, 0, 1, 1], [], []>} : vector<16x16xf32>, vector<16x8xf32>, vector<16x8xf32> -> vector<16x8xf32>
    %417 = vector.extract_strided_slice %372 {offsets = [8, 0], sizes = [8, 32], strides = [1, 1]} : vector<32x32xf32> to vector<8x32xf32>
    %cst_167 = arith.constant dense<0.000000e+00> : vector<16x32xf32>
    %418 = tpu.matmul %416, %417, %cst_167 {dimension_numbers = #tpu.dot_dimension_numbers<[1], [0], [0], [1], [0, 0, 1, 1], [], []>} : vector<16x8xf32>, vector<8x32xf32>, vector<16x32xf32> -> vector<16x32xf32>
    %419 = arith.addf %397, %418 : vector<16x32xf32>
    %420 = vector.extract_strided_slice %368 {offsets = [0, 16], sizes = [16, 8], strides = [1, 1]} : vector<16x32xf32> to vector<16x8xf32>
    %421 = vector.extract_strided_slice %369 {offsets = [0, 16], sizes = [16, 8], strides = [1, 1]} : vector<16x32xf32> to vector<16x8xf32>
    %422 = vector.extract_strided_slice %370 {offsets = [0, 16], sizes = [16, 8], strides = [1, 1]} : vector<16x32xf32> to vector<16x8xf32>
    %423 = tpu.transpose %421, [1, 0] : vector<16x8xf32> -> vector<8x16xf32>
    %cst_168 = arith.constant dense<0.000000e+00> : vector<16x16xf32>
    %424 = tpu.matmul %420, %423, %cst_168 {dimension_numbers = #tpu.dot_dimension_numbers<[1], [0], [0], [1], [0, 0, 1, 1], [], []>} : vector<16x8xf32>, vector<8x16xf32>, vector<16x16xf32> -> vector<16x16xf32>
    %cst_169 = arith.constant 0.353553385 : f32
    %425 = vector.broadcast %cst_169 : f32 to vector<16x16xf32>
    %426 = arith.mulf %424, %425 : vector<16x16xf32>
    %427 = arith.addf %426, %1 : vector<16x16xf32>
    %cst_170 = arith.constant dense<0xFF800000> : vector<16xf32>
    %428 = vector.multi_reduction <maximumf>, %427, %cst_170 [1] : vector<16x16xf32> to vector<16xf32>
    %429 = vector.shape_cast %428 : vector<16xf32> to vector<16x1xf32>
    %430 = vector.broadcast %429 : vector<16x1xf32> to vector<16x16xf32>
    %431 = arith.subf %427, %430 : vector<16x16xf32>
    %432 = math.exp %431 : vector<16x16xf32>
    %cst_171 = arith.constant dense<0.000000e+00> : vector<16xf32>
    %433 = vector.multi_reduction <add>, %432, %cst_171 [1] : vector<16x16xf32> to vector<16xf32>
    %434 = vector.shape_cast %433 : vector<16xf32> to vector<16x1xf32>
    %435 = tpu.reciprocal %434 {approx = true} : vector<16x1xf32> -> vector<16x1xf32>
    %436 = vector.broadcast %435 : vector<16x1xf32> to vector<16x16xf32>
    %437 = arith.mulf %432, %436 : vector<16x16xf32>
    %cst_172 = arith.constant dense<0.000000e+00> : vector<16x8xf32>
    %438 = tpu.matmul %437, %422, %cst_172 {dimension_numbers = #tpu.dot_dimension_numbers<[1], [0], [0], [1], [0, 0, 1, 1], [], []>} : vector<16x16xf32>, vector<16x8xf32>, vector<16x8xf32> -> vector<16x8xf32>
    %439 = vector.extract_strided_slice %372 {offsets = [16, 0], sizes = [8, 32], strides = [1, 1]} : vector<32x32xf32> to vector<8x32xf32>
    %cst_173 = arith.constant dense<0.000000e+00> : vector<16x32xf32>
    %440 = tpu.matmul %438, %439, %cst_173 {dimension_numbers = #tpu.dot_dimension_numbers<[1], [0], [0], [1], [0, 0, 1, 1], [], []>} : vector<16x8xf32>, vector<8x32xf32>, vector<16x32xf32> -> vector<16x32xf32>
    %441 = arith.addf %419, %440 : vector<16x32xf32>
    %442 = vector.extract_strided_slice %368 {offsets = [0, 24], sizes = [16, 8], strides = [1, 1]} : vector<16x32xf32> to vector<16x8xf32>
    %443 = vector.extract_strided_slice %369 {offsets = [0, 24], sizes = [16, 8], strides = [1, 1]} : vector<16x32xf32> to vector<16x8xf32>
    %444 = vector.extract_strided_slice %370 {offsets = [0, 24], sizes = [16, 8], strides = [1, 1]} : vector<16x32xf32> to vector<16x8xf32>
    %445 = tpu.transpose %443, [1, 0] : vector<16x8xf32> -> vector<8x16xf32>
    %cst_174 = arith.constant dense<0.000000e+00> : vector<16x16xf32>
    %446 = tpu.matmul %442, %445, %cst_174 {dimension_numbers = #tpu.dot_dimension_numbers<[1], [0], [0], [1], [0, 0, 1, 1], [], []>} : vector<16x8xf32>, vector<8x16xf32>, vector<16x16xf32> -> vector<16x16xf32>
    %cst_175 = arith.constant 0.353553385 : f32
    %447 = vector.broadcast %cst_175 : f32 to vector<16x16xf32>
    %448 = arith.mulf %446, %447 : vector<16x16xf32>
    %449 = arith.addf %448, %1 : vector<16x16xf32>
    %cst_176 = arith.constant dense<0xFF800000> : vector<16xf32>
    %450 = vector.multi_reduction <maximumf>, %449, %cst_176 [1] : vector<16x16xf32> to vector<16xf32>
    %451 = vector.shape_cast %450 : vector<16xf32> to vector<16x1xf32>
    %452 = vector.broadcast %451 : vector<16x1xf32> to vector<16x16xf32>
    %453 = arith.subf %449, %452 : vector<16x16xf32>
    %454 = math.exp %453 : vector<16x16xf32>
    %cst_177 = arith.constant dense<0.000000e+00> : vector<16xf32>
    %455 = vector.multi_reduction <add>, %454, %cst_177 [1] : vector<16x16xf32> to vector<16xf32>
    %456 = vector.shape_cast %455 : vector<16xf32> to vector<16x1xf32>
    %457 = tpu.reciprocal %456 {approx = true} : vector<16x1xf32> -> vector<16x1xf32>
    %458 = vector.broadcast %457 : vector<16x1xf32> to vector<16x16xf32>
    %459 = arith.mulf %454, %458 : vector<16x16xf32>
    %cst_178 = arith.constant dense<0.000000e+00> : vector<16x8xf32>
    %460 = tpu.matmul %459, %444, %cst_178 {dimension_numbers = #tpu.dot_dimension_numbers<[1], [0], [0], [1], [0, 0, 1, 1], [], []>} : vector<16x16xf32>, vector<16x8xf32>, vector<16x8xf32> -> vector<16x8xf32>
    %461 = vector.extract_strided_slice %372 {offsets = [24, 0], sizes = [8, 32], strides = [1, 1]} : vector<32x32xf32> to vector<8x32xf32>
    %cst_179 = arith.constant dense<0.000000e+00> : vector<16x32xf32>
    %462 = tpu.matmul %460, %461, %cst_179 {dimension_numbers = #tpu.dot_dimension_numbers<[1], [0], [0], [1], [0, 0, 1, 1], [], []>} : vector<16x8xf32>, vector<8x32xf32>, vector<16x32xf32> -> vector<16x32xf32>
    %463 = arith.addf %441, %462 : vector<16x32xf32>
    %464 = vector.broadcast %374 : vector<1x32xf32> to vector<16x32xf32>
    %465 = arith.addf %463, %464 : vector<16x32xf32>
    %466 = arith.addf %358, %465 : vector<16x32xf32>
    %467 = vector.extract_strided_slice %360 {offsets = [0, 0], sizes = [1, 32], strides = [1, 1]} : vector<6x32xf32> to vector<1x32xf32>
    %468 = vector.extract_strided_slice %360 {offsets = [1, 0], sizes = [1, 32], strides = [1, 1]} : vector<6x32xf32> to vector<1x32xf32>
    %cst_180 = arith.constant dense<0.000000e+00> : vector<16xf32>
    %469 = vector.multi_reduction <add>, %466, %cst_180 [1] : vector<16x32xf32> to vector<16xf32>
    %470 = vector.shape_cast %469 : vector<16xf32> to vector<16x1xf32>
    %cst_181 = arith.constant 3.200000e+01 : f32
    %471 = vector.broadcast %cst_181 : f32 to vector<16x1xf32>
    %472 = arith.divf %470, %471 : vector<16x1xf32>
    %473 = vector.broadcast %472 : vector<16x1xf32> to vector<16x32xf32>
    %474 = arith.subf %466, %473 : vector<16x32xf32>
    %475 = vector.broadcast %472 : vector<16x1xf32> to vector<16x32xf32>
    %476 = arith.subf %466, %475 : vector<16x32xf32>
    %477 = arith.mulf %474, %476 : vector<16x32xf32>
    %cst_182 = arith.constant dense<0.000000e+00> : vector<16xf32>
    %478 = vector.multi_reduction <add>, %477, %cst_182 [1] : vector<16x32xf32> to vector<16xf32>
    %479 = vector.shape_cast %478 : vector<16xf32> to vector<16x1xf32>
    %cst_183 = arith.constant 3.200000e+01 : f32
    %480 = vector.broadcast %cst_183 : f32 to vector<16x1xf32>
    %481 = arith.divf %479, %480 : vector<16x1xf32>
    %482 = vector.broadcast %472 : vector<16x1xf32> to vector<16x32xf32>
    %483 = arith.subf %466, %482 : vector<16x32xf32>
    %cst_184 = arith.constant 9.99999974E-6 : f32
    %484 = vector.broadcast %cst_184 : f32 to vector<16x1xf32>
    %485 = arith.addf %481, %484 : vector<16x1xf32>
    %486 = math.rsqrt %485 : vector<16x1xf32>
    %487 = vector.broadcast %486 : vector<16x1xf32> to vector<16x32xf32>
    %488 = arith.mulf %483, %487 : vector<16x32xf32>
    %489 = vector.broadcast %467 : vector<1x32xf32> to vector<16x32xf32>
    %490 = arith.mulf %488, %489 : vector<16x32xf32>
    %491 = vector.broadcast %468 : vector<1x32xf32> to vector<16x32xf32>
    %492 = arith.addf %490, %491 : vector<16x32xf32>
    %c0_185 = arith.constant 0 : index
    %c0_186 = arith.constant 0 : index
    %c0_187 = arith.constant 0 : index
    %493 = vector.load %arg18[%c0_185, %c0_186, %c0_187] : memref<2x32x32xf32, #tpu.memory_space<vmem>>, vector<1x32x32xf32>
    %494 = vector.shape_cast %493 : vector<1x32x32xf32> to vector<32x32xf32>
    %cst_188 = arith.constant dense<0.000000e+00> : vector<16x32xf32>
    %495 = tpu.matmul %492, %494, %cst_188 {dimension_numbers = #tpu.dot_dimension_numbers<[1], [0], [0], [1], [0, 0, 1, 1], [], []>} : vector<16x32xf32>, vector<32x32xf32>, vector<16x32xf32> -> vector<16x32xf32>
    %c0_189 = arith.constant 0 : index
    %c0_190 = arith.constant 0 : index
    %c0_191 = arith.constant 0 : index
    %496 = vector.load %arg19[%c0_189, %c0_190, %c0_191] : memref<2x1x32xf32, #tpu.memory_space<vmem>>, vector<1x1x32xf32>
    %497 = vector.shape_cast %496 : vector<1x1x32xf32> to vector<1x32xf32>
    %498 = vector.broadcast %497 : vector<1x32xf32> to vector<16x32xf32>
    %499 = arith.addf %495, %498 : vector<16x32xf32>
    %c0_192 = arith.constant 0 : index
    %c0_193 = arith.constant 0 : index
    %c0_194 = arith.constant 0 : index
    %500 = vector.load %arg20[%c0_192, %c0_193, %c0_194] : memref<2x32x64xf32, #tpu.memory_space<vmem>>, vector<1x32x64xf32>
    %501 = vector.shape_cast %500 : vector<1x32x64xf32> to vector<32x64xf32>
    %cst_195 = arith.constant dense<0.000000e+00> : vector<16x64xf32>
    %502 = tpu.matmul %357, %501, %cst_195 {dimension_numbers = #tpu.dot_dimension_numbers<[1], [0], [0], [1], [0, 0, 1, 1], [], []>} : vector<16x32xf32>, vector<32x64xf32>, vector<16x64xf32> -> vector<16x64xf32>
    %c0_196 = arith.constant 0 : index
    %c0_197 = arith.constant 0 : index
    %c0_198 = arith.constant 0 : index
    %503 = vector.load %arg21[%c0_196, %c0_197, %c0_198] : memref<2x1x64xf32, #tpu.memory_space<vmem>>, vector<1x1x64xf32>
    %504 = vector.shape_cast %503 : vector<1x1x64xf32> to vector<1x64xf32>
    %505 = vector.broadcast %504 : vector<1x64xf32> to vector<16x64xf32>
    %506 = arith.addf %502, %505 : vector<16x64xf32>
    %507 = vector.extract_strided_slice %506 {offsets = [0, 0], sizes = [16, 32], strides = [1, 1]} : vector<16x64xf32> to vector<16x32xf32>
    %508 = vector.extract_strided_slice %506 {offsets = [0, 32], sizes = [16, 32], strides = [1, 1]} : vector<16x64xf32> to vector<16x32xf32>
    %c0_199 = arith.constant 0 : index
    %c0_200 = arith.constant 0 : index
    %c0_201 = arith.constant 0 : index
    %509 = vector.load %arg22[%c0_199, %c0_200, %c0_201] : memref<2x32x32xf32, #tpu.memory_space<vmem>>, vector<1x32x32xf32>
    %510 = vector.shape_cast %509 : vector<1x32x32xf32> to vector<32x32xf32>
    %c0_202 = arith.constant 0 : index
    %c0_203 = arith.constant 0 : index
    %c0_204 = arith.constant 0 : index
    %511 = vector.load %arg23[%c0_202, %c0_203, %c0_204] : memref<2x1x32xf32, #tpu.memory_space<vmem>>, vector<1x1x32xf32>
    %512 = vector.shape_cast %511 : vector<1x1x32xf32> to vector<1x32xf32>
    %cst_205 = arith.constant 0.000000e+00 : f32
    %513 = vector.broadcast %cst_205 : f32 to vector<16x32xf32>
    %514 = vector.extract_strided_slice %499 {offsets = [0, 0], sizes = [16, 8], strides = [1, 1]} : vector<16x32xf32> to vector<16x8xf32>
    %515 = vector.extract_strided_slice %507 {offsets = [0, 0], sizes = [16, 8], strides = [1, 1]} : vector<16x32xf32> to vector<16x8xf32>
    %516 = vector.extract_strided_slice %508 {offsets = [0, 0], sizes = [16, 8], strides = [1, 1]} : vector<16x32xf32> to vector<16x8xf32>
    %517 = tpu.transpose %515, [1, 0] : vector<16x8xf32> -> vector<8x16xf32>
    %cst_206 = arith.constant dense<0.000000e+00> : vector<16x16xf32>
    %518 = tpu.matmul %514, %517, %cst_206 {dimension_numbers = #tpu.dot_dimension_numbers<[1], [0], [0], [1], [0, 0, 1, 1], [], []>} : vector<16x8xf32>, vector<8x16xf32>, vector<16x16xf32> -> vector<16x16xf32>
    %cst_207 = arith.constant 0.353553385 : f32
    %519 = vector.broadcast %cst_207 : f32 to vector<16x16xf32>
    %520 = arith.mulf %518, %519 : vector<16x16xf32>
    %521 = arith.addf %520, %2 : vector<16x16xf32>
    %cst_208 = arith.constant dense<0xFF800000> : vector<16xf32>
    %522 = vector.multi_reduction <maximumf>, %521, %cst_208 [1] : vector<16x16xf32> to vector<16xf32>
    %523 = vector.shape_cast %522 : vector<16xf32> to vector<16x1xf32>
    %524 = vector.broadcast %523 : vector<16x1xf32> to vector<16x16xf32>
    %525 = arith.subf %521, %524 : vector<16x16xf32>
    %526 = math.exp %525 : vector<16x16xf32>
    %cst_209 = arith.constant dense<0.000000e+00> : vector<16xf32>
    %527 = vector.multi_reduction <add>, %526, %cst_209 [1] : vector<16x16xf32> to vector<16xf32>
    %528 = vector.shape_cast %527 : vector<16xf32> to vector<16x1xf32>
    %529 = tpu.reciprocal %528 {approx = true} : vector<16x1xf32> -> vector<16x1xf32>
    %530 = vector.broadcast %529 : vector<16x1xf32> to vector<16x16xf32>
    %531 = arith.mulf %526, %530 : vector<16x16xf32>
    %cst_210 = arith.constant dense<0.000000e+00> : vector<16x8xf32>
    %532 = tpu.matmul %531, %516, %cst_210 {dimension_numbers = #tpu.dot_dimension_numbers<[1], [0], [0], [1], [0, 0, 1, 1], [], []>} : vector<16x16xf32>, vector<16x8xf32>, vector<16x8xf32> -> vector<16x8xf32>
    %533 = vector.extract_strided_slice %510 {offsets = [0, 0], sizes = [8, 32], strides = [1, 1]} : vector<32x32xf32> to vector<8x32xf32>
    %cst_211 = arith.constant dense<0.000000e+00> : vector<16x32xf32>
    %534 = tpu.matmul %532, %533, %cst_211 {dimension_numbers = #tpu.dot_dimension_numbers<[1], [0], [0], [1], [0, 0, 1, 1], [], []>} : vector<16x8xf32>, vector<8x32xf32>, vector<16x32xf32> -> vector<16x32xf32>
    %535 = arith.addf %513, %534 : vector<16x32xf32>
    %536 = vector.extract_strided_slice %499 {offsets = [0, 8], sizes = [16, 8], strides = [1, 1]} : vector<16x32xf32> to vector<16x8xf32>
    %537 = vector.extract_strided_slice %507 {offsets = [0, 8], sizes = [16, 8], strides = [1, 1]} : vector<16x32xf32> to vector<16x8xf32>
    %538 = vector.extract_strided_slice %508 {offsets = [0, 8], sizes = [16, 8], strides = [1, 1]} : vector<16x32xf32> to vector<16x8xf32>
    %539 = tpu.transpose %537, [1, 0] : vector<16x8xf32> -> vector<8x16xf32>
    %cst_212 = arith.constant dense<0.000000e+00> : vector<16x16xf32>
    %540 = tpu.matmul %536, %539, %cst_212 {dimension_numbers = #tpu.dot_dimension_numbers<[1], [0], [0], [1], [0, 0, 1, 1], [], []>} : vector<16x8xf32>, vector<8x16xf32>, vector<16x16xf32> -> vector<16x16xf32>
    %cst_213 = arith.constant 0.353553385 : f32
    %541 = vector.broadcast %cst_213 : f32 to vector<16x16xf32>
    %542 = arith.mulf %540, %541 : vector<16x16xf32>
    %543 = arith.addf %542, %2 : vector<16x16xf32>
    %cst_214 = arith.constant dense<0xFF800000> : vector<16xf32>
    %544 = vector.multi_reduction <maximumf>, %543, %cst_214 [1] : vector<16x16xf32> to vector<16xf32>
    %545 = vector.shape_cast %544 : vector<16xf32> to vector<16x1xf32>
    %546 = vector.broadcast %545 : vector<16x1xf32> to vector<16x16xf32>
    %547 = arith.subf %543, %546 : vector<16x16xf32>
    %548 = math.exp %547 : vector<16x16xf32>
    %cst_215 = arith.constant dense<0.000000e+00> : vector<16xf32>
    %549 = vector.multi_reduction <add>, %548, %cst_215 [1] : vector<16x16xf32> to vector<16xf32>
    %550 = vector.shape_cast %549 : vector<16xf32> to vector<16x1xf32>
    %551 = tpu.reciprocal %550 {approx = true} : vector<16x1xf32> -> vector<16x1xf32>
    %552 = vector.broadcast %551 : vector<16x1xf32> to vector<16x16xf32>
    %553 = arith.mulf %548, %552 : vector<16x16xf32>
    %cst_216 = arith.constant dense<0.000000e+00> : vector<16x8xf32>
    %554 = tpu.matmul %553, %538, %cst_216 {dimension_numbers = #tpu.dot_dimension_numbers<[1], [0], [0], [1], [0, 0, 1, 1], [], []>} : vector<16x16xf32>, vector<16x8xf32>, vector<16x8xf32> -> vector<16x8xf32>
    %555 = vector.extract_strided_slice %510 {offsets = [8, 0], sizes = [8, 32], strides = [1, 1]} : vector<32x32xf32> to vector<8x32xf32>
    %cst_217 = arith.constant dense<0.000000e+00> : vector<16x32xf32>
    %556 = tpu.matmul %554, %555, %cst_217 {dimension_numbers = #tpu.dot_dimension_numbers<[1], [0], [0], [1], [0, 0, 1, 1], [], []>} : vector<16x8xf32>, vector<8x32xf32>, vector<16x32xf32> -> vector<16x32xf32>
    %557 = arith.addf %535, %556 : vector<16x32xf32>
    %558 = vector.extract_strided_slice %499 {offsets = [0, 16], sizes = [16, 8], strides = [1, 1]} : vector<16x32xf32> to vector<16x8xf32>
    %559 = vector.extract_strided_slice %507 {offsets = [0, 16], sizes = [16, 8], strides = [1, 1]} : vector<16x32xf32> to vector<16x8xf32>
    %560 = vector.extract_strided_slice %508 {offsets = [0, 16], sizes = [16, 8], strides = [1, 1]} : vector<16x32xf32> to vector<16x8xf32>
    %561 = tpu.transpose %559, [1, 0] : vector<16x8xf32> -> vector<8x16xf32>
    %cst_218 = arith.constant dense<0.000000e+00> : vector<16x16xf32>
    %562 = tpu.matmul %558, %561, %cst_218 {dimension_numbers = #tpu.dot_dimension_numbers<[1], [0], [0], [1], [0, 0, 1, 1], [], []>} : vector<16x8xf32>, vector<8x16xf32>, vector<16x16xf32> -> vector<16x16xf32>
    %cst_219 = arith.constant 0.353553385 : f32
    %563 = vector.broadcast %cst_219 : f32 to vector<16x16xf32>
    %564 = arith.mulf %562, %563 : vector<16x16xf32>
    %565 = arith.addf %564, %2 : vector<16x16xf32>
    %cst_220 = arith.constant dense<0xFF800000> : vector<16xf32>
    %566 = vector.multi_reduction <maximumf>, %565, %cst_220 [1] : vector<16x16xf32> to vector<16xf32>
    %567 = vector.shape_cast %566 : vector<16xf32> to vector<16x1xf32>
    %568 = vector.broadcast %567 : vector<16x1xf32> to vector<16x16xf32>
    %569 = arith.subf %565, %568 : vector<16x16xf32>
    %570 = math.exp %569 : vector<16x16xf32>
    %cst_221 = arith.constant dense<0.000000e+00> : vector<16xf32>
    %571 = vector.multi_reduction <add>, %570, %cst_221 [1] : vector<16x16xf32> to vector<16xf32>
    %572 = vector.shape_cast %571 : vector<16xf32> to vector<16x1xf32>
    %573 = tpu.reciprocal %572 {approx = true} : vector<16x1xf32> -> vector<16x1xf32>
    %574 = vector.broadcast %573 : vector<16x1xf32> to vector<16x16xf32>
    %575 = arith.mulf %570, %574 : vector<16x16xf32>
    %cst_222 = arith.constant dense<0.000000e+00> : vector<16x8xf32>
    %576 = tpu.matmul %575, %560, %cst_222 {dimension_numbers = #tpu.dot_dimension_numbers<[1], [0], [0], [1], [0, 0, 1, 1], [], []>} : vector<16x16xf32>, vector<16x8xf32>, vector<16x8xf32> -> vector<16x8xf32>
    %577 = vector.extract_strided_slice %510 {offsets = [16, 0], sizes = [8, 32], strides = [1, 1]} : vector<32x32xf32> to vector<8x32xf32>
    %cst_223 = arith.constant dense<0.000000e+00> : vector<16x32xf32>
    %578 = tpu.matmul %576, %577, %cst_223 {dimension_numbers = #tpu.dot_dimension_numbers<[1], [0], [0], [1], [0, 0, 1, 1], [], []>} : vector<16x8xf32>, vector<8x32xf32>, vector<16x32xf32> -> vector<16x32xf32>
    %579 = arith.addf %557, %578 : vector<16x32xf32>
    %580 = vector.extract_strided_slice %499 {offsets = [0, 24], sizes = [16, 8], strides = [1, 1]} : vector<16x32xf32> to vector<16x8xf32>
    %581 = vector.extract_strided_slice %507 {offsets = [0, 24], sizes = [16, 8], strides = [1, 1]} : vector<16x32xf32> to vector<16x8xf32>
    %582 = vector.extract_strided_slice %508 {offsets = [0, 24], sizes = [16, 8], strides = [1, 1]} : vector<16x32xf32> to vector<16x8xf32>
    %583 = tpu.transpose %581, [1, 0] : vector<16x8xf32> -> vector<8x16xf32>
    %cst_224 = arith.constant dense<0.000000e+00> : vector<16x16xf32>
    %584 = tpu.matmul %580, %583, %cst_224 {dimension_numbers = #tpu.dot_dimension_numbers<[1], [0], [0], [1], [0, 0, 1, 1], [], []>} : vector<16x8xf32>, vector<8x16xf32>, vector<16x16xf32> -> vector<16x16xf32>
    %cst_225 = arith.constant 0.353553385 : f32
    %585 = vector.broadcast %cst_225 : f32 to vector<16x16xf32>
    %586 = arith.mulf %584, %585 : vector<16x16xf32>
    %587 = arith.addf %586, %2 : vector<16x16xf32>
    %cst_226 = arith.constant dense<0xFF800000> : vector<16xf32>
    %588 = vector.multi_reduction <maximumf>, %587, %cst_226 [1] : vector<16x16xf32> to vector<16xf32>
    %589 = vector.shape_cast %588 : vector<16xf32> to vector<16x1xf32>
    %590 = vector.broadcast %589 : vector<16x1xf32> to vector<16x16xf32>
    %591 = arith.subf %587, %590 : vector<16x16xf32>
    %592 = math.exp %591 : vector<16x16xf32>
    %cst_227 = arith.constant dense<0.000000e+00> : vector<16xf32>
    %593 = vector.multi_reduction <add>, %592, %cst_227 [1] : vector<16x16xf32> to vector<16xf32>
    %594 = vector.shape_cast %593 : vector<16xf32> to vector<16x1xf32>
    %595 = tpu.reciprocal %594 {approx = true} : vector<16x1xf32> -> vector<16x1xf32>
    %596 = vector.broadcast %595 : vector<16x1xf32> to vector<16x16xf32>
    %597 = arith.mulf %592, %596 : vector<16x16xf32>
    %cst_228 = arith.constant dense<0.000000e+00> : vector<16x8xf32>
    %598 = tpu.matmul %597, %582, %cst_228 {dimension_numbers = #tpu.dot_dimension_numbers<[1], [0], [0], [1], [0, 0, 1, 1], [], []>} : vector<16x16xf32>, vector<16x8xf32>, vector<16x8xf32> -> vector<16x8xf32>
    %599 = vector.extract_strided_slice %510 {offsets = [24, 0], sizes = [8, 32], strides = [1, 1]} : vector<32x32xf32> to vector<8x32xf32>
    %cst_229 = arith.constant dense<0.000000e+00> : vector<16x32xf32>
    %600 = tpu.matmul %598, %599, %cst_229 {dimension_numbers = #tpu.dot_dimension_numbers<[1], [0], [0], [1], [0, 0, 1, 1], [], []>} : vector<16x8xf32>, vector<8x32xf32>, vector<16x32xf32> -> vector<16x32xf32>
    %601 = arith.addf %579, %600 : vector<16x32xf32>
    %602 = vector.broadcast %512 : vector<1x32xf32> to vector<16x32xf32>
    %603 = arith.addf %601, %602 : vector<16x32xf32>
    %604 = arith.addf %492, %603 : vector<16x32xf32>
    %605 = vector.extract_strided_slice %360 {offsets = [2, 0], sizes = [1, 32], strides = [1, 1]} : vector<6x32xf32> to vector<1x32xf32>
    %606 = vector.extract_strided_slice %360 {offsets = [3, 0], sizes = [1, 32], strides = [1, 1]} : vector<6x32xf32> to vector<1x32xf32>
    %cst_230 = arith.constant dense<0.000000e+00> : vector<16xf32>
    %607 = vector.multi_reduction <add>, %604, %cst_230 [1] : vector<16x32xf32> to vector<16xf32>
    %608 = vector.shape_cast %607 : vector<16xf32> to vector<16x1xf32>
    %cst_231 = arith.constant 3.200000e+01 : f32
    %609 = vector.broadcast %cst_231 : f32 to vector<16x1xf32>
    %610 = arith.divf %608, %609 : vector<16x1xf32>
    %611 = vector.broadcast %610 : vector<16x1xf32> to vector<16x32xf32>
    %612 = arith.subf %604, %611 : vector<16x32xf32>
    %613 = vector.broadcast %610 : vector<16x1xf32> to vector<16x32xf32>
    %614 = arith.subf %604, %613 : vector<16x32xf32>
    %615 = arith.mulf %612, %614 : vector<16x32xf32>
    %cst_232 = arith.constant dense<0.000000e+00> : vector<16xf32>
    %616 = vector.multi_reduction <add>, %615, %cst_232 [1] : vector<16x32xf32> to vector<16xf32>
    %617 = vector.shape_cast %616 : vector<16xf32> to vector<16x1xf32>
    %cst_233 = arith.constant 3.200000e+01 : f32
    %618 = vector.broadcast %cst_233 : f32 to vector<16x1xf32>
    %619 = arith.divf %617, %618 : vector<16x1xf32>
    %620 = vector.broadcast %610 : vector<16x1xf32> to vector<16x32xf32>
    %621 = arith.subf %604, %620 : vector<16x32xf32>
    %cst_234 = arith.constant 9.99999974E-6 : f32
    %622 = vector.broadcast %cst_234 : f32 to vector<16x1xf32>
    %623 = arith.addf %619, %622 : vector<16x1xf32>
    %624 = math.rsqrt %623 : vector<16x1xf32>
    %625 = vector.broadcast %624 : vector<16x1xf32> to vector<16x32xf32>
    %626 = arith.mulf %621, %625 : vector<16x32xf32>
    %627 = vector.broadcast %605 : vector<1x32xf32> to vector<16x32xf32>
    %628 = arith.mulf %626, %627 : vector<16x32xf32>
    %629 = vector.broadcast %606 : vector<1x32xf32> to vector<16x32xf32>
    %630 = arith.addf %628, %629 : vector<16x32xf32>
    %c0_235 = arith.constant 0 : index
    %c0_236 = arith.constant 0 : index
    %c0_237 = arith.constant 0 : index
    %631 = vector.load %arg24[%c0_235, %c0_236, %c0_237] : memref<2x32x64xf32, #tpu.memory_space<vmem>>, vector<1x32x64xf32>
    %632 = vector.shape_cast %631 : vector<1x32x64xf32> to vector<32x64xf32>
    %c0_238 = arith.constant 0 : index
    %c0_239 = arith.constant 0 : index
    %c0_240 = arith.constant 0 : index
    %633 = vector.load %arg25[%c0_238, %c0_239, %c0_240] : memref<2x1x64xf32, #tpu.memory_space<vmem>>, vector<1x1x64xf32>
    %634 = vector.shape_cast %633 : vector<1x1x64xf32> to vector<1x64xf32>
    %c0_241 = arith.constant 0 : index
    %c0_242 = arith.constant 0 : index
    %c0_243 = arith.constant 0 : index
    %635 = vector.load %arg26[%c0_241, %c0_242, %c0_243] : memref<2x64x32xf32, #tpu.memory_space<vmem>>, vector<1x64x32xf32>
    %636 = vector.shape_cast %635 : vector<1x64x32xf32> to vector<64x32xf32>
    %c0_244 = arith.constant 0 : index
    %c0_245 = arith.constant 0 : index
    %c0_246 = arith.constant 0 : index
    %637 = vector.load %arg27[%c0_244, %c0_245, %c0_246] : memref<2x1x32xf32, #tpu.memory_space<vmem>>, vector<1x1x32xf32>
    %638 = vector.shape_cast %637 : vector<1x1x32xf32> to vector<1x32xf32>
    %cst_247 = arith.constant dense<0.000000e+00> : vector<16x64xf32>
    %639 = tpu.matmul %630, %632, %cst_247 {dimension_numbers = #tpu.dot_dimension_numbers<[1], [0], [0], [1], [0, 0, 1, 1], [], []>} : vector<16x32xf32>, vector<32x64xf32>, vector<16x64xf32> -> vector<16x64xf32>
    %640 = vector.broadcast %634 : vector<1x64xf32> to vector<16x64xf32>
    %641 = arith.addf %639, %640 : vector<16x64xf32>
    %cst_248 = arith.constant 0.000000e+00 : f32
    %642 = vector.broadcast %cst_248 : f32 to vector<16x64xf32>
    %643 = arith.maximumf %641, %642 : vector<16x64xf32>
    %cst_249 = arith.constant dense<0.000000e+00> : vector<16x32xf32>
    %644 = tpu.matmul %643, %636, %cst_249 {dimension_numbers = #tpu.dot_dimension_numbers<[1], [0], [0], [1], [0, 0, 1, 1], [], []>} : vector<16x64xf32>, vector<64x32xf32>, vector<16x32xf32> -> vector<16x32xf32>
    %645 = vector.broadcast %638 : vector<1x32xf32> to vector<16x32xf32>
    %646 = arith.addf %644, %645 : vector<16x32xf32>
    %647 = arith.addf %630, %646 : vector<16x32xf32>
    %648 = vector.extract_strided_slice %360 {offsets = [4, 0], sizes = [1, 32], strides = [1, 1]} : vector<6x32xf32> to vector<1x32xf32>
    %649 = vector.extract_strided_slice %360 {offsets = [5, 0], sizes = [1, 32], strides = [1, 1]} : vector<6x32xf32> to vector<1x32xf32>
    %cst_250 = arith.constant dense<0.000000e+00> : vector<16xf32>
    %650 = vector.multi_reduction <add>, %647, %cst_250 [1] : vector<16x32xf32> to vector<16xf32>
    %651 = vector.shape_cast %650 : vector<16xf32> to vector<16x1xf32>
    %cst_251 = arith.constant 3.200000e+01 : f32
    %652 = vector.broadcast %cst_251 : f32 to vector<16x1xf32>
    %653 = arith.divf %651, %652 : vector<16x1xf32>
    %654 = vector.broadcast %653 : vector<16x1xf32> to vector<16x32xf32>
    %655 = arith.subf %647, %654 : vector<16x32xf32>
    %656 = vector.broadcast %653 : vector<16x1xf32> to vector<16x32xf32>
    %657 = arith.subf %647, %656 : vector<16x32xf32>
    %658 = arith.mulf %655, %657 : vector<16x32xf32>
    %cst_252 = arith.constant dense<0.000000e+00> : vector<16xf32>
    %659 = vector.multi_reduction <add>, %658, %cst_252 [1] : vector<16x32xf32> to vector<16xf32>
    %660 = vector.shape_cast %659 : vector<16xf32> to vector<16x1xf32>
    %cst_253 = arith.constant 3.200000e+01 : f32
    %661 = vector.broadcast %cst_253 : f32 to vector<16x1xf32>
    %662 = arith.divf %660, %661 : vector<16x1xf32>
    %663 = vector.broadcast %653 : vector<16x1xf32> to vector<16x32xf32>
    %664 = arith.subf %647, %663 : vector<16x32xf32>
    %cst_254 = arith.constant 9.99999974E-6 : f32
    %665 = vector.broadcast %cst_254 : f32 to vector<16x1xf32>
    %666 = arith.addf %662, %665 : vector<16x1xf32>
    %667 = math.rsqrt %666 : vector<16x1xf32>
    %668 = vector.broadcast %667 : vector<16x1xf32> to vector<16x32xf32>
    %669 = arith.mulf %664, %668 : vector<16x32xf32>
    %670 = vector.broadcast %648 : vector<1x32xf32> to vector<16x32xf32>
    %671 = arith.mulf %669, %670 : vector<16x32xf32>
    %672 = vector.broadcast %649 : vector<1x32xf32> to vector<16x32xf32>
    %673 = arith.addf %671, %672 : vector<16x32xf32>
    %c1_255 = arith.constant 1 : index
    %c0_256 = arith.constant 0 : index
    %c0_257 = arith.constant 0 : index
    %674 = vector.load %arg28[%c1_255, %c0_256, %c0_257] : memref<2x6x32xf32, #tpu.memory_space<vmem>>, vector<1x6x32xf32>
    %675 = vector.shape_cast %674 : vector<1x6x32xf32> to vector<6x32xf32>
    %c1_258 = arith.constant 1 : index
    %c0_259 = arith.constant 0 : index
    %c0_260 = arith.constant 0 : index
    %676 = vector.load %arg14[%c1_258, %c0_259, %c0_260] : memref<2x32x96xf32, #tpu.memory_space<vmem>>, vector<1x32x96xf32>
    %677 = vector.shape_cast %676 : vector<1x32x96xf32> to vector<32x96xf32>
    %cst_261 = arith.constant dense<0.000000e+00> : vector<16x96xf32>
    %678 = tpu.matmul %673, %677, %cst_261 {dimension_numbers = #tpu.dot_dimension_numbers<[1], [0], [0], [1], [0, 0, 1, 1], [], []>} : vector<16x32xf32>, vector<32x96xf32>, vector<16x96xf32> -> vector<16x96xf32>
    %c1_262 = arith.constant 1 : index
    %c0_263 = arith.constant 0 : index
    %c0_264 = arith.constant 0 : index
    %679 = vector.load %arg15[%c1_262, %c0_263, %c0_264] : memref<2x1x96xf32, #tpu.memory_space<vmem>>, vector<1x1x96xf32>
    %680 = vector.shape_cast %679 : vector<1x1x96xf32> to vector<1x96xf32>
    %681 = vector.broadcast %680 : vector<1x96xf32> to vector<16x96xf32>
    %682 = arith.addf %678, %681 : vector<16x96xf32>
    %683 = vector.extract_strided_slice %682 {offsets = [0, 0], sizes = [16, 32], strides = [1, 1]} : vector<16x96xf32> to vector<16x32xf32>
    %684 = vector.extract_strided_slice %682 {offsets = [0, 32], sizes = [16, 32], strides = [1, 1]} : vector<16x96xf32> to vector<16x32xf32>
    %685 = vector.extract_strided_slice %682 {offsets = [0, 64], sizes = [16, 32], strides = [1, 1]} : vector<16x96xf32> to vector<16x32xf32>
    %c1_265 = arith.constant 1 : index
    %c0_266 = arith.constant 0 : index
    %c0_267 = arith.constant 0 : index
    %686 = vector.load %arg16[%c1_265, %c0_266, %c0_267] : memref<2x32x32xf32, #tpu.memory_space<vmem>>, vector<1x32x32xf32>
    %687 = vector.shape_cast %686 : vector<1x32x32xf32> to vector<32x32xf32>
    %c1_268 = arith.constant 1 : index
    %c0_269 = arith.constant 0 : index
    %c0_270 = arith.constant 0 : index
    %688 = vector.load %arg17[%c1_268, %c0_269, %c0_270] : memref<2x1x32xf32, #tpu.memory_space<vmem>>, vector<1x1x32xf32>
    %689 = vector.shape_cast %688 : vector<1x1x32xf32> to vector<1x32xf32>
    %cst_271 = arith.constant 0.000000e+00 : f32
    %690 = vector.broadcast %cst_271 : f32 to vector<16x32xf32>
    %691 = vector.extract_strided_slice %683 {offsets = [0, 0], sizes = [16, 8], strides = [1, 1]} : vector<16x32xf32> to vector<16x8xf32>
    %692 = vector.extract_strided_slice %684 {offsets = [0, 0], sizes = [16, 8], strides = [1, 1]} : vector<16x32xf32> to vector<16x8xf32>
    %693 = vector.extract_strided_slice %685 {offsets = [0, 0], sizes = [16, 8], strides = [1, 1]} : vector<16x32xf32> to vector<16x8xf32>
    %694 = tpu.transpose %692, [1, 0] : vector<16x8xf32> -> vector<8x16xf32>
    %cst_272 = arith.constant dense<0.000000e+00> : vector<16x16xf32>
    %695 = tpu.matmul %691, %694, %cst_272 {dimension_numbers = #tpu.dot_dimension_numbers<[1], [0], [0], [1], [0, 0, 1, 1], [], []>} : vector<16x8xf32>, vector<8x16xf32>, vector<16x16xf32> -> vector<16x16xf32>
    %cst_273 = arith.constant 0.353553385 : f32
    %696 = vector.broadcast %cst_273 : f32 to vector<16x16xf32>
    %697 = arith.mulf %695, %696 : vector<16x16xf32>
    %698 = arith.addf %697, %1 : vector<16x16xf32>
    %cst_274 = arith.constant dense<0xFF800000> : vector<16xf32>
    %699 = vector.multi_reduction <maximumf>, %698, %cst_274 [1] : vector<16x16xf32> to vector<16xf32>
    %700 = vector.shape_cast %699 : vector<16xf32> to vector<16x1xf32>
    %701 = vector.broadcast %700 : vector<16x1xf32> to vector<16x16xf32>
    %702 = arith.subf %698, %701 : vector<16x16xf32>
    %703 = math.exp %702 : vector<16x16xf32>
    %cst_275 = arith.constant dense<0.000000e+00> : vector<16xf32>
    %704 = vector.multi_reduction <add>, %703, %cst_275 [1] : vector<16x16xf32> to vector<16xf32>
    %705 = vector.shape_cast %704 : vector<16xf32> to vector<16x1xf32>
    %706 = tpu.reciprocal %705 {approx = true} : vector<16x1xf32> -> vector<16x1xf32>
    %707 = vector.broadcast %706 : vector<16x1xf32> to vector<16x16xf32>
    %708 = arith.mulf %703, %707 : vector<16x16xf32>
    %cst_276 = arith.constant dense<0.000000e+00> : vector<16x8xf32>
    %709 = tpu.matmul %708, %693, %cst_276 {dimension_numbers = #tpu.dot_dimension_numbers<[1], [0], [0], [1], [0, 0, 1, 1], [], []>} : vector<16x16xf32>, vector<16x8xf32>, vector<16x8xf32> -> vector<16x8xf32>
    %710 = vector.extract_strided_slice %687 {offsets = [0, 0], sizes = [8, 32], strides = [1, 1]} : vector<32x32xf32> to vector<8x32xf32>
    %cst_277 = arith.constant dense<0.000000e+00> : vector<16x32xf32>
    %711 = tpu.matmul %709, %710, %cst_277 {dimension_numbers = #tpu.dot_dimension_numbers<[1], [0], [0], [1], [0, 0, 1, 1], [], []>} : vector<16x8xf32>, vector<8x32xf32>, vector<16x32xf32> -> vector<16x32xf32>
    %712 = arith.addf %690, %711 : vector<16x32xf32>
    %713 = vector.extract_strided_slice %683 {offsets = [0, 8], sizes = [16, 8], strides = [1, 1]} : vector<16x32xf32> to vector<16x8xf32>
    %714 = vector.extract_strided_slice %684 {offsets = [0, 8], sizes = [16, 8], strides = [1, 1]} : vector<16x32xf32> to vector<16x8xf32>
    %715 = vector.extract_strided_slice %685 {offsets = [0, 8], sizes = [16, 8], strides = [1, 1]} : vector<16x32xf32> to vector<16x8xf32>
    %716 = tpu.transpose %714, [1, 0] : vector<16x8xf32> -> vector<8x16xf32>
    %cst_278 = arith.constant dense<0.000000e+00> : vector<16x16xf32>
    %717 = tpu.matmul %713, %716, %cst_278 {dimension_numbers = #tpu.dot_dimension_numbers<[1], [0], [0], [1], [0, 0, 1, 1], [], []>} : vector<16x8xf32>, vector<8x16xf32>, vector<16x16xf32> -> vector<16x16xf32>
    %cst_279 = arith.constant 0.353553385 : f32
    %718 = vector.broadcast %cst_279 : f32 to vector<16x16xf32>
    %719 = arith.mulf %717, %718 : vector<16x16xf32>
    %720 = arith.addf %719, %1 : vector<16x16xf32>
    %cst_280 = arith.constant dense<0xFF800000> : vector<16xf32>
    %721 = vector.multi_reduction <maximumf>, %720, %cst_280 [1] : vector<16x16xf32> to vector<16xf32>
    %722 = vector.shape_cast %721 : vector<16xf32> to vector<16x1xf32>
    %723 = vector.broadcast %722 : vector<16x1xf32> to vector<16x16xf32>
    %724 = arith.subf %720, %723 : vector<16x16xf32>
    %725 = math.exp %724 : vector<16x16xf32>
    %cst_281 = arith.constant dense<0.000000e+00> : vector<16xf32>
    %726 = vector.multi_reduction <add>, %725, %cst_281 [1] : vector<16x16xf32> to vector<16xf32>
    %727 = vector.shape_cast %726 : vector<16xf32> to vector<16x1xf32>
    %728 = tpu.reciprocal %727 {approx = true} : vector<16x1xf32> -> vector<16x1xf32>
    %729 = vector.broadcast %728 : vector<16x1xf32> to vector<16x16xf32>
    %730 = arith.mulf %725, %729 : vector<16x16xf32>
    %cst_282 = arith.constant dense<0.000000e+00> : vector<16x8xf32>
    %731 = tpu.matmul %730, %715, %cst_282 {dimension_numbers = #tpu.dot_dimension_numbers<[1], [0], [0], [1], [0, 0, 1, 1], [], []>} : vector<16x16xf32>, vector<16x8xf32>, vector<16x8xf32> -> vector<16x8xf32>
    %732 = vector.extract_strided_slice %687 {offsets = [8, 0], sizes = [8, 32], strides = [1, 1]} : vector<32x32xf32> to vector<8x32xf32>
    %cst_283 = arith.constant dense<0.000000e+00> : vector<16x32xf32>
    %733 = tpu.matmul %731, %732, %cst_283 {dimension_numbers = #tpu.dot_dimension_numbers<[1], [0], [0], [1], [0, 0, 1, 1], [], []>} : vector<16x8xf32>, vector<8x32xf32>, vector<16x32xf32> -> vector<16x32xf32>
    %734 = arith.addf %712, %733 : vector<16x32xf32>
    %735 = vector.extract_strided_slice %683 {offsets = [0, 16], sizes = [16, 8], strides = [1, 1]} : vector<16x32xf32> to vector<16x8xf32>
    %736 = vector.extract_strided_slice %684 {offsets = [0, 16], sizes = [16, 8], strides = [1, 1]} : vector<16x32xf32> to vector<16x8xf32>
    %737 = vector.extract_strided_slice %685 {offsets = [0, 16], sizes = [16, 8], strides = [1, 1]} : vector<16x32xf32> to vector<16x8xf32>
    %738 = tpu.transpose %736, [1, 0] : vector<16x8xf32> -> vector<8x16xf32>
    %cst_284 = arith.constant dense<0.000000e+00> : vector<16x16xf32>
    %739 = tpu.matmul %735, %738, %cst_284 {dimension_numbers = #tpu.dot_dimension_numbers<[1], [0], [0], [1], [0, 0, 1, 1], [], []>} : vector<16x8xf32>, vector<8x16xf32>, vector<16x16xf32> -> vector<16x16xf32>
    %cst_285 = arith.constant 0.353553385 : f32
    %740 = vector.broadcast %cst_285 : f32 to vector<16x16xf32>
    %741 = arith.mulf %739, %740 : vector<16x16xf32>
    %742 = arith.addf %741, %1 : vector<16x16xf32>
    %cst_286 = arith.constant dense<0xFF800000> : vector<16xf32>
    %743 = vector.multi_reduction <maximumf>, %742, %cst_286 [1] : vector<16x16xf32> to vector<16xf32>
    %744 = vector.shape_cast %743 : vector<16xf32> to vector<16x1xf32>
    %745 = vector.broadcast %744 : vector<16x1xf32> to vector<16x16xf32>
    %746 = arith.subf %742, %745 : vector<16x16xf32>
    %747 = math.exp %746 : vector<16x16xf32>
    %cst_287 = arith.constant dense<0.000000e+00> : vector<16xf32>
    %748 = vector.multi_reduction <add>, %747, %cst_287 [1] : vector<16x16xf32> to vector<16xf32>
    %749 = vector.shape_cast %748 : vector<16xf32> to vector<16x1xf32>
    %750 = tpu.reciprocal %749 {approx = true} : vector<16x1xf32> -> vector<16x1xf32>
    %751 = vector.broadcast %750 : vector<16x1xf32> to vector<16x16xf32>
    %752 = arith.mulf %747, %751 : vector<16x16xf32>
    %cst_288 = arith.constant dense<0.000000e+00> : vector<16x8xf32>
    %753 = tpu.matmul %752, %737, %cst_288 {dimension_numbers = #tpu.dot_dimension_numbers<[1], [0], [0], [1], [0, 0, 1, 1], [], []>} : vector<16x16xf32>, vector<16x8xf32>, vector<16x8xf32> -> vector<16x8xf32>
    %754 = vector.extract_strided_slice %687 {offsets = [16, 0], sizes = [8, 32], strides = [1, 1]} : vector<32x32xf32> to vector<8x32xf32>
    %cst_289 = arith.constant dense<0.000000e+00> : vector<16x32xf32>
    %755 = tpu.matmul %753, %754, %cst_289 {dimension_numbers = #tpu.dot_dimension_numbers<[1], [0], [0], [1], [0, 0, 1, 1], [], []>} : vector<16x8xf32>, vector<8x32xf32>, vector<16x32xf32> -> vector<16x32xf32>
    %756 = arith.addf %734, %755 : vector<16x32xf32>
    %757 = vector.extract_strided_slice %683 {offsets = [0, 24], sizes = [16, 8], strides = [1, 1]} : vector<16x32xf32> to vector<16x8xf32>
    %758 = vector.extract_strided_slice %684 {offsets = [0, 24], sizes = [16, 8], strides = [1, 1]} : vector<16x32xf32> to vector<16x8xf32>
    %759 = vector.extract_strided_slice %685 {offsets = [0, 24], sizes = [16, 8], strides = [1, 1]} : vector<16x32xf32> to vector<16x8xf32>
    %760 = tpu.transpose %758, [1, 0] : vector<16x8xf32> -> vector<8x16xf32>
    %cst_290 = arith.constant dense<0.000000e+00> : vector<16x16xf32>
    %761 = tpu.matmul %757, %760, %cst_290 {dimension_numbers = #tpu.dot_dimension_numbers<[1], [0], [0], [1], [0, 0, 1, 1], [], []>} : vector<16x8xf32>, vector<8x16xf32>, vector<16x16xf32> -> vector<16x16xf32>
    %cst_291 = arith.constant 0.353553385 : f32
    %762 = vector.broadcast %cst_291 : f32 to vector<16x16xf32>
    %763 = arith.mulf %761, %762 : vector<16x16xf32>
    %764 = arith.addf %763, %1 : vector<16x16xf32>
    %cst_292 = arith.constant dense<0xFF800000> : vector<16xf32>
    %765 = vector.multi_reduction <maximumf>, %764, %cst_292 [1] : vector<16x16xf32> to vector<16xf32>
    %766 = vector.shape_cast %765 : vector<16xf32> to vector<16x1xf32>
    %767 = vector.broadcast %766 : vector<16x1xf32> to vector<16x16xf32>
    %768 = arith.subf %764, %767 : vector<16x16xf32>
    %769 = math.exp %768 : vector<16x16xf32>
    %cst_293 = arith.constant dense<0.000000e+00> : vector<16xf32>
    %770 = vector.multi_reduction <add>, %769, %cst_293 [1] : vector<16x16xf32> to vector<16xf32>
    %771 = vector.shape_cast %770 : vector<16xf32> to vector<16x1xf32>
    %772 = tpu.reciprocal %771 {approx = true} : vector<16x1xf32> -> vector<16x1xf32>
    %773 = vector.broadcast %772 : vector<16x1xf32> to vector<16x16xf32>
    %774 = arith.mulf %769, %773 : vector<16x16xf32>
    %cst_294 = arith.constant dense<0.000000e+00> : vector<16x8xf32>
    %775 = tpu.matmul %774, %759, %cst_294 {dimension_numbers = #tpu.dot_dimension_numbers<[1], [0], [0], [1], [0, 0, 1, 1], [], []>} : vector<16x16xf32>, vector<16x8xf32>, vector<16x8xf32> -> vector<16x8xf32>
    %776 = vector.extract_strided_slice %687 {offsets = [24, 0], sizes = [8, 32], strides = [1, 1]} : vector<32x32xf32> to vector<8x32xf32>
    %cst_295 = arith.constant dense<0.000000e+00> : vector<16x32xf32>
    %777 = tpu.matmul %775, %776, %cst_295 {dimension_numbers = #tpu.dot_dimension_numbers<[1], [0], [0], [1], [0, 0, 1, 1], [], []>} : vector<16x8xf32>, vector<8x32xf32>, vector<16x32xf32> -> vector<16x32xf32>
    %778 = arith.addf %756, %777 : vector<16x32xf32>
    %779 = vector.broadcast %689 : vector<1x32xf32> to vector<16x32xf32>
    %780 = arith.addf %778, %779 : vector<16x32xf32>
    %781 = arith.addf %673, %780 : vector<16x32xf32>
    %782 = vector.extract_strided_slice %675 {offsets = [0, 0], sizes = [1, 32], strides = [1, 1]} : vector<6x32xf32> to vector<1x32xf32>
    %783 = vector.extract_strided_slice %675 {offsets = [1, 0], sizes = [1, 32], strides = [1, 1]} : vector<6x32xf32> to vector<1x32xf32>
    %cst_296 = arith.constant dense<0.000000e+00> : vector<16xf32>
    %784 = vector.multi_reduction <add>, %781, %cst_296 [1] : vector<16x32xf32> to vector<16xf32>
    %785 = vector.shape_cast %784 : vector<16xf32> to vector<16x1xf32>
    %cst_297 = arith.constant 3.200000e+01 : f32
    %786 = vector.broadcast %cst_297 : f32 to vector<16x1xf32>
    %787 = arith.divf %785, %786 : vector<16x1xf32>
    %788 = vector.broadcast %787 : vector<16x1xf32> to vector<16x32xf32>
    %789 = arith.subf %781, %788 : vector<16x32xf32>
    %790 = vector.broadcast %787 : vector<16x1xf32> to vector<16x32xf32>
    %791 = arith.subf %781, %790 : vector<16x32xf32>
    %792 = arith.mulf %789, %791 : vector<16x32xf32>
    %cst_298 = arith.constant dense<0.000000e+00> : vector<16xf32>
    %793 = vector.multi_reduction <add>, %792, %cst_298 [1] : vector<16x32xf32> to vector<16xf32>
    %794 = vector.shape_cast %793 : vector<16xf32> to vector<16x1xf32>
    %cst_299 = arith.constant 3.200000e+01 : f32
    %795 = vector.broadcast %cst_299 : f32 to vector<16x1xf32>
    %796 = arith.divf %794, %795 : vector<16x1xf32>
    %797 = vector.broadcast %787 : vector<16x1xf32> to vector<16x32xf32>
    %798 = arith.subf %781, %797 : vector<16x32xf32>
    %cst_300 = arith.constant 9.99999974E-6 : f32
    %799 = vector.broadcast %cst_300 : f32 to vector<16x1xf32>
    %800 = arith.addf %796, %799 : vector<16x1xf32>
    %801 = math.rsqrt %800 : vector<16x1xf32>
    %802 = vector.broadcast %801 : vector<16x1xf32> to vector<16x32xf32>
    %803 = arith.mulf %798, %802 : vector<16x32xf32>
    %804 = vector.broadcast %782 : vector<1x32xf32> to vector<16x32xf32>
    %805 = arith.mulf %803, %804 : vector<16x32xf32>
    %806 = vector.broadcast %783 : vector<1x32xf32> to vector<16x32xf32>
    %807 = arith.addf %805, %806 : vector<16x32xf32>
    %c1_301 = arith.constant 1 : index
    %c0_302 = arith.constant 0 : index
    %c0_303 = arith.constant 0 : index
    %808 = vector.load %arg18[%c1_301, %c0_302, %c0_303] : memref<2x32x32xf32, #tpu.memory_space<vmem>>, vector<1x32x32xf32>
    %809 = vector.shape_cast %808 : vector<1x32x32xf32> to vector<32x32xf32>
    %cst_304 = arith.constant dense<0.000000e+00> : vector<16x32xf32>
    %810 = tpu.matmul %807, %809, %cst_304 {dimension_numbers = #tpu.dot_dimension_numbers<[1], [0], [0], [1], [0, 0, 1, 1], [], []>} : vector<16x32xf32>, vector<32x32xf32>, vector<16x32xf32> -> vector<16x32xf32>
    %c1_305 = arith.constant 1 : index
    %c0_306 = arith.constant 0 : index
    %c0_307 = arith.constant 0 : index
    %811 = vector.load %arg19[%c1_305, %c0_306, %c0_307] : memref<2x1x32xf32, #tpu.memory_space<vmem>>, vector<1x1x32xf32>
    %812 = vector.shape_cast %811 : vector<1x1x32xf32> to vector<1x32xf32>
    %813 = vector.broadcast %812 : vector<1x32xf32> to vector<16x32xf32>
    %814 = arith.addf %810, %813 : vector<16x32xf32>
    %c1_308 = arith.constant 1 : index
    %c0_309 = arith.constant 0 : index
    %c0_310 = arith.constant 0 : index
    %815 = vector.load %arg20[%c1_308, %c0_309, %c0_310] : memref<2x32x64xf32, #tpu.memory_space<vmem>>, vector<1x32x64xf32>
    %816 = vector.shape_cast %815 : vector<1x32x64xf32> to vector<32x64xf32>
    %cst_311 = arith.constant dense<0.000000e+00> : vector<16x64xf32>
    %817 = tpu.matmul %357, %816, %cst_311 {dimension_numbers = #tpu.dot_dimension_numbers<[1], [0], [0], [1], [0, 0, 1, 1], [], []>} : vector<16x32xf32>, vector<32x64xf32>, vector<16x64xf32> -> vector<16x64xf32>
    %c1_312 = arith.constant 1 : index
    %c0_313 = arith.constant 0 : index
    %c0_314 = arith.constant 0 : index
    %818 = vector.load %arg21[%c1_312, %c0_313, %c0_314] : memref<2x1x64xf32, #tpu.memory_space<vmem>>, vector<1x1x64xf32>
    %819 = vector.shape_cast %818 : vector<1x1x64xf32> to vector<1x64xf32>
    %820 = vector.broadcast %819 : vector<1x64xf32> to vector<16x64xf32>
    %821 = arith.addf %817, %820 : vector<16x64xf32>
    %822 = vector.extract_strided_slice %821 {offsets = [0, 0], sizes = [16, 32], strides = [1, 1]} : vector<16x64xf32> to vector<16x32xf32>
    %823 = vector.extract_strided_slice %821 {offsets = [0, 32], sizes = [16, 32], strides = [1, 1]} : vector<16x64xf32> to vector<16x32xf32>
    %c1_315 = arith.constant 1 : index
    %c0_316 = arith.constant 0 : index
    %c0_317 = arith.constant 0 : index
    %824 = vector.load %arg22[%c1_315, %c0_316, %c0_317] : memref<2x32x32xf32, #tpu.memory_space<vmem>>, vector<1x32x32xf32>
    %825 = vector.shape_cast %824 : vector<1x32x32xf32> to vector<32x32xf32>
    %c1_318 = arith.constant 1 : index
    %c0_319 = arith.constant 0 : index
    %c0_320 = arith.constant 0 : index
    %826 = vector.load %arg23[%c1_318, %c0_319, %c0_320] : memref<2x1x32xf32, #tpu.memory_space<vmem>>, vector<1x1x32xf32>
    %827 = vector.shape_cast %826 : vector<1x1x32xf32> to vector<1x32xf32>
    %cst_321 = arith.constant 0.000000e+00 : f32
    %828 = vector.broadcast %cst_321 : f32 to vector<16x32xf32>
    %829 = vector.extract_strided_slice %814 {offsets = [0, 0], sizes = [16, 8], strides = [1, 1]} : vector<16x32xf32> to vector<16x8xf32>
    %830 = vector.extract_strided_slice %822 {offsets = [0, 0], sizes = [16, 8], strides = [1, 1]} : vector<16x32xf32> to vector<16x8xf32>
    %831 = vector.extract_strided_slice %823 {offsets = [0, 0], sizes = [16, 8], strides = [1, 1]} : vector<16x32xf32> to vector<16x8xf32>
    %832 = tpu.transpose %830, [1, 0] : vector<16x8xf32> -> vector<8x16xf32>
    %cst_322 = arith.constant dense<0.000000e+00> : vector<16x16xf32>
    %833 = tpu.matmul %829, %832, %cst_322 {dimension_numbers = #tpu.dot_dimension_numbers<[1], [0], [0], [1], [0, 0, 1, 1], [], []>} : vector<16x8xf32>, vector<8x16xf32>, vector<16x16xf32> -> vector<16x16xf32>
    %cst_323 = arith.constant 0.353553385 : f32
    %834 = vector.broadcast %cst_323 : f32 to vector<16x16xf32>
    %835 = arith.mulf %833, %834 : vector<16x16xf32>
    %836 = arith.addf %835, %2 : vector<16x16xf32>
    %cst_324 = arith.constant dense<0xFF800000> : vector<16xf32>
    %837 = vector.multi_reduction <maximumf>, %836, %cst_324 [1] : vector<16x16xf32> to vector<16xf32>
    %838 = vector.shape_cast %837 : vector<16xf32> to vector<16x1xf32>
    %839 = vector.broadcast %838 : vector<16x1xf32> to vector<16x16xf32>
    %840 = arith.subf %836, %839 : vector<16x16xf32>
    %841 = math.exp %840 : vector<16x16xf32>
    %cst_325 = arith.constant dense<0.000000e+00> : vector<16xf32>
    %842 = vector.multi_reduction <add>, %841, %cst_325 [1] : vector<16x16xf32> to vector<16xf32>
    %843 = vector.shape_cast %842 : vector<16xf32> to vector<16x1xf32>
    %844 = tpu.reciprocal %843 {approx = true} : vector<16x1xf32> -> vector<16x1xf32>
    %845 = vector.broadcast %844 : vector<16x1xf32> to vector<16x16xf32>
    %846 = arith.mulf %841, %845 : vector<16x16xf32>
    %cst_326 = arith.constant dense<0.000000e+00> : vector<16x8xf32>
    %847 = tpu.matmul %846, %831, %cst_326 {dimension_numbers = #tpu.dot_dimension_numbers<[1], [0], [0], [1], [0, 0, 1, 1], [], []>} : vector<16x16xf32>, vector<16x8xf32>, vector<16x8xf32> -> vector<16x8xf32>
    %848 = vector.extract_strided_slice %825 {offsets = [0, 0], sizes = [8, 32], strides = [1, 1]} : vector<32x32xf32> to vector<8x32xf32>
    %cst_327 = arith.constant dense<0.000000e+00> : vector<16x32xf32>
    %849 = tpu.matmul %847, %848, %cst_327 {dimension_numbers = #tpu.dot_dimension_numbers<[1], [0], [0], [1], [0, 0, 1, 1], [], []>} : vector<16x8xf32>, vector<8x32xf32>, vector<16x32xf32> -> vector<16x32xf32>
    %850 = arith.addf %828, %849 : vector<16x32xf32>
    %851 = vector.extract_strided_slice %814 {offsets = [0, 8], sizes = [16, 8], strides = [1, 1]} : vector<16x32xf32> to vector<16x8xf32>
    %852 = vector.extract_strided_slice %822 {offsets = [0, 8], sizes = [16, 8], strides = [1, 1]} : vector<16x32xf32> to vector<16x8xf32>
    %853 = vector.extract_strided_slice %823 {offsets = [0, 8], sizes = [16, 8], strides = [1, 1]} : vector<16x32xf32> to vector<16x8xf32>
    %854 = tpu.transpose %852, [1, 0] : vector<16x8xf32> -> vector<8x16xf32>
    %cst_328 = arith.constant dense<0.000000e+00> : vector<16x16xf32>
    %855 = tpu.matmul %851, %854, %cst_328 {dimension_numbers = #tpu.dot_dimension_numbers<[1], [0], [0], [1], [0, 0, 1, 1], [], []>} : vector<16x8xf32>, vector<8x16xf32>, vector<16x16xf32> -> vector<16x16xf32>
    %cst_329 = arith.constant 0.353553385 : f32
    %856 = vector.broadcast %cst_329 : f32 to vector<16x16xf32>
    %857 = arith.mulf %855, %856 : vector<16x16xf32>
    %858 = arith.addf %857, %2 : vector<16x16xf32>
    %cst_330 = arith.constant dense<0xFF800000> : vector<16xf32>
    %859 = vector.multi_reduction <maximumf>, %858, %cst_330 [1] : vector<16x16xf32> to vector<16xf32>
    %860 = vector.shape_cast %859 : vector<16xf32> to vector<16x1xf32>
    %861 = vector.broadcast %860 : vector<16x1xf32> to vector<16x16xf32>
    %862 = arith.subf %858, %861 : vector<16x16xf32>
    %863 = math.exp %862 : vector<16x16xf32>
    %cst_331 = arith.constant dense<0.000000e+00> : vector<16xf32>
    %864 = vector.multi_reduction <add>, %863, %cst_331 [1] : vector<16x16xf32> to vector<16xf32>
    %865 = vector.shape_cast %864 : vector<16xf32> to vector<16x1xf32>
    %866 = tpu.reciprocal %865 {approx = true} : vector<16x1xf32> -> vector<16x1xf32>
    %867 = vector.broadcast %866 : vector<16x1xf32> to vector<16x16xf32>
    %868 = arith.mulf %863, %867 : vector<16x16xf32>
    %cst_332 = arith.constant dense<0.000000e+00> : vector<16x8xf32>
    %869 = tpu.matmul %868, %853, %cst_332 {dimension_numbers = #tpu.dot_dimension_numbers<[1], [0], [0], [1], [0, 0, 1, 1], [], []>} : vector<16x16xf32>, vector<16x8xf32>, vector<16x8xf32> -> vector<16x8xf32>
    %870 = vector.extract_strided_slice %825 {offsets = [8, 0], sizes = [8, 32], strides = [1, 1]} : vector<32x32xf32> to vector<8x32xf32>
    %cst_333 = arith.constant dense<0.000000e+00> : vector<16x32xf32>
    %871 = tpu.matmul %869, %870, %cst_333 {dimension_numbers = #tpu.dot_dimension_numbers<[1], [0], [0], [1], [0, 0, 1, 1], [], []>} : vector<16x8xf32>, vector<8x32xf32>, vector<16x32xf32> -> vector<16x32xf32>
    %872 = arith.addf %850, %871 : vector<16x32xf32>
    %873 = vector.extract_strided_slice %814 {offsets = [0, 16], sizes = [16, 8], strides = [1, 1]} : vector<16x32xf32> to vector<16x8xf32>
    %874 = vector.extract_strided_slice %822 {offsets = [0, 16], sizes = [16, 8], strides = [1, 1]} : vector<16x32xf32> to vector<16x8xf32>
    %875 = vector.extract_strided_slice %823 {offsets = [0, 16], sizes = [16, 8], strides = [1, 1]} : vector<16x32xf32> to vector<16x8xf32>
    %876 = tpu.transpose %874, [1, 0] : vector<16x8xf32> -> vector<8x16xf32>
    %cst_334 = arith.constant dense<0.000000e+00> : vector<16x16xf32>
    %877 = tpu.matmul %873, %876, %cst_334 {dimension_numbers = #tpu.dot_dimension_numbers<[1], [0], [0], [1], [0, 0, 1, 1], [], []>} : vector<16x8xf32>, vector<8x16xf32>, vector<16x16xf32> -> vector<16x16xf32>
    %cst_335 = arith.constant 0.353553385 : f32
    %878 = vector.broadcast %cst_335 : f32 to vector<16x16xf32>
    %879 = arith.mulf %877, %878 : vector<16x16xf32>
    %880 = arith.addf %879, %2 : vector<16x16xf32>
    %cst_336 = arith.constant dense<0xFF800000> : vector<16xf32>
    %881 = vector.multi_reduction <maximumf>, %880, %cst_336 [1] : vector<16x16xf32> to vector<16xf32>
    %882 = vector.shape_cast %881 : vector<16xf32> to vector<16x1xf32>
    %883 = vector.broadcast %882 : vector<16x1xf32> to vector<16x16xf32>
    %884 = arith.subf %880, %883 : vector<16x16xf32>
    %885 = math.exp %884 : vector<16x16xf32>
    %cst_337 = arith.constant dense<0.000000e+00> : vector<16xf32>
    %886 = vector.multi_reduction <add>, %885, %cst_337 [1] : vector<16x16xf32> to vector<16xf32>
    %887 = vector.shape_cast %886 : vector<16xf32> to vector<16x1xf32>
    %888 = tpu.reciprocal %887 {approx = true} : vector<16x1xf32> -> vector<16x1xf32>
    %889 = vector.broadcast %888 : vector<16x1xf32> to vector<16x16xf32>
    %890 = arith.mulf %885, %889 : vector<16x16xf32>
    %cst_338 = arith.constant dense<0.000000e+00> : vector<16x8xf32>
    %891 = tpu.matmul %890, %875, %cst_338 {dimension_numbers = #tpu.dot_dimension_numbers<[1], [0], [0], [1], [0, 0, 1, 1], [], []>} : vector<16x16xf32>, vector<16x8xf32>, vector<16x8xf32> -> vector<16x8xf32>
    %892 = vector.extract_strided_slice %825 {offsets = [16, 0], sizes = [8, 32], strides = [1, 1]} : vector<32x32xf32> to vector<8x32xf32>
    %cst_339 = arith.constant dense<0.000000e+00> : vector<16x32xf32>
    %893 = tpu.matmul %891, %892, %cst_339 {dimension_numbers = #tpu.dot_dimension_numbers<[1], [0], [0], [1], [0, 0, 1, 1], [], []>} : vector<16x8xf32>, vector<8x32xf32>, vector<16x32xf32> -> vector<16x32xf32>
    %894 = arith.addf %872, %893 : vector<16x32xf32>
    %895 = vector.extract_strided_slice %814 {offsets = [0, 24], sizes = [16, 8], strides = [1, 1]} : vector<16x32xf32> to vector<16x8xf32>
    %896 = vector.extract_strided_slice %822 {offsets = [0, 24], sizes = [16, 8], strides = [1, 1]} : vector<16x32xf32> to vector<16x8xf32>
    %897 = vector.extract_strided_slice %823 {offsets = [0, 24], sizes = [16, 8], strides = [1, 1]} : vector<16x32xf32> to vector<16x8xf32>
    %898 = tpu.transpose %896, [1, 0] : vector<16x8xf32> -> vector<8x16xf32>
    %cst_340 = arith.constant dense<0.000000e+00> : vector<16x16xf32>
    %899 = tpu.matmul %895, %898, %cst_340 {dimension_numbers = #tpu.dot_dimension_numbers<[1], [0], [0], [1], [0, 0, 1, 1], [], []>} : vector<16x8xf32>, vector<8x16xf32>, vector<16x16xf32> -> vector<16x16xf32>
    %cst_341 = arith.constant 0.353553385 : f32
    %900 = vector.broadcast %cst_341 : f32 to vector<16x16xf32>
    %901 = arith.mulf %899, %900 : vector<16x16xf32>
    %902 = arith.addf %901, %2 : vector<16x16xf32>
    %cst_342 = arith.constant dense<0xFF800000> : vector<16xf32>
    %903 = vector.multi_reduction <maximumf>, %902, %cst_342 [1] : vector<16x16xf32> to vector<16xf32>
    %904 = vector.shape_cast %903 : vector<16xf32> to vector<16x1xf32>
    %905 = vector.broadcast %904 : vector<16x1xf32> to vector<16x16xf32>
    %906 = arith.subf %902, %905 : vector<16x16xf32>
    %907 = math.exp %906 : vector<16x16xf32>
    %cst_343 = arith.constant dense<0.000000e+00> : vector<16xf32>
    %908 = vector.multi_reduction <add>, %907, %cst_343 [1] : vector<16x16xf32> to vector<16xf32>
    %909 = vector.shape_cast %908 : vector<16xf32> to vector<16x1xf32>
    %910 = tpu.reciprocal %909 {approx = true} : vector<16x1xf32> -> vector<16x1xf32>
    %911 = vector.broadcast %910 : vector<16x1xf32> to vector<16x16xf32>
    %912 = arith.mulf %907, %911 : vector<16x16xf32>
    %cst_344 = arith.constant dense<0.000000e+00> : vector<16x8xf32>
    %913 = tpu.matmul %912, %897, %cst_344 {dimension_numbers = #tpu.dot_dimension_numbers<[1], [0], [0], [1], [0, 0, 1, 1], [], []>} : vector<16x16xf32>, vector<16x8xf32>, vector<16x8xf32> -> vector<16x8xf32>
    %914 = vector.extract_strided_slice %825 {offsets = [24, 0], sizes = [8, 32], strides = [1, 1]} : vector<32x32xf32> to vector<8x32xf32>
    %cst_345 = arith.constant dense<0.000000e+00> : vector<16x32xf32>
    %915 = tpu.matmul %913, %914, %cst_345 {dimension_numbers = #tpu.dot_dimension_numbers<[1], [0], [0], [1], [0, 0, 1, 1], [], []>} : vector<16x8xf32>, vector<8x32xf32>, vector<16x32xf32> -> vector<16x32xf32>
    %916 = arith.addf %894, %915 : vector<16x32xf32>
    %917 = vector.broadcast %827 : vector<1x32xf32> to vector<16x32xf32>
    %918 = arith.addf %916, %917 : vector<16x32xf32>
    %919 = arith.addf %807, %918 : vector<16x32xf32>
    %920 = vector.extract_strided_slice %675 {offsets = [2, 0], sizes = [1, 32], strides = [1, 1]} : vector<6x32xf32> to vector<1x32xf32>
    %921 = vector.extract_strided_slice %675 {offsets = [3, 0], sizes = [1, 32], strides = [1, 1]} : vector<6x32xf32> to vector<1x32xf32>
    %cst_346 = arith.constant dense<0.000000e+00> : vector<16xf32>
    %922 = vector.multi_reduction <add>, %919, %cst_346 [1] : vector<16x32xf32> to vector<16xf32>
    %923 = vector.shape_cast %922 : vector<16xf32> to vector<16x1xf32>
    %cst_347 = arith.constant 3.200000e+01 : f32
    %924 = vector.broadcast %cst_347 : f32 to vector<16x1xf32>
    %925 = arith.divf %923, %924 : vector<16x1xf32>
    %926 = vector.broadcast %925 : vector<16x1xf32> to vector<16x32xf32>
    %927 = arith.subf %919, %926 : vector<16x32xf32>
    %928 = vector.broadcast %925 : vector<16x1xf32> to vector<16x32xf32>
    %929 = arith.subf %919, %928 : vector<16x32xf32>
    %930 = arith.mulf %927, %929 : vector<16x32xf32>
    %cst_348 = arith.constant dense<0.000000e+00> : vector<16xf32>
    %931 = vector.multi_reduction <add>, %930, %cst_348 [1] : vector<16x32xf32> to vector<16xf32>
    %932 = vector.shape_cast %931 : vector<16xf32> to vector<16x1xf32>
    %cst_349 = arith.constant 3.200000e+01 : f32
    %933 = vector.broadcast %cst_349 : f32 to vector<16x1xf32>
    %934 = arith.divf %932, %933 : vector<16x1xf32>
    %935 = vector.broadcast %925 : vector<16x1xf32> to vector<16x32xf32>
    %936 = arith.subf %919, %935 : vector<16x32xf32>
    %cst_350 = arith.constant 9.99999974E-6 : f32
    %937 = vector.broadcast %cst_350 : f32 to vector<16x1xf32>
    %938 = arith.addf %934, %937 : vector<16x1xf32>
    %939 = math.rsqrt %938 : vector<16x1xf32>
    %940 = vector.broadcast %939 : vector<16x1xf32> to vector<16x32xf32>
    %941 = arith.mulf %936, %940 : vector<16x32xf32>
    %942 = vector.broadcast %920 : vector<1x32xf32> to vector<16x32xf32>
    %943 = arith.mulf %941, %942 : vector<16x32xf32>
    %944 = vector.broadcast %921 : vector<1x32xf32> to vector<16x32xf32>
    %945 = arith.addf %943, %944 : vector<16x32xf32>
    %c1_351 = arith.constant 1 : index
    %c0_352 = arith.constant 0 : index
    %c0_353 = arith.constant 0 : index
    %946 = vector.load %arg24[%c1_351, %c0_352, %c0_353] : memref<2x32x64xf32, #tpu.memory_space<vmem>>, vector<1x32x64xf32>
    %947 = vector.shape_cast %946 : vector<1x32x64xf32> to vector<32x64xf32>
    %c1_354 = arith.constant 1 : index
    %c0_355 = arith.constant 0 : index
    %c0_356 = arith.constant 0 : index
    %948 = vector.load %arg25[%c1_354, %c0_355, %c0_356] : memref<2x1x64xf32, #tpu.memory_space<vmem>>, vector<1x1x64xf32>
    %949 = vector.shape_cast %948 : vector<1x1x64xf32> to vector<1x64xf32>
    %c1_357 = arith.constant 1 : index
    %c0_358 = arith.constant 0 : index
    %c0_359 = arith.constant 0 : index
    %950 = vector.load %arg26[%c1_357, %c0_358, %c0_359] : memref<2x64x32xf32, #tpu.memory_space<vmem>>, vector<1x64x32xf32>
    %951 = vector.shape_cast %950 : vector<1x64x32xf32> to vector<64x32xf32>
    %c1_360 = arith.constant 1 : index
    %c0_361 = arith.constant 0 : index
    %c0_362 = arith.constant 0 : index
    %952 = vector.load %arg27[%c1_360, %c0_361, %c0_362] : memref<2x1x32xf32, #tpu.memory_space<vmem>>, vector<1x1x32xf32>
    %953 = vector.shape_cast %952 : vector<1x1x32xf32> to vector<1x32xf32>
    %cst_363 = arith.constant dense<0.000000e+00> : vector<16x64xf32>
    %954 = tpu.matmul %945, %947, %cst_363 {dimension_numbers = #tpu.dot_dimension_numbers<[1], [0], [0], [1], [0, 0, 1, 1], [], []>} : vector<16x32xf32>, vector<32x64xf32>, vector<16x64xf32> -> vector<16x64xf32>
    %955 = vector.broadcast %949 : vector<1x64xf32> to vector<16x64xf32>
    %956 = arith.addf %954, %955 : vector<16x64xf32>
    %cst_364 = arith.constant 0.000000e+00 : f32
    %957 = vector.broadcast %cst_364 : f32 to vector<16x64xf32>
    %958 = arith.maximumf %956, %957 : vector<16x64xf32>
    %cst_365 = arith.constant dense<0.000000e+00> : vector<16x32xf32>
    %959 = tpu.matmul %958, %951, %cst_365 {dimension_numbers = #tpu.dot_dimension_numbers<[1], [0], [0], [1], [0, 0, 1, 1], [], []>} : vector<16x64xf32>, vector<64x32xf32>, vector<16x32xf32> -> vector<16x32xf32>
    %960 = vector.broadcast %953 : vector<1x32xf32> to vector<16x32xf32>
    %961 = arith.addf %959, %960 : vector<16x32xf32>
    %962 = arith.addf %945, %961 : vector<16x32xf32>
    %963 = vector.extract_strided_slice %675 {offsets = [4, 0], sizes = [1, 32], strides = [1, 1]} : vector<6x32xf32> to vector<1x32xf32>
    %964 = vector.extract_strided_slice %675 {offsets = [5, 0], sizes = [1, 32], strides = [1, 1]} : vector<6x32xf32> to vector<1x32xf32>
    %cst_366 = arith.constant dense<0.000000e+00> : vector<16xf32>
    %965 = vector.multi_reduction <add>, %962, %cst_366 [1] : vector<16x32xf32> to vector<16xf32>
    %966 = vector.shape_cast %965 : vector<16xf32> to vector<16x1xf32>
    %cst_367 = arith.constant 3.200000e+01 : f32
    %967 = vector.broadcast %cst_367 : f32 to vector<16x1xf32>
    %968 = arith.divf %966, %967 : vector<16x1xf32>
    %969 = vector.broadcast %968 : vector<16x1xf32> to vector<16x32xf32>
    %970 = arith.subf %962, %969 : vector<16x32xf32>
    %971 = vector.broadcast %968 : vector<16x1xf32> to vector<16x32xf32>
    %972 = arith.subf %962, %971 : vector<16x32xf32>
    %973 = arith.mulf %970, %972 : vector<16x32xf32>
    %cst_368 = arith.constant dense<0.000000e+00> : vector<16xf32>
    %974 = vector.multi_reduction <add>, %973, %cst_368 [1] : vector<16x32xf32> to vector<16xf32>
    %975 = vector.shape_cast %974 : vector<16xf32> to vector<16x1xf32>
    %cst_369 = arith.constant 3.200000e+01 : f32
    %976 = vector.broadcast %cst_369 : f32 to vector<16x1xf32>
    %977 = arith.divf %975, %976 : vector<16x1xf32>
    %978 = vector.broadcast %968 : vector<16x1xf32> to vector<16x32xf32>
    %979 = arith.subf %962, %978 : vector<16x32xf32>
    %cst_370 = arith.constant 9.99999974E-6 : f32
    %980 = vector.broadcast %cst_370 : f32 to vector<16x1xf32>
    %981 = arith.addf %977, %980 : vector<16x1xf32>
    %982 = math.rsqrt %981 : vector<16x1xf32>
    %983 = vector.broadcast %982 : vector<16x1xf32> to vector<16x32xf32>
    %984 = arith.mulf %979, %983 : vector<16x32xf32>
    %985 = vector.broadcast %963 : vector<1x32xf32> to vector<16x32xf32>
    %986 = arith.mulf %984, %985 : vector<16x32xf32>
    %987 = vector.broadcast %964 : vector<1x32xf32> to vector<16x32xf32>
    %988 = arith.addf %986, %987 : vector<16x32xf32>
    %c0_371 = arith.constant 0 : index
    %c0_372 = arith.constant 0 : index
    %989 = vector.load %arg29[%c0_371, %c0_372] : memref<16x32xf32, #tpu.memory_space<vmem>>, vector<16x32xf32>
    tpu.vector_store %arg29[%c0_371, %c0_372], %988 {strides = array<i32>} : memref<16x32xf32, #tpu.memory_space<vmem>>, vector<16x32xf32>,
    return
  }
}

</mosaic_0001>

<bundles_post_ra>
// kernel: tpu_custom_call.1
= control target key start
LH: loop header
LB: loop body
LE: loop exit
PB: predicated region body
PF: predicated region fallthrough
CT: control target
= control target key end

     0   :  { %s11869_s6 = smov 1   ;;  %s11870_s10 = smov 2   ;;  %s13143_s0 = inlined_call_operand.smem [shape: u32[30], index: -1, kind: input, shape index: {}] }
   0x1   :  { %s11937_s5 = sld [smem:[%s13143_s0]]   ;;  %s11871_s14 = smov 3  }
   0x2   :  { %s11942_s9 = sld [smem:[%s13143_s0 + %s11869_s6]]   ;;  %s11872_s18 = smov 4  }
   0x3   :  { %s11947_s13 = sld [smem:[%s13143_s0 + %s11870_s10]]   ;;  %s11873_s22 = smov 5  }
   0x4   :  { %s11952_s17 = sld [smem:[%s13143_s0 + %s11871_s14]]   ;;  %s11874_s26 = smov 6  }
   0x5   :  { %s11957_s21 = sld [smem:[%s13143_s0 + %s11872_s18]]   ;;  %s11875_s30 = smov 7  }
   0x6   :  { %s11962_s25 = sld [smem:[%s13143_s0 + %s11873_s22]]   ;;  %s11876_s4 = smov 8  }
   0x7   :  { %s11967_s29 = sld [smem:[%s13143_s0 + %s11874_s26]]   ;;  %s11877_s10 = smov 9  }
   0x8   :  { %s11972_s3 = sld [smem:[%s13143_s0 + %s11875_s30]]   ;;  %s11878_s15 = smov 10  }
   0x9   :  { %s11977_s8 = sld [smem:[%s13143_s0 + %s11876_s4]]   ;;  %s11879_s20 = smov 11  }
   0xa   :  { %s11982_s14 = sld [smem:[%s13143_s0 + %s11877_s10]]   ;;  %s11880_s26 = smov 12  }
   0xb   :  { %s11987_s19 = sld [smem:[%s13143_s0 + %s11878_s15]]   ;;  %s11881_s1 = smov 13  }
   0xc   :  { %13156 = sst [smem:[#allocation35_spill]] %s11962_s25  ;;  %s11882_s7 = smov 14  }
   0xd   :  { %s11992_s24 = sld [smem:[%s13143_s0 + %s11879_s20]]   ;;  %s11883_s15 = smov 15  }
   0xe   :  { %13157 = sst [smem:[#allocation36_spill]] %s11972_s3  ;;  %s11884_s22 = smov 16  }
   0xf   :  { %s11997_s30 = sld [smem:[%s13143_s0 + %s11880_s26]]   ;;  %s11885_s28 = smov 17  }
  0x10   :  { %13158 = sst [smem:[#allocation37_spill]] %s11982_s14 }
  0x11   :  { %s12002_s6 = sld [smem:[%s13143_s0 + %s11881_s1]]  }
  0x12   :  { %s12007_s12 = sld [smem:[%s13143_s0 + %s11882_s7]]   ;;  %s11886_s7 = smov 18  }
  0x13   :  { %13159 = sst [smem:[#allocation38_spill]] %s11992_s24 }
  0x14   :  { %s12012_s20 = sld [smem:[%s13143_s0 + %s11883_s15]]   ;;  %s11887_s15 = smov 19  }
  0x15   :  { %s12017_s27 = sld [smem:[%s13143_s0 + %s11884_s22]]   ;;  %s11888_s22 = smov 20  }
  0x16   :  { %s12022_s4 = sld [smem:[%s13143_s0 + %s11885_s28]]   ;;  %s11889_s28 = smov 21  }
  0x18   :  { %13160 = sst [smem:[#allocation39_spill]] %s12007_s12 }
  0x19   :  { %s12027_s12 = sld [smem:[%s13143_s0 + %s11886_s7]]   ;;  %s11890_s7 = smov 22  }
  0x1a   :  { %13161 = sst [smem:[#allocation40_spill]] %s12012_s20 }
  0x1b   :  { %13162 = sst [smem:[#allocation41_spill]] %s12017_s27 }
  0x1c   :  { %13163 = sst [smem:[#allocation42_spill]] %s12022_s4 }
  0x1d   :  { %s12032_s20 = sld [smem:[%s13143_s0 + %s11887_s15]]   ;;  %s11891_s15 = smov 23  }
  0x1e   :  { %s12037_s27 = sld [smem:[%s13143_s0 + %s11888_s22]]   ;;  %s11892_s22 = smov 24  }
  0x1f   :  { %s12042_s4 = sld [smem:[%s13143_s0 + %s11889_s28]]   ;;  %s11893_s28 = smov 25  }
  0x20   :  { %s12047_s24 = sld [smem:[%s13143_s0 + %s11890_s7]]   ;;  %s11894_s7 = smov 26  }
  0x21   :  { %s12057_s14 = sld [smem:[%s13143_s0 + %s11892_s22]]   ;;  %s11896_s22 = smov 28  }
  0x22   :  { %s12067_s3 = sld [smem:[%s13143_s0 + %s11894_s7]]  }
  0x23   :  { %13164 = sst [smem:[#allocation43_spill]] %s12032_s20 }
  0x24   :  { %s12052_s20 = sld [smem:[%s13143_s0 + %s11891_s15]]   ;;  %s11895_s15 = smov 27  }
  0x25   :  { %13165 = sst [smem:[#allocation44_spill]] %s12042_s4 }
  0x26   :  { %s12062_s4 = sld [smem:[%s13143_s0 + %s11893_s28]]   ;;  %s11897_s28 = smov 29  }
  0x27   :  { %s12077_s25 = sld [smem:[%s13143_s0 + %s11896_s22]]  }
  0x2a   :  { %13166 = sst [smem:[#allocation45_spill]] %s12052_s20 }
  0x2b   :  { %s12072_s20 = sld [smem:[%s13143_s0 + %s11895_s15]]  }
  0x2c   :  { %13167 = sst [smem:[#allocation46_spill]] %s12062_s4 }
  0x2d   :  { %s12082_s4 = sld [smem:[%s13143_s0 + %s11897_s28]]  }
  0x2e   :  { %64 = vsyncpa [#allocation3], 0 }
  0x2f   :  { %65 = vsyncpa [#allocation6], 0 }
  0x30   :  { %66 = vsyncpa [#allocation9], 0 }
  0x31   :  { %67 = vsyncpa [#allocation12], 0 }
  0x32   :  { %68 = vsyncpa [#allocation15], 0 }
  0x33   :  { %69 = vsyncpa [#allocation18], 0 }
  0x34   :  { %70 = vsyncpa [#allocation21], 0 }
  0x35   :  { %71 = vsyncpa [#allocation24], 0 }
  0x36   :  { %72 = vsyncpa [#allocation4], 0  ;;  %s11898_s7 = smov [#allocation5]   ;;  %s11899_s11 = smov [#allocation8]  }
  0x37   :  { %s90_s10 = sshll.u32 %s11898_s7, 4  ;;  %s114_s15 = sshll.u32 %s11899_s11, 4  ;;  %s91_s10 = int_to_ptr.vmem [resolvable:$true] %s90_s10  ;;  %s12084_s15 = int_to_ptr.vmem [resolvable:$true] %s114_s15 }
  0x38   :  { %s11521_s0 = scalar_lea.hbm %s11942_s9, 256 }
  0x39   :  { %p11522_p0 = scmp.ne.s32.totalorder %s11942_s9, %s11521_s0  ;;  %p11525_p1 = scmp.lt.u32.totalorder %s11521_s0, %s11942_s9 }
  0x3b   :  { %p11527_p2 = pnand %p11525_p1, %p11522_p0 }
  0x3d   :  { %11530 = shalt.err (!%p11527_p2)
}
  0x3e   :  { %s11531_s16 = scalar_lea.vmem %s91_s10, 256  ;;  %p11536_p4 = scmp.lt.s32.totalorder %s91_s10, %s91_s10 }
  0x3f   :  { %p11532_p3 = scmp.ne.s32.totalorder %s91_s10, %s11531_s16  ;;  %p11537_p5 = scmp.lt.s32.totalorder %s11531_s16, %s11531_s16 }
  0x41   :  { %p11538_p6 = por %p11537_p5, %p11536_p4 }
  0x43   :  { %p11539_p7 = pnand %p11538_p6, %p11532_p3 }
  0x45   :  { %11542 = shalt.err (!%p11539_p7)
}
  0x46   :  { %s11900_s18 = smov 128   ;;  %s11901_s22 = smov 8  }
  0x47   :  { %96 = dma.hbm_to_vmem [thread:$0]  %s11942_s9, 256, %s91_s10, [#allocation6], %s11900_s18, %s11900_s18, %s11901_s22  }
  0x48   :  { %s11543_s23 = scalar_lea.hbm %s11952_s17, 256 }
  0x49   :  { %p11544_p8 = scmp.ne.s32.totalorder %s11952_s17, %s11543_s23  ;;  %p11547_p9 = scmp.lt.u32.totalorder %s11543_s23, %s11952_s17 }
  0x4b   :  { %p11549_p10 = pnand %p11547_p9, %p11544_p8 }
  0x4d   :  { %11552 = shalt.err (!%p11549_p10)
}
  0x4e   :  { %s11553_s26 = scalar_lea.vmem %s12084_s15, 256  ;;  %p11558_p12 = scmp.lt.s32.totalorder %s12084_s15, %s12084_s15 }
  0x4f   :  { %p11554_p11 = scmp.ne.s32.totalorder %s12084_s15, %s11553_s26  ;;  %p11559_p13 = scmp.lt.s32.totalorder %s11553_s26, %s11553_s26 }
  0x51   :  { %p11560_p0 = por %p11559_p13, %p11558_p12 }
  0x53   :  { %p11561_p1 = pnand %p11560_p0, %p11554_p11 }
  0x55   :  { %11564 = shalt.err (!%p11561_p1)
}
  0x56   :  { %120 = dma.hbm_to_vmem [thread:$0]  %s11952_s17, 256, %s12084_s15, [#allocation9], %s11900_s18, %s11900_s18, %s11901_s22  }
  0x57   :  { %s11902_s9 = smov [#allocation11]   ;;  %s11565_s1 = scalar_lea.hbm %s11967_s29, 32 }
  0x58   :  { %s140_s28 = sshll.u32 %s11902_s9, 4  ;;  %p11566_p2 = scmp.ne.s32.totalorder %s11967_s29, %s11565_s1  ;;  %s141_s28 = int_to_ptr.vmem [resolvable:$true] %s140_s28 }
  0x59   :  { %p11569_p3 = scmp.lt.u32.totalorder %s11565_s1, %s11967_s29 }
  0x5b   :  { %p11571_p4 = pnand %p11569_p3, %p11566_p2 }
  0x5d   :  { %11574 = shalt.err (!%p11571_p4)
}
  0x5e   :  { %s11575_s2 = scalar_lea.vmem %s141_s28, 32  ;;  %p11580_p6 = scmp.lt.s32.totalorder %s141_s28, %s141_s28 }
  0x5f   :  { %p11576_p5 = scmp.ne.s32.totalorder %s141_s28, %s11575_s2  ;;  %p11581_p7 = scmp.lt.s32.totalorder %s11575_s2, %s11575_s2 }
  0x61   :  { %p11582_p8 = por %p11581_p7, %p11580_p6 }
  0x63   :  { %p11583_p9 = pnand %p11582_p8, %p11576_p5 }
  0x65   :  { %11586 = shalt.err (!%p11583_p9)
}
  0x66   :  { %s11903_s7 = smov 16   ;;  %s11904_s17 = smov 1  }
  0x67   :  { %146 = dma.hbm_to_vmem [thread:$0]  %s11967_s29, 32, %s141_s28, [#allocation12], %s11903_s7, %s11903_s7, %s11904_s17  }
  0x68   :  { %s11905_s10 = smov [#allocation14]   ;;  %s11906_s15 = smov [#allocation17]  }
  0x69   :  { %s168_s11 = sshll.u32 %s11905_s10, 4  ;;  %s194_s0 = sshll.u32 %s11906_s15, 4  ;;  %s169_s11 = int_to_ptr.vmem [resolvable:$true] %s168_s11  ;;  %s195_s0 = int_to_ptr.vmem [resolvable:$true] %s194_s0 }
  0x6a   :  { %s11587_s16 = scalar_lea.hbm %s11987_s19, 32 }
  0x6b   :  { %p11588_p10 = scmp.ne.s32.totalorder %s11987_s19, %s11587_s16  ;;  %p11591_p11 = scmp.lt.u32.totalorder %s11587_s16, %s11987_s19 }
  0x6d   :  { %p11593_p12 = pnand %p11591_p11, %p11588_p10 }
  0x6f   :  { %11596 = shalt.err (!%p11593_p12)
}
  0x70   :  { %s11597_s23 = scalar_lea.vmem %s169_s11, 32  ;;  %p11602_p0 = scmp.lt.s32.totalorder %s169_s11, %s169_s11 }
  0x71   :  { %p11598_p13 = scmp.ne.s32.totalorder %s169_s11, %s11597_s23  ;;  %p11603_p1 = scmp.lt.s32.totalorder %s11597_s23, %s11597_s23 }
  0x73   :  { %p11604_p2 = por %p11603_p1, %p11602_p0 }
  0x75   :  { %p11605_p3 = pnand %p11604_p2, %p11598_p13 }
  0x77   :  { %11608 = shalt.err (!%p11605_p3)
}
  0x78   :  { %174 = dma.hbm_to_vmem [thread:$0]  %s11987_s19, 32, %s169_s11, [#allocation15], %s11903_s7, %s11903_s7, %s11904_s17  }
  0x79   :  { %s11609_s29 = scalar_lea.hbm %s12002_s6, 128 }
  0x7a   :  { %p11610_p4 = scmp.ne.s32.totalorder %s12002_s6, %s11609_s29  ;;  %p11613_p5 = scmp.lt.u32.totalorder %s11609_s29, %s12002_s6 }
  0x7c   :  { %p11615_p6 = pnand %p11613_p5, %p11610_p4 }
  0x7e   :  { %11618 = shalt.err (!%p11615_p6)
}
  0x7f   :  { %s11619_s26 = scalar_lea.vmem %s195_s0, 128  ;;  %p11624_p8 = scmp.lt.s32.totalorder %s195_s0, %s195_s0 }
  0x80   :  { %p11620_p7 = scmp.ne.s32.totalorder %s195_s0, %s11619_s26  ;;  %p11625_p9 = scmp.lt.s32.totalorder %s11619_s26, %s11619_s26 }
  0x82   :  { %p11626_p10 = por %p11625_p9, %p11624_p8 }
  0x84   :  { %p11627_p11 = pnand %p11626_p10, %p11620_p7 }
  0x86   :  { %11630 = shalt.err (!%p11627_p11)
}
  0x87   :  { %s11907_s9 = smov 64   ;;  %s11908_s28 = smov 4  }
  0x88   :  { %200 = dma.hbm_to_vmem [thread:$0]  %s12002_s6, 128, %s195_s0, [#allocation18], %s11907_s9, %s11907_s9, %s11908_s28  }
  0x89   :  { %s11909_s19 = smov [#allocation20]   ;;  %s11910_s2 = smov [#allocation2]  }
  0x8a   :  { %s228_s1 = sshll.u32 %s11909_s19, 4  ;;  %s78_s10 = sshll.u32 %s11910_s2, 4  ;;  %s229_s1 = int_to_ptr.vmem [resolvable:$true] %s228_s1  ;;  %s79_s10 = int_to_ptr.vmem [resolvable:$true] %s78_s10 }
  0x8b   :  { %s11631_s11 = scalar_lea.hbm %s12037_s27, 1024 }
  0x8c   :  { %p11632_p12 = scmp.ne.s32.totalorder %s12037_s27, %s11631_s11  ;;  %p11635_p13 = scmp.lt.u32.totalorder %s11631_s11, %s12037_s27 }
  0x8e   :  { %p11637_p0 = pnand %p11635_p13, %p11632_p12 }
  0x90   :  { %11640 = shalt.err (!%p11637_p0)
}
  0x91   :  { %s11641_s15 = scalar_lea.vmem %s229_s1, 1024  ;;  %p11646_p2 = scmp.lt.s32.totalorder %s229_s1, %s229_s1 }
  0x92   :  { %p11642_p1 = scmp.ne.s32.totalorder %s229_s1, %s11641_s15  ;;  %p11647_p3 = scmp.lt.s32.totalorder %s11641_s15, %s11641_s15 }
  0x94   :  { %p11648_p4 = por %p11647_p3, %p11646_p2 }
  0x96   :  { %p11649_p5 = pnand %p11648_p4, %p11642_p1 }
  0x98   :  { %11652 = shalt.err (!%p11649_p5)
}
  0x99   :  { %234 = dma.hbm_to_vmem [thread:$0]  %s12037_s27, 1024, %s229_s1, [#allocation21], %s11900_s18, %s11900_s18, %s11901_s22  }
  0x9a   :  { %s11653_s6 = scalar_lea.hbm %s11937_s5, 256 }
  0x9b   :  { %p11654_p6 = scmp.ne.s32.totalorder %s11937_s5, %s11653_s6  ;;  %p11657_p7 = scmp.lt.u32.totalorder %s11653_s6, %s11937_s5 }
  0x9d   :  { %p11659_p8 = pnand %p11657_p7, %p11654_p6 }
  0x9f   :  { %11662 = shalt.err (!%p11659_p8)
}
  0xa0   :  { %s11663_s0 = scalar_lea.vmem %s79_s10, 256  ;;  %p11668_p10 = scmp.lt.s32.totalorder %s79_s10, %s79_s10 }
  0xa1   :  { %p11664_p9 = scmp.ne.s32.totalorder %s79_s10, %s11663_s0  ;;  %p11669_p11 = scmp.lt.s32.totalorder %s11663_s0, %s11663_s0 }
  0xa3   :  { %p11670_p12 = por %p11669_p11, %p11668_p10 }
  0xa5   :  { %p11671_p13 = pnand %p11670_p12, %p11664_p9 }
  0xa7   :  { %11674 = shalt.err (!%p11671_p13)
}
  0xa8   :  { %84 = dma.hbm_to_vmem [thread:$0]  %s11937_s5, 256, %s79_s10, [#allocation3], %s11900_s18, %s11900_s18, %s11901_s22  }
  0xa9   :  { %s11911_s27 = smov [#allocation7]   ;;  %s11912_s23 = smov [#allocation10]  }
  0xaa   :  { %s102_s16 = sshll.u32 %s11911_s27, 4  ;;  %s126_s29 = sshll.u32 %s11912_s23, 4  ;;  %s103_s16 = int_to_ptr.vmem [resolvable:$true] %s102_s16  ;;  %s127_s29 = int_to_ptr.vmem [resolvable:$true] %s126_s29 }
  0xab   :  { %s11675_s26 = scalar_lea.hbm %s11947_s13, 256 }
  0xac   :  { %p11676_p0 = scmp.ne.s32.totalorder %s11947_s13, %s11675_s26  ;;  %p11679_p1 = scmp.lt.u32.totalorder %s11675_s26, %s11947_s13 }
  0xae   :  { %p11681_p2 = pnand %p11679_p1, %p11676_p0 }
  0xb0   :  { %11684 = shalt.err (!%p11681_p2)
}
  0xb1   :  { %s11685_s28 = scalar_lea.vmem %s103_s16, 256  ;;  %p11690_p4 = scmp.lt.s32.totalorder %s103_s16, %s103_s16 }
  0xb2   :  { %p11686_p3 = scmp.ne.s32.totalorder %s103_s16, %s11685_s28  ;;  %p11691_p5 = scmp.lt.s32.totalorder %s11685_s28, %s11685_s28 }
  0xb4   :  { %p11692_p6 = por %p11691_p5, %p11690_p4 }
  0xb6   :  { %p11693_p7 = pnand %p11692_p6, %p11686_p3 }
  0xb8   :  { %11696 = shalt.err (!%p11693_p7)
}
  0xb9   :  { %108 = dma.hbm_to_vmem [thread:$0]  %s11947_s13, 256, %s103_s16, [#allocation6], %s11900_s18, %s11900_s18, %s11901_s22  }
  0xba   :  { %s11697_s5 = scalar_lea.hbm %s11957_s21, 256 }
  0xbb   :  { %p11698_p8 = scmp.ne.s32.totalorder %s11957_s21, %s11697_s5  ;;  %p11701_p9 = scmp.lt.u32.totalorder %s11697_s5, %s11957_s21 }
  0xbd   :  { %p11703_p10 = pnand %p11701_p9, %p11698_p8 }
  0xbf   :  { %11706 = shalt.err (!%p11703_p10)
}
  0xc0   :  { %s11707_s19 = scalar_lea.vmem %s127_s29, 256  ;;  %p11712_p12 = scmp.lt.s32.totalorder %s127_s29, %s127_s29 }
  0xc1   :  { %p11708_p11 = scmp.ne.s32.totalorder %s127_s29, %s11707_s19  ;;  %p11713_p13 = scmp.lt.s32.totalorder %s11707_s19, %s11707_s19 }
  0xc3   :  { %p11714_p0 = por %p11713_p13, %p11712_p12 }
  0xc5   :  { %p11715_p1 = pnand %p11714_p0, %p11708_p11 }
  0xc7   :  { %11718 = shalt.err (!%p11715_p1)
}
  0xc8   :  { %132 = dma.hbm_to_vmem [thread:$0]  %s11957_s21, 256, %s127_s29, [#allocation9], %s11900_s18, %s11900_s18, %s11901_s22  }
  0xc9   :  { %s11913_s13 = smov [#allocation13]   ;;  %s11914_s2 = smov [#allocation16]  }
  0xca   :  { %s154_s1 = sshll.u32 %s11913_s13, 4  ;;  %s182_s10 = sshll.u32 %s11914_s2, 4  ;;  %s155_s1 = int_to_ptr.vmem [resolvable:$true] %s154_s1  ;;  %s183_s10 = int_to_ptr.vmem [resolvable:$true] %s182_s10 }
  0xcb   :  { %s11719_s11 = scalar_lea.hbm %s11977_s8, 32 }
  0xcc   :  { %p11720_p2 = scmp.ne.s32.totalorder %s11977_s8, %s11719_s11  ;;  %p11723_p3 = scmp.lt.u32.totalorder %s11719_s11, %s11977_s8 }
  0xce   :  { %p11725_p4 = pnand %p11723_p3, %p11720_p2 }
  0xd0   :  { %11728 = shalt.err (!%p11725_p4)
}
  0xd1   :  { %s11729_s15 = scalar_lea.vmem %s155_s1, 32  ;;  %p11734_p6 = scmp.lt.s32.totalorder %s155_s1, %s155_s1 }
  0xd2   :  { %p11730_p5 = scmp.ne.s32.totalorder %s155_s1, %s11729_s15  ;;  %p11735_p7 = scmp.lt.s32.totalorder %s11729_s15, %s11729_s15 }
  0xd4   :  { %p11736_p8 = por %p11735_p7, %p11734_p6 }
  0xd6   :  { %p11737_p9 = pnand %p11736_p8, %p11730_p5 }
  0xd8   :  { %11740 = shalt.err (!%p11737_p9)
}
  0xd9   :  { %160 = dma.hbm_to_vmem [thread:$0]  %s11977_s8, 32, %s155_s1, [#allocation12], %s11903_s7, %s11903_s7, %s11904_s17  }
  0xda   :  { %s11741_s21 = scalar_lea.hbm %s11997_s30, 32 }
  0xdb   :  { %p11742_p10 = scmp.ne.s32.totalorder %s11997_s30, %s11741_s21  ;;  %p11745_p11 = scmp.lt.u32.totalorder %s11741_s21, %s11997_s30 }
  0xdd   :  { %p11747_p12 = pnand %p11745_p11, %p11742_p10 }
  0xdf   :  { %11750 = shalt.err (!%p11747_p12)
}
  0xe0   :  { %s11751_s6 = scalar_lea.vmem %s183_s10, 32  ;;  %p11756_p0 = scmp.lt.s32.totalorder %s183_s10, %s183_s10 }
  0xe1   :  { %p11752_p13 = scmp.ne.s32.totalorder %s183_s10, %s11751_s6  ;;  %p11757_p1 = scmp.lt.s32.totalorder %s11751_s6, %s11751_s6 }
  0xe3   :  { %p11758_p2 = por %p11757_p1, %p11756_p0 }
  0xe5   :  { %p11759_p3 = pnand %p11758_p2, %p11752_p13 }
  0xe7   :  { %11762 = shalt.err (!%p11759_p3)
}
  0xe8   :  { %188 = dma.hbm_to_vmem [thread:$0]  %s11997_s30, 32, %s183_s10, [#allocation15], %s11903_s7, %s11903_s7, %s11904_s17  }
  0xe9   :  { %s11915_s8 = smov [#allocation19]   ;;  %s11916_s27 = smov [#allocation22]  }
  0xea   :  { %s214_s0 = sshll.u32 %s11915_s8, 4  ;;  %s242_s16 = sshll.u32 %s11916_s27, 4  ;;  %s215_s0 = int_to_ptr.vmem [resolvable:$true] %s214_s0  ;;  %s243_s16 = int_to_ptr.vmem [resolvable:$true] %s242_s16 }
  0xeb   :  { %s11763_s23 = scalar_lea.hbm %s12027_s12, 1024 }
  0xec   :  { %p11764_p4 = scmp.ne.s32.totalorder %s12027_s12, %s11763_s23  ;;  %p11767_p5 = scmp.lt.u32.totalorder %s11763_s23, %s12027_s12 }
  0xee   :  { %p11769_p6 = pnand %p11767_p5, %p11764_p4 }
  0xf0   :  { %11772 = shalt.err (!%p11769_p6)
}
  0xf1   :  { %s11773_s29 = scalar_lea.vmem %s215_s0, 1024  ;;  %p11778_p8 = scmp.lt.s32.totalorder %s215_s0, %s215_s0 }
  0xf2   :  { %p11774_p7 = scmp.ne.s32.totalorder %s215_s0, %s11773_s29  ;;  %p11779_p9 = scmp.lt.s32.totalorder %s11773_s29, %s11773_s29 }
  0xf4   :  { %p11780_p10 = por %p11779_p9, %p11778_p8 }
  0xf6   :  { %p11781_p11 = pnand %p11780_p10, %p11774_p7 }
  0xf8   :  { %11784 = shalt.err (!%p11781_p11)
}
  0xf9   :  { %220 = dma.hbm_to_vmem [thread:$0]  %s12027_s12, 1024, %s215_s0, [#allocation18], %s11900_s18, %s11900_s18, %s11901_s22  }
  0xfa   :  { %s11785_s30 = scalar_lea.hbm %s12047_s24, 1024 }
  0xfb   :  { %p11786_p12 = scmp.ne.s32.totalorder %s12047_s24, %s11785_s30  ;;  %p11789_p13 = scmp.lt.u32.totalorder %s11785_s30, %s12047_s24 }
  0xfd   :  { %p11791_p0 = pnand %p11789_p13, %p11786_p12 }
  0xff   :  { %11794 = shalt.err (!%p11791_p0)
}
 0x100   :  { %s11795_s7 = scalar_lea.vmem %s243_s16, 1024  ;;  %p11800_p2 = scmp.lt.s32.totalorder %s243_s16, %s243_s16 }
 0x101   :  { %p11796_p1 = scmp.ne.s32.totalorder %s243_s16, %s11795_s7  ;;  %p11801_p3 = scmp.lt.s32.totalorder %s11795_s7, %s11795_s7 }
 0x103   :  { %p11802_p4 = por %p11801_p3, %p11800_p2 }
 0x105   :  { %p11803_p5 = pnand %p11802_p4, %p11796_p1 }
 0x107   :  { %11806 = shalt.err (!%p11803_p5)
}
 0x108   :  { %248 = dma.hbm_to_vmem [thread:$0]  %s12047_s24, 1024, %s243_s16, [#allocation21], %s11900_s18, %s11900_s18, %s11901_s22  }
 0x109   :  { %s11917_s12 = smov [#allocation23]   ;;  %s11807_s26 = scalar_lea.hbm %s12057_s14, 1024 }
 0x10a   :  { %s256_s17 = sshll.u32 %s11917_s12, 4  ;;  %p11808_p6 = scmp.ne.s32.totalorder %s12057_s14, %s11807_s26  ;;  %s257_s17 = int_to_ptr.vmem [resolvable:$true] %s256_s17 }
 0x10b   :  { %p11811_p7 = scmp.lt.u32.totalorder %s11807_s26, %s12057_s14 }
 0x10d   :  { %p11813_p8 = pnand %p11811_p7, %p11808_p6 }
 0x10f   :  { %11816 = shalt.err (!%p11813_p8)
}
 0x110   :  { %s11817_s28 = scalar_lea.vmem %s257_s17, 1024  ;;  %p11822_p10 = scmp.lt.s32.totalorder %s257_s17, %s257_s17 }
 0x111   :  { %p11818_p9 = scmp.ne.s32.totalorder %s257_s17, %s11817_s28  ;;  %p11823_p11 = scmp.lt.s32.totalorder %s11817_s28, %s11817_s28 }
 0x113   :  { %p11824_p12 = por %p11823_p11, %p11822_p10 }
 0x115   :  { %p11825_p13 = pnand %p11824_p12, %p11818_p9 }
 0x117   :  { %11828 = shalt.err (!%p11825_p13)
}
 0x118   :  { %262 = dma.hbm_to_vmem [thread:$0]  %s12057_s14, 1024, %s257_s17, [#allocation24], %s11900_s18, %s11900_s18, %s11901_s22  }
 0x119   :  { %11851 = dma.done.wait [#allocation3], 256  }
 0x11a   :  { %11852 = vsyncadd [#allocation3], 4294967040 }
 0x11b   :  { %11853 = dma.done.wait [#allocation6], 512  }
 0x11c   :  { %11854 = vsyncadd [#allocation6], 4294966784 }
 0x11d   :  { %11855 = dma.done.wait [#allocation9], 512  }
 0x11e   :  { %11856 = vsyncadd [#allocation9], 4294966784 }
 0x11f   :  { %11857 = dma.done.wait [#allocation12], 64  }
 0x120   :  { %11858 = vsyncadd [#allocation12], 4294967232 }
 0x121   :  { %11859 = dma.done.wait [#allocation15], 64  }
 0x122   :  { %11860 = vsyncadd [#allocation15], 4294967232 }
 0x123   :  { %11861 = dma.done.wait [#allocation18], 1152  }
 0x124   :  { %11862 = vsyncadd [#allocation18], 4294966144 }
 0x125   :  { %11863 = dma.done.wait [#allocation21], 2048  }
 0x126   :  { %11864 = vsyncadd [#allocation21], 4294965248 }
 0x127   :  { %11865 = dma.done.wait [#allocation24], 1024  }
 0x128   :  { %11866 = vsyncadd [#allocation24], 4294966272  ;;  %s13168_s24 = sld [smem:[#allocation35_spill]]  ;;  %vm332_vm0 = vcmask 261120   ;;  %v12192_v5 = vld [vmem:[#allocation2] sm:$0xff]  ;;  %v12196_v7 = vld [vmem:[#allocation2 + $0x8] sm:$0xff] }
 0x129   :  { %9901 = vmatprep.mubr.msk.f32.mxu1 %vm332_vm0, %v12192_v5  ;;  %v9227_v8 = vld [vmem:[#allocation11] ss:$0 sm:$0xff]  ;;  %vm425_vm1 = vcmask 64512   ;;  %s11918_s14 = smov 120   ;;  %s11919_s5 = smov 96   ;;  %v12248_v32 = vld [vmem:[#allocation7 + $0x8] sm:$0xff] }
 0x12a   :  { %s11920_s19 = smov 88   ;;  %s11921_s13 = smov 112   ;;  %vm12226_vm2 = vmpackc.low %vm425_vm1, %vm425_vm1  ;;  %v12250_v35 = vld [vmem:[#allocation7] sm:$0xff]  ;;  %vm513_vm3 = vcmask 130048   ;;  %vm1722_vm4 = vcmask 523264  }
 0x12b   :  { %s11922_s1 = smov 80   ;;  %s11923_s2 = smov 56  }
 0x12c   :  { %s11924_s10 = smov 72   ;;  %s11925_s11 = smov 104  }
 0x12d   :  { %s11926_s15 = smov 48   ;;  %s11927_s21 = smov 40  }
 0x12e   :  { %v321_v0 = vld [vmem:[%s13168_s24] sm:$0xff]  ;;  %v322_v1 = vld [vmem:[%s13168_s24 + $0x8] sm:$0xff]  ;;  %v323_v2 = vld [vmem:[%s13168_s24 + $0x10] sm:$0xff]  ;;  %s13171_s6 = sld [smem:[#allocation36_spill]]  ;;  %s13172_s8 = sld [smem:[#allocation37_spill]] }
 0x12f   :  { %v10557_v3 = vpack.c.bf16 %v322_v1, %v321_v0  ;;  %v324_v4 = vld [vmem:[%s13168_s24 + $0x18] sm:$0xff]  ;;  %s13173_s0 = sld [smem:[#allocation38_spill]]  ;;  %s13174_s27 = sld [smem:[#allocation39_spill]] }
 0x130   :  { %v10561_v6 = vpack.c.bf16 %v324_v4, %v323_v2  ;;  %s13175_s16 = sld [smem:[#allocation40_spill]]  ;;  %s13176_s23 = sld [smem:[#allocation41_spill]] }
 0x131   :  { %10558 = vmatprep.subr.bf16.mxu1 %v10557_v3  ;;  %s13177_s29 = sld [smem:[#allocation42_spill]]  ;;  %s13178_s30 = sld [smem:[#allocation44_spill]] }
 0x132   :  { %10560 = vmatpush3.bf16.msra.mxu1 %v10557_v3  ;;  %s13179_s7 = sld [smem:[#allocation43_spill]]  ;;  %s13180_s12 = sld [smem:[#allocation45_spill]] }
 0x133   :  { %10562 = vmatprep.subr.bf16.mxu1 %v10561_v6  ;;  %s13181_s17 = sld [smem:[#allocation46_spill]] }
 0x136   :  { %10564 = vmatpush3.bf16.msra.mxu1 %v10561_v6 }
 0x139   :  { %9902 = vmatmul.mubr.msk.f32.vlgmr.msra.gmra.mrb[0].mxu1 %vm332_vm0, %v12196_v7 }
 0x20c   :  { %v9903_v9 = vpop.f32.mrb[0].mxu1 }
 0x20d   :  { %v12200_v10 = vadd.f32 %v9903_v9, %v9227_v8  ;;  %v405_v11 = vpop.f32.mrb[1].mxu1 }
 0x20e   :  { %v12202_v12 = vadd.f32 %v9227_v8, %v405_v11 }
 0x210   :  { %623 = vrot.lane.b32.xlu1 %v12202_v12, %s11918_s14  ;;  %9908 = vmatprep.mubr.msk.f32.mxu1 %vm425_vm1, %v12202_v12  ;;  %v12210_v13 = vpack.i.bf16 %v12200_v10, %v12202_v12 }
 0x212   :  { %11054 = vrot.lane.b32.xlu0 %v12210_v13, %s11919_s5 }
 0x214   :  { %625 = vrot.lane.b32.xlu1 %v12200_v10, %s11918_s14 }
 0x216   :  { %11059 = vrot.lane.b32.xlu0 %v12210_v13, %s11920_s19 }
 0x218   :  { %989 = vrot.lane.b32.xlu1 %v12202_v12, %s11921_s13 }
 0x21a   :  { %11064 = vrot.lane.b32.xlu0 %v12210_v13, %s11922_s1 }
 0x21e   :  { %991 = vrot.lane.b32.xlu0 %v12200_v10, %s11921_s13 }
 0x282   :  { %v624_v24 = vpop.permute.xlu1 %623 }
 0x284   :  { %v11055_v14 = vpop.permute.xlu0 %11054 }
 0x285   :  { %v11057_v15 = vunpack.i.h.bf16 %v11055_v14  ;;  %v11056_v16 = vunpack.i.l.bf16 %v11055_v14 }
 0x286   :  { %v626_v28 = vpop.permute.xlu1 %625 }
 0x287   :  { %v10565_v18 = vpack.c.bf16 %v11057_v15, %v11056_v16 }
 0x288   :  { %v11060_v19 = vpop.permute.xlu0 %11059 }
 0x289   :  { %v11062_v20 = vunpack.i.h.bf16 %v11060_v19  ;;  %v11061_v21 = vunpack.i.l.bf16 %v11060_v19  ;;  %10567 = vmatprep.subr.msk.bf16.mxu1 %vm12226_vm2, %v10565_v18 }
 0x28a   :  { %10570 = vmatpush3.bf16.xpose.msk.msra.mxu1 %vm12226_vm2, %v10565_v18  ;;  %v990_v29 = vpop.permute.xlu1 %989 }
 0x28b   :  { %v10575_v22 = vpack.c.bf16 %v11062_v20, %v11061_v21 }
 0x28c   :  { %v11065_v23 = vpop.permute.xlu0 %11064 }
 0x28d   :  { %v11067_v25 = vunpack.i.h.bf16 %v11065_v23  ;;  %v11066_v26 = vunpack.i.l.bf16 %v11065_v23  ;;  %10577 = vmatprep.subr.msk.bf16.mxu1 %vm12226_vm2, %v10575_v22 }
 0x28f   :  { %v10585_v27 = vpack.c.bf16 %v11067_v25, %v11066_v26 }
 0x290   :  { %v992_v30 = vpop.permute.xlu0 %991 }
 0x291   :  { %9909 = vmatmul.mubr.msk.f32.vlgmr.msra.gmra.mrb[2].mxu1 %vm425_vm1, %v12200_v10 }
 0x292   :  { %10580 = vmatpush3.bf16.xpose.msk.msra.mxu1 %vm12226_vm2, %v10575_v22  ;;  %9922 = vmatprep.mubr.msk.f32.mxu1 %vm425_vm1, %v624_v24 }
 0x293   :  { %10587 = vmatprep.subr.msk.bf16.mxu1 %vm12226_vm2, %v10585_v27 }
 0x299   :  { %9923 = vmatmul.mubr.msk.f32.vlgmr.msra.gmra.mrb[4].mxu1 %vm425_vm1, %v626_v28 }
 0x29a   :  { %10590 = vmatpush3.bf16.xpose.msk.msra.mxu1 %vm12226_vm2, %v10585_v27  ;;  %9946 = vmatprep.mubr.msk.f32.mxu1 %vm425_vm1, %v990_v29 }
 0x2a1   :  { %9947 = vmatmul.mubr.msk.f32.vlgmr.msra.gmra.mrb[6].mxu1 %vm425_vm1, %v992_v30 }
 0x364   :  { %v9910_v31 = vpop.f32.mrb[2].mxu1 }
 0x365   :  { %v510_v33 = vmul.f32 0.35355338, %v9910_v31  ;;  %v500_v34 = vpop.f32.mrb[3].mxu1 }
 0x366   :  { %v509_v36 = vmul.f32 0.35355338, %v500_v34 }
 0x367   :  { %v512_v37 = vadd.f32 %v510_v33, %v12248_v32 }
 0x368   :  { %v511_v38 = vadd.f32 %v509_v36, %v12250_v35 }
 0x369   :  { %v517_v39 = vsel %vm513_vm3, %v512_v37, -inf }
 0x36a   :  { %518 = vmax.xlane.f32.xlu0 %v517_v39  ;;  %v514_v40 = vsel %vm513_vm3, %v511_v38, -inf }
 0x36b   :  { %515 = vmax.xlane.f32.xlu1 %v514_v40 }
 0x36c   :  { %v9924_v41 = vpop.f32.mrb[4].mxu1 }
 0x36d   :  { %v715_v42 = vmul.f32 0.35355338, %v9924_v41  ;;  %v705_v43 = vpop.f32.mrb[5].mxu1 }
 0x36e   :  { %v714_v44 = vmul.f32 0.35355338, %v705_v43 }
 0x36f   :  { %v717_v45 = vadd.f32 %v715_v42, %v12248_v32 }
 0x370   :  { %v716_v46 = vadd.f32 %v714_v44, %v12250_v35 }
 0x371   :  { %v721_v47 = vsel %vm513_vm3, %v717_v45, -inf }
 0x372   :  { %722 = vmax.xlane.f32.xlu1 %v721_v47  ;;  %v718_v48 = vsel %vm513_vm3, %v716_v46, -inf }
 0x373   :  { %719 = vmax.xlane.f32.xlu0 %v718_v48 }
 0x374   :  { %v9948_v49 = vpop.f32.mrb[6].mxu1 }
 0x375   :  { %v1071_v50 = vpop.f32.mrb[7].mxu1  ;;  %v1081_v11 = vmul.f32 0.35355338, %v9948_v49 }
 0x376   :  { %v1080_v9 = vmul.f32 0.35355338, %v1071_v50 }
 0x377   :  { %v1083_v15 = vadd.f32 %v1081_v11, %v12248_v32 }
 0x378   :  { %v1082_v14 = vadd.f32 %v1080_v9, %v12250_v35 }
 0x379   :  { %v1087_v18 = vsel %vm513_vm3, %v1083_v15, -inf }
 0x37a   :  { %v1084_v16 = vsel %vm513_vm3, %v1082_v14, -inf }
 0x3f7   :  { %v519_v51 = vpop.xlane.xlu0 %518 }
 0x3f8   :  { %v521_v52 = vsub.f32 %v512_v37, %v519_v51  ;;  %v516_v53 = vpop.xlane.xlu1 %515 }
 0x3f9   :  { %v520_v54 = vsub.f32 %v511_v38, %v516_v53 }
 0x3fa   :  { %v524_v55 = vmul.f32 1.442695, %v521_v52 }
 0x3fb   :  { %v522_v56 = vmul.f32 1.442695, %v520_v54  ;;  %v415_v54 = vld [vmem:[%s13171_s6 + $0x8] sm:$0xff] }
 0x3fc   :  { %11283 = vpow2.f32 %v524_v55  ;;  %v414_v55 = vld [vmem:[%s13171_s6] sm:$0xff] }
 0x3fd   :  { %11285 = vpow2.f32 %v522_v56 }
 0x3ff   :  { %v723_v57 = vpop.xlane.xlu1 %722 }
 0x400   :  { %v725_v58 = vsub.f32 %v717_v45, %v723_v57  ;;  %v720_v59 = vpop.xlane.xlu0 %719 }
 0x401   :  { %v724_v60 = vsub.f32 %v716_v46, %v720_v59 }
 0x402   :  { %v728_v61 = vmul.f32 1.442695, %v725_v58 }
 0x403   :  { %v726_v62 = vmul.f32 1.442695, %v724_v60 }
 0x404   :  { %11287 = vpow2.f32 %v728_v61 }
 0x405   :  { %11289 = vpow2.f32 %v726_v62 }
 0x406   :  { %v11284_v63 = vpop.eup %11283 }
 0x407   :  { %v11286_v0 = vpop.eup %11285  ;;  %v529_v1 = vsel %vm513_vm3, %v11284_v63, 0.0 }
 0x408   :  { %530 = vadd.xlane.f32.xlu1 %v529_v1  ;;  %v526_v2 = vsel %vm513_vm3, %v11286_v0, 0.0 }
 0x409   :  { %527 = vadd.xlane.f32.xlu0 %v526_v2 }
 0x40e   :  { %v12262_v3 = vpop.eup %11287 }
 0x40f   :  { %v11290_v4 = vpop.eup %11289  ;;  %v733_v6 = vsel %vm513_vm3, %v12262_v3, 0.0 }
 0x410   :  { %734 = vadd.xlane.f32.xlu1 %v733_v6  ;;  %v730_v8 = vsel %vm513_vm3, %v11290_v4, 0.0 }
 0x411   :  { %731 = vadd.xlane.f32.xlu0 %v730_v8 }
 0x421   :  { %11074 = vrot.lane.b32.xlu1 %v12210_v13, %s11923_s2 }
 0x425   :  { %11079 = vrot.lane.b32.xlu1 %v12210_v13, %s11924_s10 }
 0x427   :  { %11069 = vrot.lane.b32.xlu0 %v12210_v13, %s11907_s9 }
 0x429   :  { %1278 = vrot.lane.b32.xlu1 %v12200_v10, %s11925_s11 }
 0x42b   :  { %1276 = vrot.lane.b32.xlu0 %v12202_v12, %s11925_s11 }
 0x44a   :  { %1085 = vmax.xlane.f32.xlu0 %v1084_v16 }
 0x44d   :  { %1088 = vmax.xlane.f32.xlu1 %v1087_v18 }
 0x45e   :  { %11084 = vrot.lane.b32.xlu1 %v12210_v13, %s11926_s15 }
 0x462   :  { %11089 = vrot.lane.b32.xlu1 %v12210_v13, %s11927_s21 }
 0x495   :  { %v531_v12 = vpop.xlane.xlu1 %530 }
 0x496   :  { %v528_v10 = vpop.xlane.xlu0 %527 }
 0x497   :  { %11291 = vrcp.f32 %v528_v10  ;;  %v416_v10 = vld [vmem:[%s13171_s6 + $0x10] sm:$0xff] }
 0x498   :  { %11293 = vrcp.f32 %v531_v12 }
 0x49d   :  { %v735_v19 = vpop.xlane.xlu1 %734 }
 0x49e   :  { %v732_v20 = vpop.xlane.xlu0 %731 }
 0x49f   :  { %11295 = vrcp.f32 %v732_v20 }
 0x4a0   :  { %11297 = vrcp.f32 %v735_v19 }
 0x4a1   :  { %v11292_v21 = vpop.eup %11291  ;;  %v11075_v22 = vpop.permute.xlu1 %11074 }
 0x4a2   :  { %v11070_v23 = vpop.permute.xlu0 %11069  ;;  %v534_v24 = vmul.f32 %v11292_v21, %v11286_v0  ;;  %v11077_v25 = vunpack.i.h.bf16 %v11075_v22  ;;  %v11076_v26 = vunpack.i.l.bf16 %v11075_v22  ;;  %v11294_v30 = vpop.eup %11293 }
 0x4a3   :  { %v11072_v27 = vunpack.i.h.bf16 %v11070_v23  ;;  %v11071_v28 = vunpack.i.l.bf16 %v11070_v23  ;;  %v535_v39 = vmul.f32 %v11294_v30, %v11284_v63 }
 0x4a4   :  { %9915 = vmatprep.mubr.msk.f32.mxu0 %vm513_vm3, %v534_v24  ;;  %v10581_v36 = vpack.c.bf16 %v11077_v25, %v11076_v26 }
 0x4a5   :  { %v11080_v29 = vpop.permute.xlu1 %11079  ;;  %v10571_v13 = vpack.c.bf16 %v11072_v27, %v11071_v28 }
 0x4a6   :  { %v11082_v31 = vunpack.i.h.bf16 %v11080_v29  ;;  %v11081_v33 = vunpack.i.l.bf16 %v11080_v29  ;;  %v1277_v34 = vpop.permute.xlu0 %1276 }
 0x4a7   :  { %10572 = vmatprep.subr.bf16.mxu0 %v10571_v13  ;;  %9965 = vmatprep.mubr.msk.f32.mxu1 %vm425_vm1, %v1277_v34 }
 0x4a8   :  { %v10595_v37 = vpack.c.bf16 %v11082_v31, %v11081_v33  ;;  %10574 = vmatpush3.bf16.msra.mxu0 %v10571_v13 }
 0x4a9   :  { %v11296_v38 = vpop.eup %11295  ;;  %10582 = vmatprep.subr.bf16.mxu0 %v10581_v36  ;;  %v1279_v43 = vpop.permute.xlu1 %1278 }
 0x4aa   :  { %v11298_v40 = vpop.eup %11297  ;;  %10597 = vmatprep.subr.msk.bf16.mxu1 %vm12226_vm2, %v10595_v37  ;;  %v738_v41 = vmul.f32 %v11296_v38, %v11290_v4 }
 0x4ab   :  { %9916 = vmatmul.mubr.msk.f32.vlgmr.msra.gmra.mrb[0].mxu0 %vm513_vm3, %v535_v39  ;;  %10600 = vmatpush3.bf16.xpose.msk.msra.mxu1 %vm12226_vm2, %v10595_v37  ;;  %v739_v42 = vmul.f32 %v11298_v40, %v12262_v3 }
 0x4ac   :  { %10584 = vmatpush3.bf16.msra.mxu0 %v10581_v36  ;;  %9929 = vmatprep.mubr.msk.f32.mxu0 %vm513_vm3, %v738_v41  ;;  %v417_v36 = vld [vmem:[%s13171_s6 + $0x18] sm:$0xff] }
 0x4ad   :  { %9932 = vmatprep.subr.mxu0 %v415_v54 }
 0x4af   :  { %9930 = vmatmul.mubr.msk.f32.vlgmr.msra.gmra.mrb[2].mxu0 %vm513_vm3, %v739_v42 }
 0x4b0   :  { %9933 = vmatpush3.msra.mxu0 %v415_v54 }
 0x4b1   :  { %9937 = vmatprep.subr.mxu0 %v414_v55 }
 0x4b2   :  { %9966 = vmatmul.mubr.msk.f32.vlgmr.msra.gmra.mrb[8].mxu1 %vm425_vm1, %v1279_v43 }
 0x4d7   :  { %v1086_v44 = vpop.xlane.xlu0 %1085 }
 0x4d8   :  { %v1090_v45 = vsub.f32 %v1082_v14, %v1086_v44 }
 0x4da   :  { %v1092_v46 = vmul.f32 1.442695, %v1090_v45  ;;  %v1089_v47 = vpop.xlane.xlu1 %1088  ;;  %v9262_v45 = vld [vmem:[#allocation13] ss:$0 sm:$0xff] }
 0x4db   :  { %v1091_v48 = vsub.f32 %v1083_v15, %v1089_v47 }
 0x4dc   :  { %11299 = vpow2.f32 %v1092_v46 }
 0x4dd   :  { %v1094_v49 = vmul.f32 1.442695, %v1091_v48 }
 0x4de   :  { %v11085_v57 = vpop.permute.xlu1 %11084 }
 0x4df   :  { %11301 = vpow2.f32 %v1094_v49  ;;  %v11087_v61 = vunpack.i.h.bf16 %v11085_v57  ;;  %v11086_v62 = vunpack.i.l.bf16 %v11085_v57 }
 0x4e1   :  { %v10591_v2 = vpack.c.bf16 %v11087_v61, %v11086_v62  ;;  %v1613_v62 = vld [vmem:[%s13172_s8] sm:$0xff] }
 0x4e2   :  { %v11090_v11 = vpop.permute.xlu1 %11089 }
 0x4e3   :  { %v11092_v12 = vunpack.i.h.bf16 %v11090_v11  ;;  %v11091_v19 = vunpack.i.l.bf16 %v11090_v11  ;;  %v1621_v11 = vld [vmem:[%s13173_s0 + $0x18] sm:$0xff] }
 0x4e5   :  { %v10601_v22 = vpack.c.bf16 %v11092_v12, %v11091_v19  ;;  %v1601_v19 = vlaneseq }
 0x4e6   :  { %v11300_v50 = vpop.eup %11299 }
 0x4e7   :  { %v1096_v51 = vsel %vm513_vm3, %v11300_v50, 0.0 }
 0x4e8   :  { %1097 = vadd.xlane.f32.xlu0 %v1096_v51 }
 0x4e9   :  { %v11302_v52 = vpop.eup %11301 }
 0x4ea   :  { %v1099_v53 = vsel %vm513_vm3, %v11302_v52, 0.0 }
 0x4ec   :  { %1100 = vadd.xlane.f32.xlu0 %v1099_v53 }
 0x575   :  { %v1098_v56 = vpop.xlane.xlu0 %1097 }
 0x576   :  { %11303 = vrcp.f32 %v1098_v56 }
 0x579   :  { %v1101_v59 = vpop.xlane.xlu0 %1100 }
 0x57a   :  { %11305 = vrcp.f32 %v1101_v59 }
 0x57e   :  { %v9917_v58 = vpop.f32.mrb[0].mxu0 }
 0x57f   :  { %v614_v60 = vpop.f32.mrb[1].mxu0 }
 0x580   :  { %v11304_v8 = vpop.eup %11303 }
 0x581   :  { %v1104_v18 = vmul.f32 %v11304_v8, %v11300_v50  ;;  %v1620_v8 = vld [vmem:[%s13173_s0 + $0x10] sm:$0xff] }
 0x582   :  { %v9931_v63 = vpop.f32.mrb[2].mxu0 }
 0x583   :  { %v818_v0 = vpop.f32.mrb[3].mxu0 }
 0x584   :  { %9934 = vmatprep.mubr.msk.f32.mxu0 %vm425_vm1, %v818_v0  ;;  %v11306_v16 = vpop.eup %11305 }
 0x585   :  { %9935 = vmatmul.mubr.msk.f32.vlgmr.msra.gmra.mrb[4].mxu0 %vm425_vm1, %v9931_v63  ;;  %v9967_v1 = vpop.f32.mrb[8].mxu1  ;;  %v1105_v21 = vmul.f32 %v11306_v16, %v11302_v52  ;;  %v1614_v63 = vld [vmem:[%s13172_s8 + $0x8] sm:$0xff] }
 0x586   :  { %9938 = vmatpush3.msra.mxu0 %v414_v55  ;;  %9939 = vmatprep.mubr.msk.f32.mxu0 %vm425_vm1, %v614_v60  ;;  %v1358_v3 = vpop.f32.mrb[9].mxu1  ;;  %v1368_v4 = vmul.f32 0.35355338, %v9967_v1  ;;  %v10605_v0 = vpack.c.bf16 %v1614_v63, %v1613_v62  ;;  %v1615_v1 = vld [vmem:[%s13172_s8 + $0x10] sm:$0xff]  ;;  %v1623_v16 = vld [vmem:[%s13173_s0 + $0x28] sm:$0xff] }
 0x587   :  { %10592 = vmatprep.subr.bf16.mxu0 %v10591_v2  ;;  %v1367_v6 = vmul.f32 0.35355338, %v1358_v3 }
 0x588   :  { %v1370_v15 = vadd.f32 %v1368_v4, %v12248_v32  ;;  %10606 = vmatprep.subr.bf16.mxu1 %v10605_v0  ;;  %v1618_v4 = vld [vmem:[%s13173_s0] sm:$0xff] }
 0x589   :  { %v1369_v9 = vadd.f32 %v1367_v6, %v12250_v35  ;;  %10608 = vmatpush3.bf16.msra.mxu1 %v10605_v0  ;;  %v1619_v6 = vld [vmem:[%s13173_s0 + $0x8] sm:$0xff] }
 0x58a   :  { %v1374_v20 = vsel %vm513_vm3, %v1370_v15, -inf }
 0x58b   :  { %v1371_v14 = vsel %vm513_vm3, %v1369_v9, -inf }
 0x58c   :  { %1372 = vmax.xlane.f32.xlu0 %v1371_v14  ;;  %v10617_v14 = vpack.c.bf16 %v1621_v11, %v1620_v8  ;;  %v9272_v8 = vld [vmem:[%s13168_s24 + $0x38] sm:$0xff] }
 0x58d   :  { %9940 = vmatmul.mubr.msk.f32.vlgmr.msra.gmra.mrb[4].mxu0 %vm425_vm1, %v9917_v58 }
 0x58e   :  { %10594 = vmatpush3.bf16.msra.mxu0 %v10591_v2  ;;  %9953 = vmatprep.mubr.msk.f32.mxu0 %vm513_vm3, %v1104_v18  ;;  %v1616_v2 = vld [vmem:[%s13172_s8 + $0x18] sm:$0xff] }
 0x58f   :  { %9956 = vmatprep.subr.mxu0 %v416_v10  ;;  %v10609_v3 = vpack.c.bf16 %v1616_v2, %v1615_v1  ;;  %v9269_v2 = vld [vmem:[%s13168_s24 + $0x20] sm:$0xff] }
 0x590   :  { %1375 = vmax.xlane.f32.xlu0 %v1374_v20 }
 0x591   :  { %9954 = vmatmul.mubr.msk.f32.vlgmr.msra.gmra.mrb[6].mxu0 %vm513_vm3, %v1105_v21  ;;  %10610 = vmatprep.subr.bf16.mxu1 %v10609_v3 }
 0x592   :  { %9957 = vmatpush3.msra.mxu0 %v416_v10  ;;  %10612 = vmatpush3.bf16.msra.mxu1 %v10609_v3  ;;  %v9270_v3 = vld [vmem:[%s13168_s24 + $0x28] sm:$0xff] }
 0x593   :  { %10602 = vmatprep.subr.bf16.mxu0 %v10601_v22 }
 0x619   :  { %v1373_v23 = vpop.xlane.xlu0 %1372 }
 0x61a   :  { %v1377_v24 = vsub.f32 %v1369_v9, %v1373_v23  ;;  %v10613_v9 = vpack.c.bf16 %v1619_v6, %v1618_v4  ;;  %v12336_v23 = vshrl.u32 %v1601_v19, 7  ;;  %v10629_v4 = vpack.c.bf16 %v9270_v3, %v9269_v2  ;;  %v9271_v6 = vld [vmem:[%s13168_s24 + $0x30] sm:$0xff] }
 0x61c   :  { %v1379_v25 = vmul.f32 1.442695, %v1377_v24  ;;  %10630 = vmatprep.subr.bf16.mxu1 %v10629_v4  ;;  %v12368_v19 = vsub.s32 3, %v12336_v23 }
 0x61d   :  { %v1376_v26 = vpop.xlane.xlu0 %1375 }
 0x61e   :  { %11307 = vpow2.f32 %v1379_v25  ;;  %v1378_v27 = vsub.f32 %v1370_v15, %v1376_v26  ;;  %v1622_v15 = vld [vmem:[%s13173_s0 + $0x20] sm:$0xff]  ;;  %v12339_v25 = vsub.s32 0, %v12336_v23  ;;  %v12341_v26 = vld [vmem:[#allocation17] sm:$0xf] }
 0x61f   :  { %v10621_v18 = vpack.c.bf16 %v1623_v16, %v1622_v15 }
 0x620   :  { %v1381_v28 = vmul.f32 1.442695, %v1378_v27  ;;  %v12344_v27 = vsub.s32 1, %v12336_v23 }
 0x622   :  { %11309 = vpow2.f32 %v1381_v28  ;;  %v1604_v28 = vrot.slane %v12341_v26, %v12339_v25 }
 0x628   :  { %v11308_v29 = vpop.eup %11307 }
 0x629   :  { %v1383_v13 = vsel %vm513_vm3, %v11308_v29, 0.0 }
 0x62a   :  { %1384 = vadd.xlane.f32.xlu0 %v1383_v13 }
 0x62c   :  { %v11310_v30 = vpop.eup %11309 }
 0x62d   :  { %v1386_v31 = vsel %vm513_vm3, %v11310_v30, 0.0 }
 0x62e   :  { %1387 = vadd.xlane.f32.xlu0 %v1386_v31 }
 0x664   :  { %v9955_v33 = vpop.f32.mrb[6].mxu0 }
 0x665   :  { %v1184_v34 = vpop.f32.mrb[7].mxu0 }
 0x666   :  { %9958 = vmatprep.mubr.msk.f32.mxu0 %vm425_vm1, %v1184_v34 }
 0x667   :  { %9959 = vmatmul.mubr.msk.f32.vlgmr.msra.gmra.mrb[4].mxu0 %vm425_vm1, %v9955_v33 }
 0x668   :  { %10604 = vmatpush3.bf16.msra.mxu0 %v10601_v22 }
 0x669   :  { %9975 = vmatprep.subr.mxu0 %v417_v36 }
 0x6b7   :  { %v1385_v37 = vpop.xlane.xlu0 %1384 }
 0x6b8   :  { %11311 = vrcp.f32 %v1385_v37 }
 0x6bb   :  { %v1388_v38 = vpop.xlane.xlu0 %1387 }
 0x6bc   :  { %11313 = vrcp.f32 %v1388_v38 }
 0x6c2   :  { %v11312_v39 = vpop.eup %11311 }
 0x6c3   :  { %v1391_v40 = vmul.f32 %v11312_v39, %v11308_v29  ;;  %v1624_v39 = vld [vmem:[%s13173_s0 + $0x30] sm:$0xff] }
 0x6c5   :  { %9972 = vmatprep.mubr.msk.f32.mxu0 %vm513_vm3, %v1391_v40  ;;  %v1625_v40 = vld [vmem:[%s13173_s0 + $0x38] sm:$0xff] }
 0x6c6   :  { %v11314_v41 = vpop.eup %11313 }
 0x6c7   :  { %v1392_v42 = vmul.f32 %v11314_v41, %v11310_v30  ;;  %v1610_v30 = vrot.slane %v12341_v26, %v12344_v27  ;;  %v10625_v41 = vpack.c.bf16 %v1625_v40, %v1624_v39 }
 0x6c9   :  { %9973 = vmatmul.mubr.msk.f32.vlgmr.msra.gmra.mrb[8].mxu0 %vm513_vm3, %v1392_v42  ;;  %v9263_v42 = vld [vmem:[#allocation14] ss:$0 sm:$0xff] }
 0x6ca   :  { %9976 = vmatpush3.msra.mxu0 %v417_v36 }
 0x6cb   :  { %10614 = vmatprep.subr.bf16.mxu0 %v10613_v9 }
 0x79c   :  { %v9974_v43 = vpop.f32.mrb[8].mxu0 }
 0x79d   :  { %v1471_v44 = vpop.f32.mrb[9].mxu0 }
 0x79e   :  { %9977 = vmatprep.mubr.msk.f32.mxu0 %vm425_vm1, %v1471_v44 }
 0x79f   :  { %9978 = vmatmul.mubr.msk.f32.vlgmr.msra.gmra.mrb[4].mxu0 %vm425_vm1, %v9974_v43 }
 0x7a0   :  { %10616 = vmatpush3.bf16.msra.mxu0 %v10613_v9  ;;  %v10633_v9 = vpack.c.bf16 %v9272_v8, %v9271_v6 }
 0x7a1   :  { %10618 = vmatprep.subr.bf16.mxu0 %v10617_v14 }
 0x7a4   :  { %10620 = vmatpush3.bf16.msra.mxu0 %v10617_v14 }
 0x7a5   :  { %10622 = vmatprep.subr.bf16.mxu0 %v10621_v18 }
 0x7a8   :  { %10624 = vmatpush3.bf16.msra.mxu0 %v10621_v18 }
 0x7a9   :  { %10626 = vmatprep.subr.bf16.mxu0 %v10625_v41 }
 0x7ac   :  { %10628 = vmatpush3.bf16.msra.mxu0 %v10625_v41 }
 0x872   :  { %v9979_v46 = vpop.f32.mrb[4].mxu0 }
 0x873   :  { %v1570_v47 = vadd.f32 %v9979_v46, %v9262_v45  ;;  %v1552_v48 = vpop.f32.mrb[5].mxu0 }
 0x874   :  { %v1569_v49 = vadd.f32 %v9262_v45, %v1552_v48 }
 0x875   :  { %v1573_v50 = vadd.f32 %v1570_v47, %v12196_v7 }
 0x876   :  { %v1572_v51 = vadd.f32 %v1569_v49, %v12192_v5  ;;  %v9266_v49 = vld [vmem:[#allocation16] ss:$0 sm:$0xff] }
 0x877   :  { %v1577_v52 = vsel %vm332_vm0, %v1573_v50, 0.0 }
 0x878   :  { %1578 = vadd.xlane.f32.xlu1 %v1577_v52  ;;  %v1574_v53 = vsel %vm332_vm0, %v1572_v51, 0.0 }
 0x879   :  { %1575 = vadd.xlane.f32.xlu0 %v1574_v53 }
 0x905   :  { %v1579_v54 = vpop.xlane.xlu1 %1578 }
 0x906   :  { %v1582_v55 = vmul.f32 0.03125, %v1579_v54  ;;  %v1576_v56 = vpop.xlane.xlu0 %1575 }
 0x907   :  { %v1581_v57 = vmul.f32 0.03125, %v1576_v56 }
 0x908   :  { %v1584_v58 = vsub.f32 %v1573_v50, %v1582_v55 }
 0x909   :  { %v1583_v59 = vsub.f32 %v1572_v51, %v1581_v57 }
 0x90a   :  { %v1586_v7 = vmul.f32 %v1584_v58, %v1584_v58 }
 0x90b   :  { %v1585_v60 = vmul.f32 %v1583_v59, %v1583_v59 }
 0x90c   :  { %v1590_v61 = vsel %vm332_vm0, %v1586_v7, 0.0 }
 0x90d   :  { %v1587_v5 = vsel %vm332_vm0, %v1585_v60, 0.0 }
 0x90e   :  { %1588 = vadd.xlane.f32.xlu0 %v1587_v5 }
 0x912   :  { %1591 = vadd.xlane.f32.xlu0 %v1590_v61 }
 0x99b   :  { %v1589_v10 = vpop.xlane.xlu0 %1588 }
 0x99c   :  { %v1593_v12 = vmul.f32 0.03125, %v1589_v10 }
 0x99e   :  { %v1595_v20 = vadd.f32 1e-05, %v1593_v12  ;;  %v12365_v12 = vsub.s32 2, %v12336_v23 }
 0x99f   :  { %v1592_v21 = vpop.xlane.xlu0 %1591 }
 0x9a0   :  { %11315 = vrsqrt.f32 %v1595_v20  ;;  %v1594_v22 = vmul.f32 0.03125, %v1592_v21  ;;  %v1835_v20 = vrot.slane %v12341_v26, %v12365_v12 }
 0x9a2   :  { %v1596_v24 = vadd.f32 1e-05, %v1594_v22 }
 0x9a4   :  { %11317 = vrsqrt.f32 %v1596_v24  ;;  %v1841_v24 = vrot.slane %v12341_v26, %v12368_v19 }
 0x9aa   :  { %v11316_v29 = vpop.eup %11315 }
 0x9ab   :  { %v1599_v13 = vmul.f32 %v11316_v29, %v1583_v59 }
 0x9ad   :  { %v1605_v31 = vmul.f32 %v1604_v28, %v1599_v13 }
 0x9ae   :  { %v11318_v33 = vpop.eup %11317 }
 0x9af   :  { %v1600_v34 = vmul.f32 %v11318_v33, %v1584_v58  ;;  %v1611_v36 = vadd.f32 %v1610_v30, %v1605_v31 }
 0x9b1   :  { %v1606_v37 = vmul.f32 %v1604_v28, %v1600_v34  ;;  %9988 = vmatprep.mubr.msk.f32.mxu1 %vm332_vm0, %v1611_v36  ;;  %v9273_v34 = vld [vmem:[#allocation11 + $0x1] ss:$0 sm:$0xff] }
 0x9b3   :  { %v1612_v38 = vadd.f32 %v1610_v30, %v1606_v37 }
 0x9b5   :  { %9989 = vmatmul.mubr.msk.f32.vlgmr.msra.gmra.mrb[10].mxu1 %vm332_vm0, %v1612_v38 }
 0x9b6   :  { %10632 = vmatpush3.bf16.msra.mxu1 %v10629_v4 }
 0x9b7   :  { %10634 = vmatprep.subr.bf16.mxu1 %v10633_v9 }
 0x9ba   :  { %10636 = vmatpush3.bf16.msra.mxu1 %v10633_v9 }
 0xa88   :  { %v9990_v43 = vpop.f32.mrb[10].mxu1 }
 0xa89   :  { %v1711_v44 = vadd.f32 %v9990_v43, %v9263_v42  ;;  %v1705_v45 = vpop.f32.mrb[11].mxu1 }
 0xa8a   :  { %v1706_v46 = vadd.f32 %v9263_v42, %v1705_v45 }
 0xa8b   :  { %v1715_v48 = vmax.f32 %v1711_v44, 0.0 }
 0xa8c   :  { %v1714_v47 = vmax.f32 %v1706_v46, 0.0 }
 0xa8e   :  { %10007 = vmatprep.mubr.msk.f32.mxu0 %vm1722_vm4, %v1714_v47 }
 0xa8f   :  { %10008 = vmatmul.mubr.msk.f32.vlgmr.msra.gmra.mrb[10].mxu0 %vm1722_vm4, %v1715_v48 }
 0xb62   :  { %v10009_v50 = vpop.f32.mrb[10].mxu0 }
 0xb63   :  { %v1795_v51 = vpop.f32.mrb[11].mxu0  ;;  %v1801_v52 = vadd.f32 %v10009_v50, %v9266_v49 }
 0xb64   :  { %v1796_v53 = vadd.f32 %v9266_v49, %v1795_v51 }
 0xb65   :  { %v1805_v56 = vadd.f32 %v1801_v52, %v1612_v38 }
 0xb66   :  { %v1804_v54 = vadd.f32 %v1796_v53, %v1611_v36 }
 0xb67   :  { %v1809_v57 = vsel %vm332_vm0, %v1805_v56, 0.0 }
 0xb68   :  { %v1806_v55 = vsel %vm332_vm0, %v1804_v54, 0.0 }
 0xb69   :  { %1807 = vadd.xlane.f32.xlu0 %v1806_v55 }
 0xb6d   :  { %1810 = vadd.xlane.f32.xlu0 %v1809_v57 }
 0xbf6   :  { %v1808_v58 = vpop.xlane.xlu0 %1807 }
 0xbf7   :  { %v1812_v59 = vmul.f32 0.03125, %v1808_v58 }
 0xbf9   :  { %v1814_v60 = vsub.f32 %v1804_v54, %v1812_v59 }
 0xbfa   :  { %v1811_v5 = vpop.xlane.xlu0 %1810 }
 0xbfb   :  { %v1813_v7 = vmul.f32 0.03125, %v1811_v5  ;;  %v1816_v61 = vmul.f32 %v1814_v60, %v1814_v60 }
 0xbfd   :  { %v1815_v62 = vsub.f32 %v1805_v56, %v1813_v7  ;;  %v1818_v63 = vsel %vm332_vm0, %v1816_v61, 0.0 }
 0xbfe   :  { %1819 = vadd.xlane.f32.xlu0 %v1818_v63 }
 0xbff   :  { %v1817_v0 = vmul.f32 %v1815_v62, %v1815_v62 }
 0xc01   :  { %v1821_v1 = vsel %vm332_vm0, %v1817_v0, 0.0 }
 0xc02   :  { %1822 = vadd.xlane.f32.xlu0 %v1821_v1 }
 0xc8b   :  { %v1820_v11 = vpop.xlane.xlu0 %1819 }
 0xc8c   :  { %v1824_v14 = vmul.f32 0.03125, %v1820_v11 }
 0xc8e   :  { %v1826_v15 = vadd.f32 1e-05, %v1824_v14 }
 0xc8f   :  { %v1823_v16 = vpop.xlane.xlu0 %1822 }
 0xc90   :  { %11319 = vrsqrt.f32 %v1826_v15  ;;  %v1825_v18 = vmul.f32 0.03125, %v1823_v16 }
 0xc92   :  { %v1827_v10 = vadd.f32 1e-05, %v1825_v18 }
 0xc94   :  { %11321 = vrsqrt.f32 %v1827_v10 }
 0xc9a   :  { %v11320_v21 = vpop.eup %11319 }
 0xc9b   :  { %v1830_v22 = vmul.f32 %v11320_v21, %v1814_v60 }
 0xc9d   :  { %v1836_v28 = vmul.f32 %v1835_v20, %v1830_v22 }
 0xc9e   :  { %v11322_v29 = vpop.eup %11321 }
 0xc9f   :  { %v1831_v13 = vmul.f32 %v11322_v29, %v1815_v62  ;;  %v12374_v30 = vadd.f32 %v1841_v24, %v1836_v28 }
 0xca1   :  { %v1837_v31 = vmul.f32 %v1835_v20, %v1831_v13  ;;  %10018 = vmatprep.mubr.msk.f32.mxu1 %vm332_vm0, %v12374_v30 }
 0xca3   :  { %v12378_v33 = vadd.f32 %v1841_v24, %v1837_v31 }
 0xca5   :  { %10019 = vmatmul.mubr.msk.f32.vlgmr.msra.gmra.mrb[12].mxu1 %vm332_vm0, %v12378_v33 }
 0xd78   :  { %v10020_v36 = vpop.f32.mrb[12].mxu1 }
 0xd79   :  { %v12382_v37 = vadd.f32 %v10020_v36, %v9273_v34  ;;  %v1929_v38 = vpop.f32.mrb[13].mxu1 }
 0xd7a   :  { %v12384_v26 = vadd.f32 %v9273_v34, %v1929_v38 }
 0xd7c   :  { %10025 = vmatprep.mubr.msk.f32.mxu1 %vm425_vm1, %v12384_v26  ;;  %v12390_v39 = vpack.i.bf16 %v12382_v37, %v12384_v26 }
 0xd7e   :  { %11099 = vrot.lane.b32.xlu1 %v12390_v39, %s11920_s19  ;;  %11094 = vrot.lane.b32.xlu0 %v12390_v39, %s11919_s5 }
 0xd82   :  { %11104 = vrot.lane.b32.xlu1 %v12390_v39, %s11922_s1  ;;  %2147 = vrot.lane.b32.xlu0 %v12384_v26, %s11918_s14 }
 0xd86   :  { %2515 = vrot.lane.b32.xlu1 %v12382_v37, %s11921_s13  ;;  %2149 = vrot.lane.b32.xlu0 %v12382_v37, %s11918_s14 }
 0xd8a   :  { %2513 = vrot.lane.b32.xlu0 %v12384_v26, %s11921_s13 }
 0xdf0   :  { %v11100_v40 = vpop.permute.xlu1 %11099  ;;  %v11095_v41 = vpop.permute.xlu0 %11094 }
 0xdf1   :  { %v11102_v42 = vunpack.i.h.bf16 %v11100_v40  ;;  %v11101_v43 = vunpack.i.l.bf16 %v11100_v40  ;;  %v11097_v44 = vunpack.i.h.bf16 %v11095_v41  ;;  %v11096_v45 = vunpack.i.l.bf16 %v11095_v41 }
 0xdf3   :  { %v10637_v46 = vpack.c.bf16 %v11097_v44, %v11096_v45  ;;  %v10647_v47 = vpack.c.bf16 %v11102_v42, %v11101_v43 }
 0xdf4   :  { %v11105_v48 = vpop.permute.xlu1 %11104  ;;  %v2148_v51 = vpop.permute.xlu0 %2147 }
 0xdf5   :  { %10639 = vmatprep.subr.msk.bf16.mxu1 %vm12226_vm2, %v10637_v46  ;;  %v11107_v49 = vunpack.i.h.bf16 %v11105_v48  ;;  %v11106_v50 = vunpack.i.l.bf16 %v11105_v48 }
 0xdf6   :  { %10642 = vmatpush3.bf16.xpose.msk.msra.mxu1 %vm12226_vm2, %v10637_v46 }
 0xdf7   :  { %10649 = vmatprep.subr.msk.bf16.mxu1 %vm12226_vm2, %v10647_v47  ;;  %v10657_v52 = vpack.c.bf16 %v11107_v49, %v11106_v50 }
 0xdf8   :  { %v2150_v53 = vpop.permute.xlu0 %2149  ;;  %v2516_v55 = vpop.permute.xlu1 %2515 }
 0xdfc   :  { %v2514_v54 = vpop.permute.xlu0 %2513 }
 0xdfd   :  { %10026 = vmatmul.mubr.msk.f32.vlgmr.msra.gmra.mrb[14].mxu1 %vm425_vm1, %v12382_v37 }
 0xdfe   :  { %10652 = vmatpush3.bf16.xpose.msk.msra.mxu1 %vm12226_vm2, %v10647_v47  ;;  %10039 = vmatprep.mubr.msk.f32.mxu1 %vm425_vm1, %v2148_v51 }
 0xdff   :  { %10659 = vmatprep.subr.msk.bf16.mxu1 %vm12226_vm2, %v10657_v52 }
 0xe05   :  { %10040 = vmatmul.mubr.msk.f32.vlgmr.msra.gmra.mrb[16].mxu1 %vm425_vm1, %v2150_v53 }
 0xe06   :  { %10662 = vmatpush3.bf16.xpose.msk.msra.mxu1 %vm12226_vm2, %v10657_v52  ;;  %10063 = vmatprep.mubr.msk.f32.mxu1 %vm425_vm1, %v2514_v54 }
 0xe0d   :  { %10064 = vmatmul.mubr.msk.f32.vlgmr.msra.gmra.mrb[18].mxu1 %vm425_vm1, %v2516_v55 }
 0xed0   :  { %v10027_v56 = vpop.f32.mrb[14].mxu1 }
 0xed1   :  { %v2035_v57 = vmul.f32 0.35355338, %v10027_v56  ;;  %v2025_v58 = vpop.f32.mrb[15].mxu1 }
 0xed2   :  { %v2034_v59 = vmul.f32 0.35355338, %v2025_v58 }
 0xed3   :  { %v2037_v60 = vadd.f32 %v2035_v57, %v12248_v32 }
 0xed4   :  { %v2036_v5 = vadd.f32 %v2034_v59, %v12250_v35 }
 0xed5   :  { %v2041_v7 = vsel %vm513_vm3, %v2037_v60, -inf }
 0xed6   :  { %2042 = vmax.xlane.f32.xlu1 %v2041_v7  ;;  %v2038_v61 = vsel %vm513_vm3, %v2036_v5, -inf }
 0xed7   :  { %2039 = vmax.xlane.f32.xlu0 %v2038_v61 }
 0xed8   :  { %v10041_v62 = vpop.f32.mrb[16].mxu1 }
 0xed9   :  { %v2229_v63 = vpop.f32.mrb[17].mxu1  ;;  %v2239_v0 = vmul.f32 0.35355338, %v10041_v62 }
 0xeda   :  { %v2238_v1 = vmul.f32 0.35355338, %v2229_v63 }
 0xedb   :  { %v2241_v4 = vadd.f32 %v2239_v0, %v12248_v32 }
 0xedc   :  { %v2240_v2 = vadd.f32 %v2238_v1, %v12250_v35 }
 0xedd   :  { %v2245_v9 = vsel %vm513_vm3, %v2241_v4, -inf }
 0xede   :  { %v2242_v3 = vsel %vm513_vm3, %v2240_v2, -inf }
 0xedf   :  { %2243 = vmax.xlane.f32.xlu0 %v2242_v3 }
 0xee0   :  { %v10065_v6 = vpop.f32.mrb[18].mxu1 }
 0xee1   :  { %v2595_v8 = vpop.f32.mrb[19].mxu1  ;;  %v2605_v43 = vmul.f32 0.35355338, %v10065_v6 }
 0xee2   :  { %v2604_v44 = vmul.f32 0.35355338, %v2595_v8 }
 0xee3   :  { %2246 = vmax.xlane.f32.xlu0 %v2245_v9  ;;  %v2607_v46 = vadd.f32 %v2605_v43, %v12248_v32 }
 0xee4   :  { %v2606_v45 = vadd.f32 %v2604_v44, %v12250_v35 }
 0xee5   :  { %v2611_v48 = vsel %vm513_vm3, %v2607_v46, -inf }
 0xee6   :  { %v2608_v47 = vsel %vm513_vm3, %v2606_v45, -inf }
 0xf63   :  { %v2043_v11 = vpop.xlane.xlu1 %2042 }
 0xf64   :  { %v2045_v14 = vsub.f32 %v2037_v60, %v2043_v11  ;;  %v2040_v15 = vpop.xlane.xlu0 %2039 }
 0xf65   :  { %v2044_v16 = vsub.f32 %v2036_v5, %v2040_v15 }
 0xf66   :  { %v2048_v18 = vmul.f32 1.442695, %v2045_v14 }
 0xf67   :  { %v2046_v10 = vmul.f32 1.442695, %v2044_v16 }
 0xf68   :  { %11323 = vpow2.f32 %v2048_v18 }
 0xf69   :  { %11325 = vpow2.f32 %v2046_v10 }
 0xf6c   :  { %v2244_v20 = vpop.xlane.xlu0 %2243 }
 0xf6d   :  { %v2248_v21 = vsub.f32 %v2240_v2, %v2244_v20 }
 0xf6f   :  { %v2250_v22 = vmul.f32 1.442695, %v2248_v21  ;;  %v9277_v21 = vld [vmem:[%s13171_s6 + $0x28] sm:$0xff] }
 0xf70   :  { %v2247_v24 = vpop.xlane.xlu0 %2246 }
 0xf71   :  { %11327 = vpow2.f32 %v2250_v22  ;;  %v2249_v28 = vsub.f32 %v2241_v4, %v2247_v24  ;;  %v9276_v22 = vld [vmem:[%s13171_s6 + $0x20] sm:$0xff] }
 0xf72   :  { %v11324_v29 = vpop.eup %11323 }
 0xf73   :  { %v11326_v13 = vpop.eup %11325  ;;  %v2252_v31 = vmul.f32 1.442695, %v2249_v28  ;;  %v2053_v34 = vsel %vm513_vm3, %v11324_v29, 0.0 }
 0xf74   :  { %2054 = vadd.xlane.f32.xlu0 %v2053_v34  ;;  %v2050_v36 = vsel %vm513_vm3, %v11326_v13, 0.0 }
 0xf75   :  { %11329 = vpow2.f32 %v2252_v31  ;;  %2051 = vadd.xlane.f32.xlu1 %v2050_v36 }
 0xf7b   :  { %v11328_v38 = vpop.eup %11327 }
 0xf7c   :  { %v2254_v40 = vsel %vm513_vm3, %v11328_v38, 0.0 }
 0xf7d   :  { %2255 = vadd.xlane.f32.xlu1 %v2254_v40 }
 0xf7f   :  { %v11330_v41 = vpop.eup %11329 }
 0xf80   :  { %v2257_v42 = vsel %vm513_vm3, %v11330_v41, 0.0 }
 0xf81   :  { %2258 = vadd.xlane.f32.xlu0 %v2257_v42 }
 0xf8e   :  { %11109 = vrot.lane.b32.xlu1 %v12390_v39, %s11907_s9 }
 0xf92   :  { %11119 = vrot.lane.b32.xlu1 %v12390_v39, %s11924_s10 }
 0xf96   :  { %2800 = vrot.lane.b32.xlu1 %v12384_v26, %s11925_s11 }
 0xf97   :  { %11114 = vrot.lane.b32.xlu0 %v12390_v39, %s11923_s2 }
 0xf9b   :  { %2802 = vrot.lane.b32.xlu0 %v12382_v37, %s11925_s11 }
 0xfba   :  { %2609 = vmax.xlane.f32.xlu1 %v2608_v47  ;;  %2612 = vmax.xlane.f32.xlu0 %v2611_v48  ;;  %v11515_v47 = vld [vmem:[#allocation7] sm:$0xff] }
0x1001   :  { %v2055_v26 = vpop.xlane.xlu0 %2054 }
0x1002   :  { %v2052_v49 = vpop.xlane.xlu1 %2051 }
0x1003   :  { %11331 = vrcp.f32 %v2052_v49 }
0x1004   :  { %11333 = vrcp.f32 %v2055_v26 }
0x100a   :  { %v2256_v50 = vpop.xlane.xlu1 %2255 }
0x100b   :  { %11335 = vrcp.f32 %v2256_v50 }
0x100d   :  { %v11332_v51 = vpop.eup %11331 }
0x100e   :  { %v11110_v37 = vpop.permute.xlu1 %11109  ;;  %v2259_v52 = vpop.xlane.xlu0 %2258  ;;  %v2058_v53 = vmul.f32 %v11332_v51, %v11326_v13  ;;  %v11516_v51 = vld [vmem:[#allocation7 + $0x8] sm:$0xff] }
0x100f   :  { %v11112_v54 = vunpack.i.h.bf16 %v11110_v37  ;;  %v11111_v35 = vunpack.i.l.bf16 %v11110_v37  ;;  %11337 = vrcp.f32 %v2259_v52  ;;  %v11334_v55 = vpop.eup %11333 }
0x1010   :  { %10032 = vmatprep.mubr.msk.f32.mxu0 %vm513_vm3, %v2058_v53  ;;  %v2059_v62 = vmul.f32 %v11334_v55, %v11324_v29 }
0x1011   :  { %v10643_v32 = vpack.c.bf16 %v11112_v54, %v11111_v35  ;;  %v9278_v54 = vld [vmem:[%s13171_s6 + $0x30] sm:$0xff] }
0x1012   :  { %v11120_v56 = vpop.permute.xlu1 %11119  ;;  %v11115_v57 = vpop.permute.xlu0 %11114 }
0x1013   :  { %v11122_v58 = vunpack.i.h.bf16 %v11120_v56  ;;  %v11121_v59 = vunpack.i.l.bf16 %v11120_v56  ;;  %v11117_v60 = vunpack.i.h.bf16 %v11115_v57  ;;  %v11116_v5 = vunpack.i.l.bf16 %v11115_v57  ;;  %10644 = vmatprep.subr.bf16.mxu0 %v10643_v32 }
0x1014   :  { %10646 = vmatpush3.bf16.msra.mxu0 %v10643_v32 }
0x1015   :  { %v11336_v7 = vpop.eup %11335  ;;  %v10667_v61 = vpack.c.bf16 %v11122_v58, %v11121_v59  ;;  %v10653_v63 = vpack.c.bf16 %v11117_v60, %v11116_v5 }
0x1016   :  { %v2801_v0 = vpop.permute.xlu1 %2800  ;;  %v2262_v1 = vmul.f32 %v11336_v7, %v11328_v38  ;;  %v2803_v4 = vpop.permute.xlu0 %2802 }
0x1017   :  { %10033 = vmatmul.mubr.msk.f32.vlgmr.msra.gmra.mrb[12].mxu0 %vm513_vm3, %v2059_v62  ;;  %10654 = vmatprep.subr.bf16.mxu0 %v10653_v63 }
0x1018   :  { %10669 = vmatprep.subr.msk.bf16.mxu1 %vm12226_vm2, %v10667_v61  ;;  %10082 = vmatprep.mubr.msk.f32.mxu1 %vm425_vm1, %v2801_v0 }
0x1019   :  { %v11338_v2 = vpop.eup %11337  ;;  %10656 = vmatpush3.bf16.msra.mxu0 %v10653_v63  ;;  %10046 = vmatprep.mubr.msk.f32.mxu0 %vm513_vm3, %v2262_v1 }
0x101a   :  { %10672 = vmatpush3.bf16.xpose.msk.msra.mxu1 %vm12226_vm2, %v10667_v61  ;;  %v2263_v3 = vmul.f32 %v11338_v2, %v11330_v41  ;;  %10049 = vmatprep.subr.mxu0 %v9277_v21 }
0x101c   :  { %10047 = vmatmul.mubr.msk.f32.vlgmr.msra.gmra.mrb[14].mxu0 %vm513_vm3, %v2263_v3 }
0x101d   :  { %10050 = vmatpush3.msra.mxu0 %v9277_v21 }
0x101e   :  { %10054 = vmatprep.subr.mxu0 %v9276_v22 }
0x1021   :  { %10083 = vmatmul.mubr.msk.f32.vlgmr.msra.gmra.mrb[20].mxu1 %vm425_vm1, %v2803_v4 }
0x1047   :  { %v2610_v6 = vpop.xlane.xlu1 %2609  ;;  %v2613_v8 = vpop.xlane.xlu0 %2612 }
0x1048   :  { %v2614_v9 = vsub.f32 %v2606_v45, %v2610_v6  ;;  %v2615_v11 = vsub.f32 %v2607_v46, %v2613_v8  ;;  %v9279_v6 = vld [vmem:[%s13171_s6 + $0x38] sm:$0xff] }
0x104a   :  { %v2616_v14 = vmul.f32 1.442695, %v2614_v9  ;;  %v2618_v15 = vmul.f32 1.442695, %v2615_v11 }
0x104c   :  { %11339 = vpow2.f32 %v2616_v14 }
0x104d   :  { %11341 = vpow2.f32 %v2618_v15 }
0x1056   :  { %v11340_v16 = vpop.eup %11339 }
0x1057   :  { %v11342_v18 = vpop.eup %11341  ;;  %v2620_v10 = vsel %vm513_vm3, %v11340_v16, 0.0 }
0x1058   :  { %2621 = vadd.xlane.f32.xlu0 %v2620_v10  ;;  %v2623_v20 = vsel %vm513_vm3, %v11342_v18, 0.0 }
0x1059   :  { %2624 = vadd.xlane.f32.xlu1 %v2623_v20 }
0x106e   :  { %11124 = vrot.lane.b32.xlu0 %v12390_v39, %s11926_s15 }
0x10e5   :  { %v2622_v24 = vpop.xlane.xlu0 %2621 }
0x10e6   :  { %v2625_v31 = vpop.xlane.xlu1 %2624  ;;  %11343 = vrcp.f32 %v2622_v24 }
0x10e7   :  { %11345 = vrcp.f32 %v2625_v31 }
0x10e9   :  { %v11125_v29 = vpop.permute.xlu0 %11124 }
0x10ea   :  { %v10034_v28 = vpop.f32.mrb[12].mxu0  ;;  %v11127_v34 = vunpack.i.h.bf16 %v11125_v29  ;;  %v11126_v36 = vunpack.i.l.bf16 %v11125_v29 }
0x10eb   :  { %v2138_v13 = vpop.f32.mrb[13].mxu0 }
0x10ec   :  { %v10663_v41 = vpack.c.bf16 %v11127_v34, %v11126_v36 }
0x10ef   :  { %v10048_v38 = vpop.f32.mrb[14].mxu0 }
0x10f0   :  { %v2342_v40 = vpop.f32.mrb[15].mxu0  ;;  %v11344_v46 = vpop.eup %11343 }
0x10f1   :  { %10051 = vmatprep.mubr.msk.f32.mxu0 %vm425_vm1, %v2342_v40  ;;  %v11346_v49 = vpop.eup %11345  ;;  %v2628_v50 = vmul.f32 %v11344_v46, %v11340_v16  ;;  %v9312_v16 = vld [vmem:[#allocation13 + $0x1] ss:$0 sm:$0xff] }
0x10f2   :  { %10052 = vmatmul.mubr.msk.f32.vlgmr.msra.gmra.mrb[16].mxu0 %vm425_vm1, %v10048_v38  ;;  %v2629_v52 = vmul.f32 %v11346_v49, %v11342_v18  ;;  %v9315_v46 = vld [vmem:[%s13172_s8 + $0x30] sm:$0xff]  ;;  %v3374_v49 = vld [vmem:[%s13174_s27] sm:$0xff] }
0x10f3   :  { %10055 = vmatpush3.msra.mxu0 %v9276_v22  ;;  %10056 = vmatprep.mubr.msk.f32.mxu0 %vm425_vm1, %v2138_v13 }
0x10f4   :  { %v10084_v42 = vpop.f32.mrb[20].mxu1  ;;  %10664 = vmatprep.subr.bf16.mxu0 %v10663_v41 }
0x10f5   :  { %v2882_v43 = vpop.f32.mrb[21].mxu1  ;;  %v2892_v44 = vmul.f32 0.35355338, %v10084_v42 }
0x10f6   :  { %v2891_v45 = vmul.f32 0.35355338, %v2882_v43  ;;  %v9313_v43 = vld [vmem:[%s13172_s8 + $0x20] sm:$0xff] }
0x10f7   :  { %v2894_v37 = vadd.f32 %v11516_v51, %v2892_v44  ;;  %v9314_v44 = vld [vmem:[%s13172_s8 + $0x28] sm:$0xff]  ;;  %v9317_v51 = vld [vmem:[%s13173_s0 + $0x40] sm:$0xff] }
0x10f8   :  { %v2893_v48 = vadd.f32 %v11515_v47, %v2891_v45  ;;  %v10677_v45 = vpack.c.bf16 %v9314_v44, %v9313_v43  ;;  %v9316_v47 = vld [vmem:[%s13172_s8 + $0x38] sm:$0xff] }
0x10f9   :  { %v2898_v53 = vsel %vm513_vm3, %v2894_v37, -inf }
0x10fa   :  { %v2895_v26 = vsel %vm513_vm3, %v2893_v48, -inf  ;;  %10057 = vmatmul.mubr.msk.f32.vlgmr.msra.gmra.mrb[16].mxu0 %vm425_vm1, %v10034_v28  ;;  %10678 = vmatprep.subr.bf16.mxu1 %v10677_v45 }
0x10fb   :  { %2896 = vmax.xlane.f32.xlu1 %v2895_v26  ;;  %10666 = vmatpush3.bf16.msra.mxu0 %v10663_v41  ;;  %v3375_v26 = vld [vmem:[%s13174_s27 + $0x8] sm:$0xff] }
0x10fc   :  { %10070 = vmatprep.mubr.msk.f32.mxu0 %vm513_vm3, %v2628_v50  ;;  %10073 = vmatprep.subr.mxu0 %v9278_v54  ;;  %v10701_v50 = vpack.c.bf16 %v3375_v26, %v3374_v49 }
0x10fd   :  { %10680 = vmatpush3.bf16.msra.mxu1 %v10677_v45 }
0x10fe   :  { %10071 = vmatmul.mubr.msk.f32.vlgmr.msra.gmra.mrb[18].mxu0 %vm513_vm3, %v2629_v52  ;;  %v9319_v52 = vld [vmem:[%s13173_s0 + $0x50] sm:$0xff] }
0x10ff   :  { %2899 = vmax.xlane.f32.xlu1 %v2898_v53  ;;  %10074 = vmatpush3.msra.mxu0 %v9278_v54  ;;  %v9320_v54 = vld [vmem:[%s13173_s0 + $0x58] sm:$0xff] }
0x1188   :  { %v2897_v35 = vpop.xlane.xlu1 %2896 }
0x1189   :  { %v2901_v32 = vsub.f32 %v2893_v48, %v2897_v35  ;;  %v10681_v48 = vpack.c.bf16 %v9316_v47, %v9315_v46  ;;  %v10689_v35 = vpack.c.bf16 %v9320_v54, %v9319_v52 }
0x118b   :  { %v2903_v57 = vmul.f32 1.442695, %v2901_v32  ;;  %10682 = vmatprep.subr.bf16.mxu1 %v10681_v48  ;;  %v9321_v32 = vld [vmem:[%s13173_s0 + $0x60] sm:$0xff] }
0x118c   :  { %v2900_v55 = vpop.xlane.xlu1 %2899  ;;  %10684 = vmatpush3.bf16.msra.mxu1 %v10681_v48 }
0x118d   :  { %v2902_v56 = vsub.f32 %v2894_v37, %v2900_v55  ;;  %10702 = vmatprep.subr.bf16.mxu1 %v10701_v50  ;;  %v9318_v37 = vld [vmem:[%s13173_s0 + $0x48] sm:$0xff] }
0x118e   :  { %v10685_v53 = vpack.c.bf16 %v9318_v37, %v9317_v51  ;;  %v9322_v55 = vld [vmem:[%s13173_s0 + $0x68] sm:$0xff] }
0x118f   :  { %v2905_v58 = vmul.f32 1.442695, %v2902_v56  ;;  %v10693_v56 = vpack.c.bf16 %v9322_v55, %v9321_v32 }
0x1191   :  { %11347 = vpow2.f32 %v2905_v58 }
0x1192   :  { %11349 = vpow2.f32 %v2903_v57 }
0x119b   :  { %v11348_v59 = vpop.eup %11347 }
0x119c   :  { %v2910_v60 = vsel %vm513_vm3, %v11348_v59, 0.0  ;;  %v11350_v5 = vpop.eup %11349 }
0x119d   :  { %2911 = vadd.xlane.f32.xlu1 %v2910_v60  ;;  %v2907_v7 = vsel %vm513_vm3, %v11350_v5, 0.0 }
0x11a1   :  { %2908 = vadd.xlane.f32.xlu1 %v2907_v7 }
0x11b2   :  { %11129 = vrot.lane.b32.xlu1 %v12390_v39, %s11927_s21 }
0x11d1   :  { %v10072_v61 = vpop.f32.mrb[18].mxu0 }
0x11d2   :  { %v2708_v62 = vpop.f32.mrb[19].mxu0 }
0x11d3   :  { %10075 = vmatprep.mubr.msk.f32.mxu0 %vm425_vm1, %v2708_v62 }
0x11d4   :  { %10076 = vmatmul.mubr.msk.f32.vlgmr.msra.gmra.mrb[16].mxu0 %vm425_vm1, %v10072_v61  ;;  %v12504_v61 = vld [vmem:[#allocation17 + $0x4] sm:$0xf] }
0x11d5   :  { %v3128_v62 = vrot.slane %v12504_v61, %v12339_v25 }
0x122a   :  { %v2912_v63 = vpop.xlane.xlu1 %2911 }
0x122b   :  { %11351 = vrcp.f32 %v2912_v63 }
0x122e   :  { %v2909_v0 = vpop.xlane.xlu1 %2908 }
0x122f   :  { %11353 = vrcp.f32 %v2909_v0 }
0x1232   :  { %v11130_v1 = vpop.permute.xlu1 %11129 }
0x1233   :  { %v11132_v2 = vunpack.i.h.bf16 %v11130_v1  ;;  %v11131_v3 = vunpack.i.l.bf16 %v11130_v1  ;;  %v3134_v1 = vrot.slane %v12504_v61, %v12344_v27 }
0x1235   :  { %v10673_v4 = vpack.c.bf16 %v11132_v2, %v11131_v3  ;;  %v11352_v8 = vpop.eup %11351 }
0x1236   :  { %v2916_v11 = vmul.f32 %v11352_v8, %v11348_v59  ;;  %v3376_v8 = vld [vmem:[%s13174_s27 + $0x10] sm:$0xff] }
0x1237   :  { %10674 = vmatprep.subr.bf16.mxu0 %v10673_v4 }
0x1238   :  { %10676 = vmatpush3.bf16.msra.mxu0 %v10673_v4 }
0x1239   :  { %v11354_v9 = vpop.eup %11353  ;;  %10092 = vmatprep.subr.mxu0 %v9279_v6 }
0x123a   :  { %v2915_v39 = vmul.f32 %v11354_v9, %v11350_v5  ;;  %v3377_v9 = vld [vmem:[%s13174_s27 + $0x18] sm:$0xff] }
0x123c   :  { %10089 = vmatprep.mubr.msk.f32.mxu0 %vm513_vm3, %v2915_v39 }
0x123d   :  { %10090 = vmatmul.mubr.msk.f32.vlgmr.msra.gmra.mrb[20].mxu0 %vm513_vm3, %v2916_v11 }
0x123e   :  { %10093 = vmatpush3.msra.mxu0 %v9279_v6 }
0x123f   :  { %10686 = vmatprep.subr.bf16.mxu0 %v10685_v53 }
0x1310   :  { %v10091_v14 = vpop.f32.mrb[20].mxu0 }
0x1311   :  { %v2995_v15 = vpop.f32.mrb[21].mxu0 }
0x1312   :  { %10094 = vmatprep.mubr.msk.f32.mxu0 %vm425_vm1, %v2995_v15  ;;  %v12518_v15 = vld [vmem:[#allocation5] sm:$0xff] }
0x1313   :  { %10095 = vmatmul.mubr.msk.f32.vlgmr.msra.gmra.mrb[16].mxu0 %vm425_vm1, %v10091_v14  ;;  %v10705_v14 = vpack.c.bf16 %v3377_v9, %v3376_v8 }
0x1314   :  { %10688 = vmatpush3.bf16.msra.mxu0 %v10685_v53 }
0x1315   :  { %10690 = vmatprep.subr.bf16.mxu0 %v10689_v35 }
0x1318   :  { %10692 = vmatpush3.bf16.msra.mxu0 %v10689_v35  ;;  %v12575_v35 = vld [vmem:[#allocation16 + $0x1] ss:$0 sm:$0xff] }
0x1319   :  { %10694 = vmatprep.subr.bf16.mxu0 %v10693_v56 }
0x131c   :  { %10696 = vmatpush3.bf16.msra.mxu0 %v10693_v56 }
0x13e6   :  { %v10096_v18 = vpop.f32.mrb[16].mxu0 }
0x13e7   :  { %v3094_v10 = vadd.f32 %v10096_v18, %v9312_v16  ;;  %v3076_v20 = vpop.f32.mrb[17].mxu0  ;;  %v9323_v18 = vld [vmem:[%s13173_s0 + $0x70] sm:$0xff] }
0x13e8   :  { %v3093_v21 = vadd.f32 %v9312_v16, %v3076_v20  ;;  %v12524_v16 = vld [vmem:[#allocation5 + $0x8] sm:$0xff] }
0x13e9   :  { %v3098_v22 = vadd.f32 %v3094_v10, %v12378_v33  ;;  %v9324_v10 = vld [vmem:[%s13173_s0 + $0x78] sm:$0xff] }
0x13ea   :  { %v3097_v24 = vadd.f32 %v3093_v21, %v12374_v30  ;;  %v10697_v20 = vpack.c.bf16 %v9324_v10, %v9323_v18  ;;  %v9325_v21 = vld [vmem:[#allocation14 + $0x1] ss:$0 sm:$0xff] }
0x13eb   :  { %v3102_v28 = vsel %vm332_vm0, %v3098_v22, 0.0 }
0x13ec   :  { %3103 = vadd.xlane.f32.xlu1 %v3102_v28  ;;  %v3099_v29 = vsel %vm332_vm0, %v3097_v24, 0.0  ;;  %10698 = vmatprep.subr.bf16.mxu0 %v10697_v20 }
0x13ed   :  { %3100 = vadd.xlane.f32.xlu0 %v3099_v29  ;;  %10700 = vmatpush3.bf16.msra.mxu0 %v10697_v20 }
0x1479   :  { %v3104_v13 = vpop.xlane.xlu1 %3103 }
0x147a   :  { %v3106_v31 = vmul.f32 0.03125, %v3104_v13  ;;  %v3101_v34 = vpop.xlane.xlu0 %3100 }
0x147b   :  { %v3105_v36 = vmul.f32 0.03125, %v3101_v34  ;;  %v9331_v34 = vld [vmem:[%s13175_s16] ss:$0 sm:$0xff] }
0x147c   :  { %v3108_v38 = vsub.f32 %v3098_v22, %v3106_v31 }
0x147d   :  { %v3107_v40 = vsub.f32 %v3097_v24, %v3105_v36 }
0x147e   :  { %v3110_v33 = vmul.f32 %v3108_v38, %v3108_v38 }
0x147f   :  { %v3109_v41 = vmul.f32 %v3107_v40, %v3107_v40 }
0x1480   :  { %v3114_v42 = vsel %vm332_vm0, %v3110_v33, 0.0 }
0x1481   :  { %v3111_v30 = vsel %vm332_vm0, %v3109_v41, 0.0 }
0x1482   :  { %3112 = vadd.xlane.f32.xlu0 %v3111_v30 }
0x1486   :  { %3115 = vadd.xlane.f32.xlu0 %v3114_v42 }
0x150f   :  { %v3113_v57 = vpop.xlane.xlu0 %3112 }
0x1510   :  { %v3117_v58 = vmul.f32 0.03125, %v3113_v57 }
0x1512   :  { %v3119_v59 = vadd.f32 1e-05, %v3117_v58  ;;  %v12582_v58 = vld [vmem:[#allocation8 + $0x8] sm:$0xff] }
0x1513   :  { %v3116_v60 = vpop.xlane.xlu0 %3115 }
0x1514   :  { %11355 = vrsqrt.f32 %v3119_v59  ;;  %v3118_v5 = vmul.f32 0.03125, %v3116_v60 }
0x1516   :  { %v3120_v7 = vadd.f32 1e-05, %v3118_v5  ;;  %v12584_v5 = vld [vmem:[#allocation8] sm:$0xff] }
0x1518   :  { %11357 = vrsqrt.f32 %v3120_v7 }
0x151e   :  { %v11356_v63 = vpop.eup %11355 }
0x151f   :  { %v3123_v0 = vmul.f32 %v11356_v63, %v3107_v40 }
0x1521   :  { %v3129_v2 = vmul.f32 %v3128_v62, %v3123_v0 }
0x1522   :  { %v11358_v3 = vpop.eup %11357 }
0x1523   :  { %v3124_v4 = vmul.f32 %v11358_v3, %v3108_v38  ;;  %v12510_v6 = vadd.f32 %v3134_v1, %v3129_v2 }
0x1525   :  { %v3130_v39 = vmul.f32 %v3128_v62, %v3124_v4  ;;  %10105 = vmatprep.mubr.msk.f32.mxu1 %vm332_vm0, %v12510_v6 }
0x1527   :  { %v12516_v11 = vadd.f32 %v3134_v1, %v3130_v39 }
0x1529   :  { %10106 = vmatmul.mubr.msk.f32.vlgmr.msra.gmra.mrb[22].mxu1 %vm332_vm0, %v12516_v11 }
0x152a   :  { %10704 = vmatpush3.bf16.msra.mxu1 %v10701_v50  ;;  %10135 = vmatprep.mubr.msk.f32.mxu1 %vm332_vm0, %v12518_v15 }
0x152b   :  { %10706 = vmatprep.subr.bf16.mxu1 %v10705_v14 }
0x152e   :  { %10708 = vmatpush3.bf16.msra.mxu1 %v10705_v14 }
0x1531   :  { %10136 = vmatmul.mubr.msk.f32.vlgmr.msra.gmra.mrb[24].mxu1 %vm332_vm0, %v12524_v16 }
0x15fc   :  { %v10107_v22 = vpop.f32.mrb[22].mxu1 }
0x15fd   :  { %v3239_v24 = vadd.f32 %v10107_v22, %v9325_v21  ;;  %v3233_v28 = vpop.f32.mrb[23].mxu1 }
0x15fe   :  { %v3234_v29 = vadd.f32 %v9325_v21, %v3233_v28 }
0x15ff   :  { %v3243_v31 = vmax.f32 %v3239_v24, 0.0 }
0x1600   :  { %v3242_v13 = vmax.f32 %v3234_v29, 0.0 }
0x1602   :  { %10124 = vmatprep.mubr.msk.f32.mxu0 %vm1722_vm4, %v3242_v13 }
0x1603   :  { %10125 = vmatmul.mubr.msk.f32.vlgmr.msra.gmra.mrb[22].mxu0 %vm1722_vm4, %v3243_v31 }
0x1604   :  { %v10137_v36 = vpop.f32.mrb[24].mxu1 }
0x1605   :  { %v12533_v38 = vadd.f32 %v10137_v36, %v9331_v34  ;;  %v3457_v40 = vpop.f32.mrb[25].mxu1 }
0x1606   :  { %v12535_v41 = vadd.f32 %v9331_v34, %v3457_v40 }
0x1608   :  { %10142 = vmatprep.mubr.msk.f32.mxu1 %vm425_vm1, %v12535_v41  ;;  %v12541_v30 = vpack.i.bf16 %v12533_v38, %v12535_v41 }
0x160a   :  { %11139 = vrot.lane.b32.xlu1 %v12541_v30, %s11920_s19  ;;  %11134 = vrot.lane.b32.xlu0 %v12541_v30, %s11919_s5 }
0x160e   :  { %11144 = vrot.lane.b32.xlu1 %v12541_v30, %s11922_s1  ;;  %3673 = vrot.lane.b32.xlu0 %v12535_v41, %s11918_s14 }
0x1612   :  { %4041 = vrot.lane.b32.xlu1 %v12533_v38, %s11921_s13  ;;  %3675 = vrot.lane.b32.xlu0 %v12533_v38, %s11918_s14 }
0x1616   :  { %4039 = vrot.lane.b32.xlu0 %v12535_v41, %s11921_s13 }
0x167c   :  { %v11140_v33 = vpop.permute.xlu1 %11139  ;;  %v11135_v42 = vpop.permute.xlu0 %11134 }
0x167d   :  { %v11142_v43 = vunpack.i.h.bf16 %v11140_v33  ;;  %v11141_v44 = vunpack.i.l.bf16 %v11140_v33  ;;  %v11137_v45 = vunpack.i.h.bf16 %v11135_v42  ;;  %v11136_v46 = vunpack.i.l.bf16 %v11135_v42 }
0x167f   :  { %v10709_v47 = vpack.c.bf16 %v11137_v45, %v11136_v46  ;;  %v10719_v48 = vpack.c.bf16 %v11142_v43, %v11141_v44 }
0x1680   :  { %v11145_v49 = vpop.permute.xlu1 %11144  ;;  %v3674_v51 = vpop.permute.xlu0 %3673 }
0x1681   :  { %10711 = vmatprep.subr.msk.bf16.mxu1 %vm12226_vm2, %v10709_v47  ;;  %v11147_v26 = vunpack.i.h.bf16 %v11145_v49  ;;  %v11146_v50 = vunpack.i.l.bf16 %v11145_v49 }
0x1682   :  { %10714 = vmatpush3.bf16.xpose.msk.msra.mxu1 %vm12226_vm2, %v10709_v47 }
0x1683   :  { %10721 = vmatprep.subr.msk.bf16.mxu1 %vm12226_vm2, %v10719_v48  ;;  %v10729_v37 = vpack.c.bf16 %v11147_v26, %v11146_v50 }
0x1684   :  { %v3676_v52 = vpop.permute.xlu0 %3675  ;;  %v4042_v54 = vpop.permute.xlu1 %4041 }
0x1688   :  { %v4040_v53 = vpop.permute.xlu0 %4039 }
0x1689   :  { %10143 = vmatmul.mubr.msk.f32.vlgmr.msra.gmra.mrb[26].mxu1 %vm425_vm1, %v12533_v38 }
0x168a   :  { %10724 = vmatpush3.bf16.xpose.msk.msra.mxu1 %vm12226_vm2, %v10719_v48  ;;  %10156 = vmatprep.mubr.msk.f32.mxu1 %vm425_vm1, %v3674_v51 }
0x168b   :  { %10731 = vmatprep.subr.msk.bf16.mxu1 %vm12226_vm2, %v10729_v37 }
0x1691   :  { %10157 = vmatmul.mubr.msk.f32.vlgmr.msra.gmra.mrb[28].mxu1 %vm425_vm1, %v3676_v52 }
0x1692   :  { %10734 = vmatpush3.bf16.xpose.msk.msra.mxu1 %vm12226_vm2, %v10729_v37  ;;  %10180 = vmatprep.mubr.msk.f32.mxu1 %vm425_vm1, %v4040_v53 }
0x1699   :  { %10181 = vmatmul.mubr.msk.f32.vlgmr.msra.gmra.mrb[30].mxu1 %vm425_vm1, %v4042_v54 }
0x16d6   :  { %v10126_v32 = vpop.f32.mrb[22].mxu0 }
0x16d7   :  { %v12578_v55 = vadd.f32 %v10126_v32, %v12575_v35  ;;  %v12580_v56 = vpop.f32.mrb[23].mxu0 }
0x175c   :  { %v10144_v57 = vpop.f32.mrb[26].mxu1 }
0x175d   :  { %v3561_v59 = vmul.f32 0.35355338, %v10144_v57  ;;  %v3551_v60 = vpop.f32.mrb[27].mxu1 }
0x175e   :  { %v3560_v7 = vmul.f32 0.35355338, %v3551_v60 }
0x175f   :  { %v3563_v62 = vadd.f32 %v3561_v59, %v12582_v58 }
0x1760   :  { %v3562_v63 = vadd.f32 %v3560_v7, %v12584_v5 }
0x1761   :  { %v3567_v0 = vsel %vm513_vm3, %v3563_v62, -inf }
0x1762   :  { %3568 = vmax.xlane.f32.xlu1 %v3567_v0  ;;  %v3564_v1 = vsel %vm513_vm3, %v3562_v63, -inf }
0x1763   :  { %3565 = vmax.xlane.f32.xlu0 %v3564_v1 }
0x1764   :  { %v10158_v2 = vpop.f32.mrb[28].mxu1 }
0x1765   :  { %v3755_v3 = vpop.f32.mrb[29].mxu1  ;;  %v3765_v4 = vmul.f32 0.35355338, %v10158_v2 }
0x1766   :  { %v3764_v8 = vmul.f32 0.35355338, %v3755_v3 }
0x1767   :  { %v3767_v14 = vadd.f32 %v3765_v4, %v12582_v58 }
0x1768   :  { %v3766_v9 = vadd.f32 %v3764_v8, %v12584_v5 }
0x1769   :  { %v3771_v20 = vsel %vm513_vm3, %v3767_v14, -inf }
0x176a   :  { %v3768_v39 = vsel %vm513_vm3, %v3766_v9, -inf }
0x176b   :  { %3769 = vmax.xlane.f32.xlu0 %v3768_v39 }
0x176c   :  { %v10182_v18 = vpop.f32.mrb[30].mxu1 }
0x176d   :  { %v4121_v10 = vpop.f32.mrb[31].mxu1  ;;  %v4131_v50 = vmul.f32 0.35355338, %v10182_v18 }
0x176e   :  { %v4130_v51 = vmul.f32 0.35355338, %v4121_v10 }
0x176f   :  { %3772 = vmax.xlane.f32.xlu0 %v3771_v20  ;;  %v4133_v37 = vadd.f32 %v4131_v50, %v12582_v58 }
0x1770   :  { %v4132_v52 = vadd.f32 %v4130_v51, %v12584_v5 }
0x1771   :  { %v4137_v54 = vsel %vm513_vm3, %v4133_v37, -inf }
0x1772   :  { %v4134_v53 = vsel %vm513_vm3, %v4132_v52, -inf }
0x17ef   :  { %v3569_v21 = vpop.xlane.xlu1 %3568 }
0x17f0   :  { %v3571_v22 = vsub.f32 %v3563_v62, %v3569_v21  ;;  %v3566_v24 = vpop.xlane.xlu0 %3565 }
0x17f1   :  { %v3570_v28 = vsub.f32 %v3562_v63, %v3566_v24 }
0x17f2   :  { %v3574_v29 = vmul.f32 1.442695, %v3571_v22 }
0x17f3   :  { %v3572_v13 = vmul.f32 1.442695, %v3570_v28 }
0x17f4   :  { %11359 = vpow2.f32 %v3574_v29 }
0x17f5   :  { %11361 = vpow2.f32 %v3572_v13 }
0x17f8   :  { %v3770_v31 = vpop.xlane.xlu0 %3769 }
0x17f9   :  { %v3774_v34 = vsub.f32 %v3766_v9, %v3770_v31 }
0x17fb   :  { %v3776_v36 = vmul.f32 1.442695, %v3774_v34 }
0x17fc   :  { %v3773_v40 = vpop.xlane.xlu0 %3772 }
0x17fd   :  { %11363 = vpow2.f32 %v3776_v36  ;;  %v3775_v33 = vsub.f32 %v3767_v14, %v3773_v40 }
0x17fe   :  { %v11360_v42 = vpop.eup %11359 }
0x17ff   :  { %v11362_v43 = vpop.eup %11361  ;;  %v3778_v44 = vmul.f32 1.442695, %v3775_v33  ;;  %v3579_v45 = vsel %vm513_vm3, %v11360_v42, 0.0 }
0x1800   :  { %3580 = vadd.xlane.f32.xlu0 %v3579_v45  ;;  %v3576_v46 = vsel %vm513_vm3, %v11362_v43, 0.0 }
0x1801   :  { %11365 = vpow2.f32 %v3778_v44  ;;  %3577 = vadd.xlane.f32.xlu1 %v3576_v46  ;;  %v3467_v46 = vld [vmem:[%s13176_s23 + $0x8] sm:$0xff] }
0x1807   :  { %v11364_v47 = vpop.eup %11363 }
0x1808   :  { %v3780_v48 = vsel %vm513_vm3, %v11364_v47, 0.0 }
0x1809   :  { %3781 = vadd.xlane.f32.xlu1 %v3780_v48  ;;  %v3323_v48 = vadd.f32 %v12575_v35, %v12580_v56 }
0x180b   :  { %v11366_v49 = vpop.eup %11365 }
0x180c   :  { %v3783_v26 = vsel %vm513_vm3, %v11366_v49, 0.0 }
0x180d   :  { %3784 = vadd.xlane.f32.xlu0 %v3783_v26 }
0x181a   :  { %11149 = vrot.lane.b32.xlu1 %v12541_v30, %s11907_s9 }
0x181e   :  { %11159 = vrot.lane.b32.xlu1 %v12541_v30, %s11924_s10 }
0x1822   :  { %4326 = vrot.lane.b32.xlu1 %v12535_v41, %s11925_s11 }
0x1823   :  { %11154 = vrot.lane.b32.xlu0 %v12541_v30, %s11923_s2 }
0x1827   :  { %4328 = vrot.lane.b32.xlu0 %v12533_v38, %s11925_s11 }
0x1846   :  { %4135 = vmax.xlane.f32.xlu1 %v4134_v53  ;;  %4138 = vmax.xlane.f32.xlu0 %v4137_v54 }
0x188d   :  { %v3581_v41 = vpop.xlane.xlu0 %3580 }
0x188e   :  { %v3578_v32 = vpop.xlane.xlu1 %3577 }
0x188f   :  { %11367 = vrcp.f32 %v3578_v32 }
0x1890   :  { %11369 = vrcp.f32 %v3581_v41 }
0x1896   :  { %v3782_v57 = vpop.xlane.xlu1 %3781 }
0x1897   :  { %11371 = vrcp.f32 %v3782_v57 }
0x1899   :  { %v11368_v59 = vpop.eup %11367 }
0x189a   :  { %v11150_v38 = vpop.permute.xlu1 %11149  ;;  %v3785_v60 = vpop.xlane.xlu0 %3784  ;;  %v3584_v7 = vmul.f32 %v11368_v59, %v11362_v43 }
0x189b   :  { %v11152_v62 = vunpack.i.h.bf16 %v11150_v38  ;;  %v11151_v63 = vunpack.i.l.bf16 %v11150_v38  ;;  %11373 = vrcp.f32 %v3785_v60  ;;  %v11370_v1 = vpop.eup %11369 }
0x189c   :  { %10149 = vmatprep.mubr.msk.f32.mxu0 %vm513_vm3, %v3584_v7  ;;  %v3585_v10 = vmul.f32 %v11370_v1, %v11360_v42 }
0x189d   :  { %v10715_v0 = vpack.c.bf16 %v11152_v62, %v11151_v63 }
0x189e   :  { %v11160_v2 = vpop.permute.xlu1 %11159  ;;  %v11155_v3 = vpop.permute.xlu0 %11154 }
0x189f   :  { %v11162_v4 = vunpack.i.h.bf16 %v11160_v2  ;;  %v11161_v8 = vunpack.i.l.bf16 %v11160_v2  ;;  %v11157_v9 = vunpack.i.h.bf16 %v11155_v3  ;;  %v11156_v39 = vunpack.i.l.bf16 %v11155_v3  ;;  %10716 = vmatprep.subr.bf16.mxu0 %v10715_v0 }
0x18a0   :  { %10718 = vmatpush3.bf16.msra.mxu0 %v10715_v0 }
0x18a1   :  { %v11372_v14 = vpop.eup %11371  ;;  %v10739_v18 = vpack.c.bf16 %v11162_v4, %v11161_v8  ;;  %v10725_v20 = vpack.c.bf16 %v11157_v9, %v11156_v39  ;;  %v3468_v4 = vld [vmem:[%s13176_s23 + $0x10] sm:$0xff] }
0x18a2   :  { %v4327_v21 = vpop.permute.xlu1 %4326  ;;  %v3788_v22 = vmul.f32 %v11372_v14, %v11364_v47  ;;  %v4329_v29 = vpop.permute.xlu0 %4328  ;;  %v3466_v47 = vld [vmem:[%s13176_s23] sm:$0xff] }
0x18a3   :  { %10150 = vmatmul.mubr.msk.f32.vlgmr.msra.gmra.mrb[24].mxu0 %vm513_vm3, %v3585_v10  ;;  %10726 = vmatprep.subr.bf16.mxu0 %v10725_v20 }
0x18a4   :  { %10741 = vmatprep.subr.msk.bf16.mxu1 %vm12226_vm2, %v10739_v18  ;;  %10199 = vmatprep.mubr.msk.f32.mxu1 %vm425_vm1, %v4327_v21 }
0x18a5   :  { %v11374_v24 = vpop.eup %11373  ;;  %10728 = vmatpush3.bf16.msra.mxu0 %v10725_v20  ;;  %10163 = vmatprep.mubr.msk.f32.mxu0 %vm513_vm3, %v3788_v22 }
0x18a6   :  { %10744 = vmatpush3.bf16.xpose.msk.msra.mxu1 %vm12226_vm2, %v10739_v18  ;;  %v3789_v28 = vmul.f32 %v11374_v24, %v11366_v49  ;;  %10166 = vmatprep.subr.mxu0 %v3467_v46  ;;  %v12631_v49 = vadd.f32 %v3323_v48, %v12510_v6  ;;  %v3332_v24 = vadd.f32 %v12578_v55, %v12516_v11 }
0x18a8   :  { %10164 = vmatmul.mubr.msk.f32.vlgmr.msra.gmra.mrb[26].mxu0 %vm513_vm3, %v3789_v28  ;;  %v3333_v26 = vsel %vm332_vm0, %v12631_v49, 0.0 }
0x18a9   :  { %10167 = vmatpush3.msra.mxu0 %v3467_v46 }
0x18aa   :  { %10171 = vmatprep.subr.mxu0 %v3466_v47 }
0x18ad   :  { %10200 = vmatmul.mubr.msk.f32.vlgmr.msra.gmra.mrb[32].mxu1 %vm425_vm1, %v4329_v29  ;;  %v3336_v29 = vsel %vm332_vm0, %v3332_v24, 0.0 }
0x18d3   :  { %v4136_v13 = vpop.xlane.xlu1 %4135  ;;  %v4139_v31 = vpop.xlane.xlu0 %4138 }
0x18d4   :  { %v4140_v34 = vsub.f32 %v4132_v52, %v4136_v13  ;;  %v4141_v36 = vsub.f32 %v4133_v37, %v4139_v31 }
0x18d6   :  { %v4142_v40 = vmul.f32 1.442695, %v4140_v34  ;;  %v4144_v33 = vmul.f32 1.442695, %v4141_v36 }
0x18d8   :  { %11375 = vpow2.f32 %v4142_v40 }
0x18d9   :  { %11377 = vpow2.f32 %v4144_v33  ;;  %v3469_v33 = vld [vmem:[%s13176_s23 + $0x18] sm:$0xff] }
0x18e2   :  { %v11376_v42 = vpop.eup %11375 }
0x18e3   :  { %v11378_v43 = vpop.eup %11377  ;;  %v4146_v44 = vsel %vm513_vm3, %v11376_v42, 0.0 }
0x18e4   :  { %4147 = vadd.xlane.f32.xlu0 %v4146_v44  ;;  %v4149_v45 = vsel %vm513_vm3, %v11378_v43, 0.0 }
0x18e5   :  { %4150 = vadd.xlane.f32.xlu1 %v4149_v45 }
0x18fa   :  { %11164 = vrot.lane.b32.xlu0 %v12541_v30, %s11926_s15 }
0x1919   :  { %3334 = vadd.xlane.f32.xlu0 %v3333_v26 }
0x1971   :  { %v4148_v50 = vpop.xlane.xlu0 %4147 }
0x1972   :  { %v4151_v53 = vpop.xlane.xlu1 %4150  ;;  %11379 = vrcp.f32 %v4148_v50 }
0x1973   :  { %11381 = vrcp.f32 %v4151_v53 }
0x1975   :  { %v11165_v37 = vpop.permute.xlu0 %11164 }
0x1976   :  { %v10151_v51 = vpop.f32.mrb[24].mxu0  ;;  %v11167_v54 = vunpack.i.h.bf16 %v11165_v37  ;;  %v11166_v32 = vunpack.i.l.bf16 %v11165_v37 }
0x1977   :  { %v3664_v52 = vpop.f32.mrb[25].mxu0 }
0x1978   :  { %v10735_v6 = vpack.c.bf16 %v11167_v54, %v11166_v32 }
0x197b   :  { %v10165_v41 = vpop.f32.mrb[26].mxu0 }
0x197c   :  { %v3868_v57 = vpop.f32.mrb[27].mxu0  ;;  %v11380_v60 = vpop.eup %11379 }
0x197d   :  { %10168 = vmatprep.mubr.msk.f32.mxu0 %vm425_vm1, %v3868_v57  ;;  %v11382_v62 = vpop.eup %11381  ;;  %v4154_v0 = vmul.f32 %v11380_v60, %v11376_v42 }
0x197e   :  { %10169 = vmatmul.mubr.msk.f32.vlgmr.msra.gmra.mrb[28].mxu0 %vm425_vm1, %v10165_v41  ;;  %v4155_v2 = vmul.f32 %v11382_v62, %v11378_v43  ;;  %v4756_v62 = vld [vmem:[#allocation20 + $0x18] sm:$0xff] }
0x197f   :  { %10172 = vmatpush3.msra.mxu0 %v3466_v47  ;;  %10173 = vmatprep.mubr.msk.f32.mxu0 %vm425_vm1, %v3664_v52  ;;  %v9366_v47 = vld [vmem:[%s13177_s29] ss:$0 sm:$0xff] }
0x1980   :  { %v10201_v35 = vpop.f32.mrb[32].mxu1  ;;  %10736 = vmatprep.subr.bf16.mxu0 %v10735_v6 }
0x1981   :  { %v4408_v56 = vpop.f32.mrb[33].mxu1  ;;  %v4418_v59 = vmul.f32 0.35355338, %v10201_v35 }
0x1982   :  { %v4417_v38 = vmul.f32 0.35355338, %v4408_v56 }
0x1983   :  { %v4420_v1 = vadd.f32 %v4418_v59, %v12582_v58 }
0x1984   :  { %v4419_v7 = vadd.f32 %v4417_v38, %v12584_v5 }
0x1985   :  { %v4424_v3 = vsel %vm513_vm3, %v4420_v1, -inf }
0x1986   :  { %v4421_v63 = vsel %vm513_vm3, %v4419_v7, -inf  ;;  %10174 = vmatmul.mubr.msk.f32.vlgmr.msra.gmra.mrb[28].mxu0 %vm425_vm1, %v10151_v51 }
0x1987   :  { %4422 = vmax.xlane.f32.xlu1 %v4421_v63  ;;  %10738 = vmatpush3.bf16.msra.mxu0 %v10735_v6 }
0x1988   :  { %10187 = vmatprep.mubr.msk.f32.mxu0 %vm513_vm3, %v4154_v0  ;;  %10190 = vmatprep.subr.mxu0 %v3468_v4 }
0x198a   :  { %10188 = vmatmul.mubr.msk.f32.vlgmr.msra.gmra.mrb[30].mxu0 %vm513_vm3, %v4155_v2 }
0x198b   :  { %4425 = vmax.xlane.f32.xlu1 %v4424_v3  ;;  %10191 = vmatpush3.msra.mxu0 %v3468_v4 }
0x19a6   :  { %v3335_v46 = vpop.xlane.xlu0 %3334 }
0x19a7   :  { %v3339_v50 = vmul.f32 0.03125, %v3335_v46 }
0x19a9   :  { %v3341_v54 = vsub.f32 %v12631_v49, %v3339_v50  ;;  %v4754_v49 = vld [vmem:[#allocation20 + $0x8] sm:$0xff] }
0x19ab   :  { %v3343_v56 = vmul.f32 %v3341_v54, %v3341_v54 }
0x19ad   :  { %v3345_v59 = vsel %vm332_vm0, %v3343_v56, 0.0 }
0x1a14   :  { %v4423_v5 = vpop.xlane.xlu1 %4422 }
0x1a15   :  { %v4427_v8 = vsub.f32 %v4419_v7, %v4423_v5 }
0x1a17   :  { %v4429_v14 = vmul.f32 1.442695, %v4427_v8 }
0x1a18   :  { %v4426_v9 = vpop.xlane.xlu1 %4425 }
0x1a19   :  { %v4428_v39 = vsub.f32 %v4420_v1, %v4426_v9 }
0x1a1b   :  { %v4431_v18 = vmul.f32 1.442695, %v4428_v39 }
0x1a1d   :  { %11383 = vpow2.f32 %v4431_v18 }
0x1a1e   :  { %11385 = vpow2.f32 %v4429_v14 }
0x1a27   :  { %v11384_v58 = vpop.eup %11383 }
0x1a28   :  { %v4436_v10 = vsel %vm513_vm3, %v11384_v58, 0.0  ;;  %v11386_v20 = vpop.eup %11385 }
0x1a29   :  { %4437 = vadd.xlane.f32.xlu1 %v4436_v10  ;;  %v4433_v21 = vsel %vm513_vm3, %v11386_v20, 0.0 }
0x1a2d   :  { %4434 = vadd.xlane.f32.xlu1 %v4433_v21 }
0x1a3e   :  { %11169 = vrot.lane.b32.xlu1 %v12541_v30, %s11927_s21 }
0x1a5d   :  { %v10189_v22 = vpop.f32.mrb[30].mxu0 }
0x1a5e   :  { %v4234_v28 = vpop.f32.mrb[31].mxu0 }
0x1a5f   :  { %10192 = vmatprep.mubr.msk.f32.mxu0 %vm425_vm1, %v4234_v28 }
0x1a60   :  { %10193 = vmatmul.mubr.msk.f32.vlgmr.msra.gmra.mrb[28].mxu0 %vm425_vm1, %v10189_v22 }
0x1a62   :  { %3337 = vadd.xlane.f32.xlu1 %v3336_v29 }
0x1ab6   :  { %v4438_v13 = vpop.xlane.xlu1 %4437 }
0x1ab7   :  { %11387 = vrcp.f32 %v4438_v13  ;;  %v3368_v13 = vrot.slane %v12504_v61, %v12368_v19 }
0x1aba   :  { %v4435_v31 = vpop.xlane.xlu1 %4434 }
0x1abb   :  { %11389 = vrcp.f32 %v4435_v31 }
0x1abe   :  { %v11170_v34 = vpop.permute.xlu1 %11169 }
0x1abf   :  { %v11172_v36 = vunpack.i.h.bf16 %v11170_v34  ;;  %v11171_v30 = vunpack.i.l.bf16 %v11170_v34 }
0x1ac1   :  { %v10745_v40 = vpack.c.bf16 %v11172_v36, %v11171_v30  ;;  %v11388_v11 = vpop.eup %11387 }
0x1ac2   :  { %v4442_v43 = vmul.f32 %v11388_v11, %v11384_v58  ;;  %v4661_v11 = vld [vmem:[#allocation19] sm:$0xff] }
0x1ac3   :  { %10746 = vmatprep.subr.bf16.mxu0 %v10745_v40 }
0x1ac4   :  { %10748 = vmatpush3.bf16.msra.mxu0 %v10745_v40 }
0x1ac5   :  { %v11390_v55 = vpop.eup %11389  ;;  %10209 = vmatprep.subr.mxu0 %v3469_v33 }
0x1ac6   :  { %v4441_v42 = vmul.f32 %v11390_v55, %v11386_v20  ;;  %v4662_v55 = vld [vmem:[#allocation19 + $0x8] sm:$0xff] }
0x1ac8   :  { %10206 = vmatprep.mubr.msk.f32.mxu0 %vm513_vm3, %v4441_v42  ;;  %v10749_v42 = vpack.c.bf16 %v4662_v55, %v4661_v11 }
0x1ac9   :  { %10207 = vmatmul.mubr.msk.f32.vlgmr.msra.gmra.mrb[32].mxu0 %vm513_vm3, %v4442_v43  ;;  %v4664_v43 = vld [vmem:[#allocation19 + $0x18] sm:$0xff] }
0x1aca   :  { %10210 = vmatpush3.msra.mxu0 %v3469_v33  ;;  %10750 = vmatprep.subr.bf16.mxu1 %v10749_v42 }
0x1acb   :  { %10752 = vmatpush3.bf16.msra.mxu1 %v10749_v42 }
0x1aef   :  { %v3338_v52 = vpop.xlane.xlu1 %3337 }
0x1af0   :  { %v3340_v32 = vmul.f32 0.03125, %v3338_v52 }
0x1af2   :  { %v3342_v6 = vsub.f32 %v3332_v24, %v3340_v32  ;;  %v3362_v24 = vrot.slane %v12504_v61, %v12365_v12  ;;  %v4663_v61 = vld [vmem:[#allocation19 + $0x10] sm:$0xff] }
0x1af4   :  { %v3344_v38 = vmul.f32 %v3342_v6, %v3342_v6 }
0x1af6   :  { %v3348_v60 = vsel %vm332_vm0, %v3344_v38, 0.0 }
0x1b9c   :  { %v10208_v44 = vpop.f32.mrb[32].mxu0 }
0x1b9d   :  { %v4521_v45 = vpop.f32.mrb[33].mxu0 }
0x1b9e   :  { %10211 = vmatprep.mubr.msk.f32.mxu0 %vm425_vm1, %v4521_v45 }
0x1b9f   :  { %10212 = vmatmul.mubr.msk.f32.vlgmr.msra.gmra.mrb[28].mxu0 %vm425_vm1, %v10208_v44  ;;  %v10753_v44 = vpack.c.bf16 %v4664_v43, %v4663_v61 }
0x1ba1   :  { %10754 = vmatprep.subr.bf16.mxu1 %v10753_v44 }
0x1ba2   :  { %10756 = vmatpush3.bf16.msra.mxu1 %v10753_v44 }
0x1c72   :  { %v10213_v48 = vpop.f32.mrb[28].mxu0 }
0x1c73   :  { %v4602_v26 = vpop.f32.mrb[29].mxu0  ;;  %v4620_v51 = vadd.f32 %v10213_v48, %v9366_v47 }
0x1c74   :  { %v4619_v37 = vadd.f32 %v9366_v47, %v4602_v26 }
0x1c75   :  { %v4622_v41 = vadd.f32 %v4620_v51, %v12524_v16  ;;  %v4755_v16 = vld [vmem:[#allocation20 + $0x10] sm:$0xff]  ;;  %v12683_v51 = vld [vmem:[%s12077_s25] sm:$0x3f] }
0x1c76   :  { %v4621_v53 = vadd.f32 %v4619_v37, %v12518_v15  ;;  %v4753_v15 = vld [vmem:[#allocation20] sm:$0xff]  ;;  %v10761_v63 = vpack.c.bf16 %v4756_v62, %v4755_v16  ;;  %v4652_v37 = vrot.slane %v12683_v51, %v12339_v25 }
0x1c77   :  { %v4626_v35 = vsel %vm332_vm0, %v4622_v41, 0.0  ;;  %v10757_v7 = vpack.c.bf16 %v4754_v49, %v4753_v15 }
0x1c78   :  { %v4623_v57 = vsel %vm332_vm0, %v4621_v53, 0.0 }
0x1c79   :  { %4624 = vadd.xlane.f32.xlu0 %v4623_v57  ;;  %10758 = vmatprep.subr.bf16.mxu0 %v10757_v7 }
0x1c7a   :  { %10760 = vmatpush3.bf16.msra.mxu0 %v10757_v7 }
0x1c7b   :  { %10762 = vmatprep.subr.bf16.mxu0 %v10761_v63 }
0x1c7d   :  { %4627 = vadd.xlane.f32.xlu0 %v4626_v35 }
0x1c7e   :  { %10764 = vmatpush3.bf16.msra.mxu0 %v10761_v63 }
0x1c81   :  { %3346 = vadd.xlane.f32.xlu0 %v3345_v59  ;;  %v9370_v59 = vld [vmem:[%s13178_s30] ss:$0 sm:$0xff] }
0x1c85   :  { %3349 = vadd.xlane.f32.xlu0 %v3348_v60 }
0x1d06   :  { %v4625_v0 = vpop.xlane.xlu0 %4624 }
0x1d07   :  { %v4629_v1 = vmul.f32 0.03125, %v4625_v0 }
0x1d09   :  { %v4631_v2 = vsub.f32 %v4621_v53, %v4629_v1 }
0x1d0a   :  { %v4628_v3 = vpop.xlane.xlu0 %4627 }
0x1d0b   :  { %v4630_v4 = vmul.f32 0.03125, %v4628_v3  ;;  %v4633_v5 = vmul.f32 %v4631_v2, %v4631_v2  ;;  %v9367_v3 = vld [vmem:[%s13179_s7] ss:$0 sm:$0xff] }
0x1d0d   :  { %v4632_v8 = vsub.f32 %v4622_v41, %v4630_v4  ;;  %v4635_v9 = vsel %vm332_vm0, %v4633_v5, 0.0 }
0x1d0e   :  { %4636 = vadd.xlane.f32.xlu0 %v4635_v9  ;;  %v3347_v39 = vpop.xlane.xlu0 %3346 }
0x1d0f   :  { %v3351_v14 = vmul.f32 0.03125, %v3347_v39  ;;  %v4634_v18 = vmul.f32 %v4632_v8, %v4632_v8 }
0x1d11   :  { %v3353_v58 = vadd.f32 1e-05, %v3351_v14  ;;  %v4638_v10 = vsel %vm332_vm0, %v4634_v18, 0.0 }
0x1d12   :  { %4639 = vadd.xlane.f32.xlu1 %v4638_v10  ;;  %v3350_v20 = vpop.xlane.xlu0 %3349 }
0x1d13   :  { %11391 = vrsqrt.f32 %v3353_v58  ;;  %v3352_v21 = vmul.f32 0.03125, %v3350_v20 }
0x1d15   :  { %v3354_v22 = vadd.f32 1e-05, %v3352_v21 }
0x1d17   :  { %11393 = vrsqrt.f32 %v3354_v22  ;;  %v12737_v22 = vld [vmem:[#allocation10 + $0x8] sm:$0xff] }
0x1d1d   :  { %v11392_v28 = vpop.eup %11391 }
0x1d1e   :  { %v3357_v29 = vmul.f32 %v11392_v28, %v3341_v54  ;;  %v4658_v54 = vrot.slane %v12683_v51, %v12344_v27 }
0x1d20   :  { %v3363_v31 = vmul.f32 %v3362_v24, %v3357_v29  ;;  %v12739_v29 = vld [vmem:[#allocation10] sm:$0xff] }
0x1d21   :  { %v11394_v34 = vpop.eup %11393 }
0x1d22   :  { %v3358_v36 = vmul.f32 %v11394_v34, %v3342_v6  ;;  %v12674_v30 = vadd.f32 %v3368_v13, %v3363_v31 }
0x1d24   :  { %v3364_v40 = vmul.f32 %v3362_v24, %v3358_v36  ;;  %10233 = vmatprep.mubr.msk.f32.mxu0 %vm332_vm0, %v12674_v30 }
0x1d26   :  { %v12678_v33 = vadd.f32 %v3368_v13, %v3364_v40 }
0x1d28   :  { %10234 = vmatmul.mubr.msk.f32.vlgmr.msra.gmra.mrb[34].mxu0 %vm332_vm0, %v12678_v33 }
0x1d9b   :  { %v4637_v45 = vpop.xlane.xlu0 %4636 }
0x1d9c   :  { %v4641_v46 = vmul.f32 0.03125, %v4637_v45 }
0x1d9e   :  { %v4643_v47 = vadd.f32 1e-05, %v4641_v46 }
0x1d9f   :  { %v4640_v48 = vpop.xlane.xlu1 %4639 }
0x1da0   :  { %11395 = vrsqrt.f32 %v4643_v47  ;;  %v4642_v26 = vmul.f32 0.03125, %v4640_v48 }
0x1da2   :  { %v4644_v50 = vadd.f32 1e-05, %v4642_v26 }
0x1da4   :  { %11397 = vrsqrt.f32 %v4644_v50 }
0x1daa   :  { %v11396_v52 = vpop.eup %11395 }
0x1dab   :  { %v4647_v53 = vmul.f32 %v11396_v52, %v4631_v2 }
0x1dad   :  { %v4653_v32 = vmul.f32 %v4652_v37, %v4647_v53 }
0x1dae   :  { %v11398_v41 = vpop.eup %11397 }
0x1daf   :  { %v4648_v57 = vmul.f32 %v11398_v41, %v4632_v8  ;;  %v12689_v6 = vadd.f32 %v4658_v54, %v4653_v32 }
0x1db1   :  { %v4654_v35 = vmul.f32 %v4652_v37, %v4648_v57  ;;  %10222 = vmatprep.mubr.msk.f32.mxu1 %vm332_vm0, %v12689_v6 }
0x1db3   :  { %v12693_v56 = vadd.f32 %v4658_v54, %v4654_v35 }
0x1db5   :  { %10223 = vmatmul.mubr.msk.f32.vlgmr.msra.gmra.mrb[34].mxu1 %vm332_vm0, %v12693_v56 }
0x1dfb   :  { %v10235_v38 = vpop.f32.mrb[34].mxu0 }
0x1dfc   :  { %v4842_v60 = vadd.f32 %v10235_v38, %v9370_v59  ;;  %v4836_v15 = vpop.f32.mrb[35].mxu0 }
0x1dfd   :  { %v4837_v49 = vadd.f32 %v9370_v59, %v4836_v15 }
0x1dff   :  { %v12698_v7 = vpack.i.bf16 %v4842_v60, %v4837_v49  ;;  %v10765_v16 = vpack.c.bf16 %v4842_v60, %v4837_v49 }
0x1e01   :  { %11174 = vrot.lane.b32.xlu0 %v12698_v7, %s11918_s14  ;;  %10767 = vmatprep.subr.msk.bf16.mxu1 %vm12226_vm2, %v10765_v16 }
0x1e02   :  { %10770 = vmatpush3.bf16.xpose.msk.msra.mxu1 %vm12226_vm2, %v10765_v16 }
0x1e05   :  { %11179 = vrot.lane.b32.xlu0 %v12698_v7, %s11921_s13 }
0x1e73   :  { %v11175_v62 = vpop.permute.xlu0 %11174 }
0x1e74   :  { %v11177_v63 = vunpack.i.h.bf16 %v11175_v62  ;;  %v11176_v0 = vunpack.i.l.bf16 %v11175_v62 }
0x1e76   :  { %v10775_v1 = vpack.c.bf16 %v11177_v63, %v11176_v0 }
0x1e77   :  { %v11180_v2 = vpop.permute.xlu0 %11179 }
0x1e78   :  { %10777 = vmatprep.subr.msk.bf16.mxu1 %vm12226_vm2, %v10775_v1  ;;  %v11182_v5 = vunpack.i.h.bf16 %v11180_v2  ;;  %v11181_v8 = vunpack.i.l.bf16 %v11180_v2 }
0x1e7a   :  { %v10785_v18 = vpack.c.bf16 %v11182_v5, %v11181_v8 }
0x1e88   :  { %v10224_v4 = vpop.f32.mrb[34].mxu1 }
0x1e89   :  { %v12711_v9 = vadd.f32 %v10224_v4, %v9367_v3  ;;  %v4744_v39 = vpop.f32.mrb[35].mxu1 }
0x1e8a   :  { %v12713_v14 = vadd.f32 %v9367_v3, %v4744_v39 }
0x1e8b   :  { %5418 = vrot.lane.b32.xlu0 %v12711_v9, %s11921_s13 }
0x1e8c   :  { %5050 = vrot.lane.b32.xlu1 %v12713_v14, %s11918_s14  ;;  %10240 = vmatprep.mubr.msk.f32.mxu1 %vm425_vm1, %v12713_v14 }
0x1e8d   :  { %10241 = vmatmul.mubr.msk.f32.vlgmr.msra.gmra.mrb[36].mxu1 %vm425_vm1, %v12711_v9 }
0x1e8e   :  { %10780 = vmatpush3.bf16.xpose.msk.msra.mxu1 %vm12226_vm2, %v10775_v1 }
0x1e8f   :  { %10787 = vmatprep.subr.msk.bf16.mxu1 %vm12226_vm2, %v10785_v18 }
0x1e90   :  { %5052 = vrot.lane.b32.xlu1 %v12711_v9, %s11918_s14 }
0x1e94   :  { %5416 = vrot.lane.b32.xlu1 %v12713_v14, %s11921_s13 }
0x1efd   :  { %v5419_v21 = vpop.permute.xlu0 %5418 }
0x1efe   :  { %v5051_v58 = vpop.permute.xlu1 %5050 }
0x1eff   :  { %10254 = vmatprep.mubr.msk.f32.mxu1 %vm425_vm1, %v5051_v58 }
0x1f02   :  { %v5053_v10 = vpop.permute.xlu1 %5052 }
0x1f03   :  { %10255 = vmatmul.mubr.msk.f32.vlgmr.msra.gmra.mrb[38].mxu1 %vm425_vm1, %v5053_v10 }
0x1f04   :  { %10790 = vmatpush3.bf16.xpose.msk.msra.mxu1 %vm12226_vm2, %v10785_v18 }
0x1f06   :  { %v5417_v20 = vpop.permute.xlu1 %5416 }
0x1f07   :  { %10278 = vmatprep.mubr.msk.f32.mxu1 %vm425_vm1, %v5417_v20 }
0x1f0b   :  { %10279 = vmatmul.mubr.msk.f32.vlgmr.msra.gmra.mrb[40].mxu1 %vm425_vm1, %v5419_v21 }
0x1f60   :  { %v10242_v24 = vpop.f32.mrb[36].mxu1 }
0x1f61   :  { %v4938_v28 = vmul.f32 0.35355338, %v10242_v24  ;;  %v4928_v13 = vpop.f32.mrb[37].mxu1 }
0x1f62   :  { %v4937_v31 = vmul.f32 0.35355338, %v4928_v13 }
0x1f63   :  { %v4940_v34 = vadd.f32 %v4938_v28, %v12737_v22 }
0x1f64   :  { %v4939_v36 = vadd.f32 %v4937_v31, %v12739_v29 }
0x1f65   :  { %v4944_v40 = vsel %vm513_vm3, %v4940_v34, -inf }
0x1f66   :  { %4945 = vmax.xlane.f32.xlu0 %v4944_v40  ;;  %v4941_v11 = vsel %vm513_vm3, %v4939_v36, -inf }
0x1f67   :  { %4942 = vmax.xlane.f32.xlu1 %v4941_v11 }
0x1fd6   :  { %v10256_v55 = vpop.f32.mrb[38].mxu1 }
0x1fd7   :  { %v5142_v42 = vmul.f32 0.35355338, %v10256_v55  ;;  %v5132_v61 = vpop.f32.mrb[39].mxu1 }
0x1fd8   :  { %v5141_v43 = vmul.f32 0.35355338, %v5132_v61 }
0x1fd9   :  { %v5144_v44 = vadd.f32 %v5142_v42, %v12737_v22 }
0x1fda   :  { %v5143_v45 = vadd.f32 %v5141_v43, %v12739_v29 }
0x1fdb   :  { %v5148_v46 = vsel %vm513_vm3, %v5144_v44, -inf }
0x1fdc   :  { %5149 = vmax.xlane.f32.xlu1 %v5148_v46  ;;  %v5145_v47 = vsel %vm513_vm3, %v5143_v45, -inf }
0x1fdd   :  { %5146 = vmax.xlane.f32.xlu0 %v5145_v47 }
0x1fde   :  { %v10280_v48 = vpop.f32.mrb[40].mxu1 }
0x1fdf   :  { %v5498_v26 = vpop.f32.mrb[41].mxu1  ;;  %v5508_v39 = vmul.f32 0.35355338, %v10280_v48 }
0x1fe0   :  { %v5507_v8 = vmul.f32 0.35355338, %v5498_v26 }
0x1fe1   :  { %v5510_v58 = vadd.f32 %v5508_v39, %v12737_v22 }
0x1fe2   :  { %v5509_v18 = vadd.f32 %v5507_v8, %v12739_v29 }
0x1fe3   :  { %v5514_v20 = vsel %vm513_vm3, %v5510_v58, -inf }
0x1fe4   :  { %v5511_v10 = vsel %vm513_vm3, %v5509_v18, -inf }
0x1ff3   :  { %v4946_v50 = vpop.xlane.xlu0 %4945 }
0x1ff4   :  { %v4948_v37 = vsub.f32 %v4940_v34, %v4946_v50  ;;  %v4943_v52 = vpop.xlane.xlu1 %4942 }
0x1ff5   :  { %v4947_v53 = vsub.f32 %v4939_v36, %v4943_v52 }
0x1ff6   :  { %v4951_v54 = vmul.f32 1.442695, %v4948_v37 }
0x1ff7   :  { %v4949_v32 = vmul.f32 1.442695, %v4947_v53 }
0x1ff8   :  { %11399 = vpow2.f32 %v4951_v54 }
0x1ff9   :  { %11401 = vpow2.f32 %v4949_v32 }
0x2002   :  { %v12749_v41 = vpop.eup %11399 }
0x2003   :  { %v11402_v57 = vpop.eup %11401  ;;  %v4956_v35 = vsel %vm513_vm3, %v12749_v41, 0.0 }
0x2004   :  { %4957 = vadd.xlane.f32.xlu1 %v4956_v35  ;;  %v4953_v59 = vsel %vm513_vm3, %v11402_v57, 0.0 }
0x2005   :  { %4954 = vadd.xlane.f32.xlu0 %v4953_v59 }
0x2069   :  { %v5150_v38 = vpop.xlane.xlu1 %5149 }
0x206a   :  { %v5152_v60 = vsub.f32 %v5144_v44, %v5150_v38  ;;  %v5147_v15 = vpop.xlane.xlu0 %5146 }
0x206b   :  { %v5151_v49 = vsub.f32 %v5143_v45, %v5147_v15  ;;  %v4845_v15 = vld [vmem:[#allocation22] sm:$0xff] }
0x206c   :  { %v5155_v16 = vmul.f32 1.442695, %v5152_v60  ;;  %v4846_v60 = vld [vmem:[#allocation22 + $0x8] sm:$0xff] }
0x206d   :  { %v5153_v62 = vmul.f32 1.442695, %v5151_v49 }
0x206e   :  { %11403 = vpow2.f32 %v5155_v16 }
0x206f   :  { %11405 = vpow2.f32 %v5153_v62 }
0x2078   :  { %v11404_v63 = vpop.eup %11403 }
0x2079   :  { %v11406_v0 = vpop.eup %11405  ;;  %v5160_v1 = vsel %vm513_vm3, %v11404_v63, 0.0 }
0x207a   :  { %5161 = vadd.xlane.f32.xlu1 %v5160_v1  ;;  %v5157_v2 = vsel %vm513_vm3, %v11406_v0, 0.0 }
0x207b   :  { %5158 = vadd.xlane.f32.xlu0 %v5157_v2 }
0x208b   :  { %11189 = vrot.lane.b32.xlu1 %v12698_v7, %s11920_s19 }
0x208f   :  { %11194 = vrot.lane.b32.xlu1 %v12698_v7, %s11925_s11 }
0x2091   :  { %11184 = vrot.lane.b32.xlu0 %v12698_v7, %s11919_s5 }
0x2092   :  { %v4955_v3 = vpop.xlane.xlu0 %4954 }
0x2093   :  { %11407 = vrcp.f32 %v4955_v3  ;;  %5705 = vrot.lane.b32.xlu1 %v12711_v9, %s11925_s11  ;;  %v4958_v9 = vpop.xlane.xlu1 %4957 }
0x2094   :  { %11409 = vrcp.f32 %v4958_v9 }
0x2095   :  { %5703 = vrot.lane.b32.xlu0 %v12713_v14, %s11925_s11 }
0x209d   :  { %v11408_v4 = vpop.eup %11407 }
0x209e   :  { %v4961_v5 = vmul.f32 %v11408_v4, %v11402_v57  ;;  %v11410_v55 = vpop.eup %11409 }
0x209f   :  { %v4962_v46 = vmul.f32 %v11410_v55, %v12749_v41 }
0x20a0   :  { %10247 = vmatprep.mubr.msk.f32.mxu0 %vm513_vm3, %v4961_v5 }
0x20b4   :  { %5512 = vmax.xlane.f32.xlu0 %v5511_v10 }
0x20b7   :  { %5515 = vmax.xlane.f32.xlu1 %v5514_v20 }
0x20c8   :  { %11199 = vrot.lane.b32.xlu1 %v12698_v7, %s11922_s1 }
0x20cc   :  { %11204 = vrot.lane.b32.xlu1 %v12698_v7, %s11924_s10 }
0x2107   :  { %v5162_v14 = vpop.xlane.xlu1 %5161 }
0x2108   :  { %v5159_v21 = vpop.xlane.xlu0 %5158 }
0x2109   :  { %11411 = vrcp.f32 %v5159_v21 }
0x210a   :  { %11413 = vrcp.f32 %v5162_v14 }
0x210b   :  { %v11190_v24 = vpop.permute.xlu1 %11189 }
0x210c   :  { %v11185_v28 = vpop.permute.xlu0 %11184  ;;  %v11192_v13 = vunpack.i.h.bf16 %v11190_v24  ;;  %v11191_v31 = vunpack.i.l.bf16 %v11190_v24 }
0x210d   :  { %v11187_v34 = vunpack.i.h.bf16 %v11185_v28  ;;  %v11186_v36 = vunpack.i.l.bf16 %v11185_v28 }
0x210e   :  { %v10781_v44 = vpack.c.bf16 %v11192_v13, %v11191_v31  ;;  %v4847_v13 = vld [vmem:[#allocation22 + $0x10] sm:$0xff] }
0x210f   :  { %v11195_v40 = vpop.permute.xlu1 %11194  ;;  %v10771_v11 = vpack.c.bf16 %v11187_v34, %v11186_v36 }
0x2110   :  { %v11197_v42 = vunpack.i.h.bf16 %v11195_v40  ;;  %v11196_v61 = vunpack.i.l.bf16 %v11195_v40  ;;  %v5704_v43 = vpop.permute.xlu0 %5703 }
0x2111   :  { %10772 = vmatprep.subr.bf16.mxu0 %v10771_v11  ;;  %10297 = vmatprep.mubr.msk.f32.mxu1 %vm425_vm1, %v5704_v43 }
0x2112   :  { %v10795_v7 = vpack.c.bf16 %v11197_v42, %v11196_v61  ;;  %10774 = vmatpush3.bf16.msra.mxu0 %v10771_v11 }
0x2113   :  { %v11412_v45 = vpop.eup %11411  ;;  %10782 = vmatprep.subr.bf16.mxu0 %v10781_v44  ;;  %v5706_v50 = vpop.permute.xlu1 %5705 }
0x2114   :  { %v11414_v47 = vpop.eup %11413  ;;  %10797 = vmatprep.subr.msk.bf16.mxu1 %vm12226_vm2, %v10795_v7  ;;  %v5165_v48 = vmul.f32 %v11412_v45, %v11406_v0 }
0x2115   :  { %10248 = vmatmul.mubr.msk.f32.vlgmr.msra.gmra.mrb[36].mxu0 %vm513_vm3, %v4962_v46  ;;  %10800 = vmatpush3.bf16.xpose.msk.msra.mxu1 %vm12226_vm2, %v10795_v7  ;;  %v5166_v26 = vmul.f32 %v11414_v47, %v11404_v63 }
0x2116   :  { %10784 = vmatpush3.bf16.msra.mxu0 %v10781_v44  ;;  %10261 = vmatprep.mubr.msk.f32.mxu0 %vm513_vm3, %v5165_v48 }
0x2117   :  { %10264 = vmatprep.subr.mxu0 %v4846_v60 }
0x2119   :  { %10262 = vmatmul.mubr.msk.f32.vlgmr.msra.gmra.mrb[38].mxu0 %vm513_vm3, %v5166_v26  ;;  %v4848_v26 = vld [vmem:[#allocation22 + $0x18] sm:$0xff] }
0x211a   :  { %10265 = vmatpush3.msra.mxu0 %v4846_v60 }
0x211b   :  { %10269 = vmatprep.subr.mxu0 %v4845_v15 }
0x211c   :  { %10298 = vmatmul.mubr.msk.f32.vlgmr.msra.gmra.mrb[42].mxu1 %vm425_vm1, %v5706_v50 }
0x2141   :  { %v5513_v37 = vpop.xlane.xlu0 %5512 }
0x2142   :  { %v5517_v52 = vsub.f32 %v5509_v18, %v5513_v37 }
0x2144   :  { %v5519_v53 = vmul.f32 1.442695, %v5517_v52  ;;  %v5516_v54 = vpop.xlane.xlu1 %5515 }
0x2145   :  { %v5518_v32 = vsub.f32 %v5510_v58, %v5516_v54 }
0x2146   :  { %11415 = vpow2.f32 %v5519_v53 }
0x2147   :  { %v5521_v41 = vmul.f32 1.442695, %v5518_v32 }
0x2148   :  { %v11200_v16 = vpop.permute.xlu1 %11199 }
0x2149   :  { %11417 = vpow2.f32 %v5521_v41  ;;  %v11202_v1 = vunpack.i.h.bf16 %v11200_v16  ;;  %v11201_v2 = vunpack.i.l.bf16 %v11200_v16 }
0x214b   :  { %v10791_v5 = vpack.c.bf16 %v11202_v1, %v11201_v2 }
0x214c   :  { %v11205_v9 = vpop.permute.xlu1 %11204 }
0x214d   :  { %v11207_v31 = vunpack.i.h.bf16 %v11205_v9  ;;  %v11206_v34 = vunpack.i.l.bf16 %v11205_v9  ;;  %v6041_v9 = vld [vmem:[#allocation23 + $0x18] sm:$0xff] }
0x2150   :  { %v11416_v57 = vpop.eup %11415 }
0x2151   :  { %v5523_v35 = vsel %vm513_vm3, %v11416_v57, 0.0 }
0x2152   :  { %5524 = vadd.xlane.f32.xlu0 %v5523_v35  ;;  %v9405_v35 = vld [vmem:[%s13180_s12] ss:$0 sm:$0xff] }
0x2153   :  { %v11418_v59 = vpop.eup %11417 }
0x2154   :  { %v5526_v38 = vsel %vm513_vm3, %v11418_v59, 0.0 }
0x2156   :  { %5527 = vadd.xlane.f32.xlu0 %v5526_v38 }
0x21df   :  { %v5525_v49 = vpop.xlane.xlu0 %5524 }
0x21e0   :  { %11419 = vrcp.f32 %v5525_v49 }
0x21e3   :  { %v5528_v63 = vpop.xlane.xlu0 %5527 }
0x21e4   :  { %11421 = vrcp.f32 %v5528_v63 }
0x21e8   :  { %v10249_v62 = vpop.f32.mrb[36].mxu0 }
0x21e9   :  { %v5041_v0 = vpop.f32.mrb[37].mxu0 }
0x21ea   :  { %v11420_v10 = vpop.eup %11419 }
0x21eb   :  { %v5531_v28 = vmul.f32 %v11420_v10, %v11416_v57 }
0x21ec   :  { %v10263_v3 = vpop.f32.mrb[38].mxu0 }
0x21ed   :  { %v5245_v4 = vpop.f32.mrb[39].mxu0 }
0x21ee   :  { %10266 = vmatprep.mubr.msk.f32.mxu0 %vm425_vm1, %v5245_v4  ;;  %v11422_v24 = vpop.eup %11421 }
0x21ef   :  { %10267 = vmatmul.mubr.msk.f32.vlgmr.msra.gmra.mrb[40].mxu0 %vm425_vm1, %v10263_v3  ;;  %v10299_v8 = vpop.f32.mrb[42].mxu1  ;;  %v5532_v36 = vmul.f32 %v11422_v24, %v11418_v59  ;;  %v6044_v24 = vld [vmem:[%s12067_s3 + $0x8] sm:$0xff] }
0x21f0   :  { %10270 = vmatpush3.msra.mxu0 %v4845_v15  ;;  %10271 = vmatprep.mubr.msk.f32.mxu0 %vm425_vm1, %v5041_v0  ;;  %v5785_v39 = vpop.f32.mrb[43].mxu1  ;;  %v5795_v18 = vmul.f32 0.35355338, %v10299_v8 }
0x21f1   :  { %10792 = vmatprep.subr.bf16.mxu0 %v10791_v5  ;;  %v5794_v58 = vmul.f32 0.35355338, %v5785_v39 }
0x21f2   :  { %v5797_v14 = vadd.f32 %v5795_v18, %v12737_v22  ;;  %v6038_v18 = vld [vmem:[#allocation23] sm:$0xff] }
0x21f3   :  { %v5796_v20 = vadd.f32 %v5794_v58, %v12739_v29  ;;  %v10801_v29 = vpack.c.bf16 %v11207_v31, %v11206_v34  ;;  %v6039_v58 = vld [vmem:[#allocation23 + $0x8] sm:$0xff]  ;;  %v6046_v31 = vld [vmem:[%s12067_s3 + $0x18] sm:$0xff] }
0x21f4   :  { %v5801_v40 = vsel %vm513_vm3, %v5797_v14, -inf  ;;  %v10805_v10 = vpack.c.bf16 %v6039_v58, %v6038_v18 }
0x21f5   :  { %v5798_v21 = vsel %vm513_vm3, %v5796_v20, -inf }
0x21f6   :  { %5799 = vmax.xlane.f32.xlu0 %v5798_v21  ;;  %10806 = vmatprep.subr.bf16.mxu1 %v10805_v10  ;;  %v6043_v21 = vld [vmem:[%s12067_s3] sm:$0xff] }
0x21f7   :  { %10272 = vmatmul.mubr.msk.f32.vlgmr.msra.gmra.mrb[40].mxu0 %vm425_vm1, %v10249_v62  ;;  %10808 = vmatpush3.bf16.msra.mxu1 %v10805_v10 }
0x21f8   :  { %10794 = vmatpush3.bf16.msra.mxu0 %v10791_v5  ;;  %10285 = vmatprep.mubr.msk.f32.mxu0 %vm513_vm3, %v5531_v28  ;;  %v6045_v28 = vld [vmem:[%s12067_s3 + $0x10] sm:$0xff] }
0x21f9   :  { %10288 = vmatprep.subr.mxu0 %v4847_v13  ;;  %v10817_v34 = vpack.c.bf16 %v6046_v31, %v6045_v28  ;;  %v9415_v28 = vld [vmem:[%s13174_s27 + $0x30] sm:$0xff] }
0x21fa   :  { %5802 = vmax.xlane.f32.xlu0 %v5801_v40  ;;  %v6048_v40 = vld [vmem:[%s12067_s3 + $0x28] sm:$0xff] }
0x21fb   :  { %10286 = vmatmul.mubr.msk.f32.vlgmr.msra.gmra.mrb[42].mxu0 %vm513_vm3, %v5532_v36  ;;  %v6047_v36 = vld [vmem:[%s12067_s3 + $0x20] sm:$0xff] }
0x21fc   :  { %10289 = vmatpush3.msra.mxu0 %v4847_v13  ;;  %v10813_v13 = vpack.c.bf16 %v6044_v24, %v6043_v21  ;;  %v9414_v21 = vld [vmem:[%s13174_s27 + $0x28] sm:$0xff] }
0x21fd   :  { %10802 = vmatprep.subr.bf16.mxu0 %v10801_v29 }
0x2283   :  { %v5800_v22 = vpop.xlane.xlu0 %5799 }
0x2284   :  { %v5804_v11 = vsub.f32 %v5796_v20, %v5800_v22  ;;  %v6040_v20 = vld [vmem:[#allocation23 + $0x10] sm:$0xff] }
0x2286   :  { %v5806_v55 = vmul.f32 1.442695, %v5804_v11 }
0x2287   :  { %v5803_v42 = vpop.xlane.xlu0 %5802 }
0x2288   :  { %11423 = vpow2.f32 %v5806_v55  ;;  %v5805_v61 = vsub.f32 %v5797_v14, %v5803_v42  ;;  %v10809_v14 = vpack.c.bf16 %v6041_v9, %v6040_v20 }
0x228a   :  { %v5808_v43 = vmul.f32 1.442695, %v5805_v61  ;;  %10810 = vmatprep.subr.bf16.mxu1 %v10809_v14 }
0x228b   :  { %10812 = vmatpush3.bf16.msra.mxu1 %v10809_v14  ;;  %v9413_v14 = vld [vmem:[%s13174_s27 + $0x20] sm:$0xff] }
0x228c   :  { %11425 = vpow2.f32 %v5808_v43  ;;  %v10829_v24 = vpack.c.bf16 %v9414_v21, %v9413_v14 }
0x228e   :  { %10830 = vmatprep.subr.bf16.mxu1 %v10829_v24 }
0x2292   :  { %v11424_v44 = vpop.eup %11423 }
0x2293   :  { %v5810_v7 = vsel %vm513_vm3, %v11424_v44, 0.0 }
0x2294   :  { %5811 = vadd.xlane.f32.xlu0 %v5810_v7 }
0x2296   :  { %v11426_v45 = vpop.eup %11425 }
0x2297   :  { %v5813_v46 = vsel %vm513_vm3, %v11426_v45, 0.0 }
0x2298   :  { %5814 = vadd.xlane.f32.xlu0 %v5813_v46  ;;  %v6035_v46 = vrot.slane %v12683_v51, %v12368_v19 }
0x22ce   :  { %v10287_v47 = vpop.f32.mrb[42].mxu0 }
0x22cf   :  { %v5611_v48 = vpop.f32.mrb[43].mxu0 }
0x22d0   :  { %10290 = vmatprep.mubr.msk.f32.mxu0 %vm425_vm1, %v5611_v48 }
0x22d1   :  { %10291 = vmatmul.mubr.msk.f32.vlgmr.msra.gmra.mrb[40].mxu0 %vm425_vm1, %v10287_v47 }
0x22d2   :  { %10804 = vmatpush3.bf16.msra.mxu0 %v10801_v29  ;;  %v10821_v29 = vpack.c.bf16 %v6048_v40, %v6047_v36 }
0x22d3   :  { %10307 = vmatprep.subr.mxu0 %v4848_v26 }
0x2321   :  { %v5812_v50 = vpop.xlane.xlu0 %5811 }
0x2322   :  { %11427 = vrcp.f32 %v5812_v50 }
0x2325   :  { %v5815_v37 = vpop.xlane.xlu0 %5814 }
0x2326   :  { %11429 = vrcp.f32 %v5815_v37 }
0x232c   :  { %v11428_v52 = vpop.eup %11427 }
0x232d   :  { %v5818_v53 = vmul.f32 %v11428_v52, %v11424_v44  ;;  %v6029_v44 = vrot.slane %v12683_v51, %v12365_v12 }
0x232f   :  { %10304 = vmatprep.mubr.msk.f32.mxu0 %vm513_vm3, %v5818_v53  ;;  %v6049_v53 = vld [vmem:[%s12067_s3 + $0x30] sm:$0xff] }
0x2330   :  { %v11430_v54 = vpop.eup %11429 }
0x2331   :  { %v5819_v32 = vmul.f32 %v11430_v54, %v11426_v45  ;;  %v6050_v54 = vld [vmem:[%s12067_s3 + $0x38] sm:$0xff] }
0x2333   :  { %10305 = vmatmul.mubr.msk.f32.vlgmr.msra.gmra.mrb[44].mxu0 %vm513_vm3, %v5819_v32  ;;  %v10825_v32 = vpack.c.bf16 %v6050_v54, %v6049_v53 }
0x2334   :  { %10308 = vmatpush3.msra.mxu0 %v4848_v26 }
0x2335   :  { %10814 = vmatprep.subr.bf16.mxu0 %v10813_v13 }
0x2406   :  { %v10306_v41 = vpop.f32.mrb[44].mxu0 }
0x2407   :  { %v5898_v57 = vpop.f32.mrb[45].mxu0 }
0x2408   :  { %10309 = vmatprep.mubr.msk.f32.mxu0 %vm425_vm1, %v5898_v57 }
0x2409   :  { %10310 = vmatmul.mubr.msk.f32.vlgmr.msra.gmra.mrb[40].mxu0 %vm425_vm1, %v10306_v41  ;;  %v9406_v41 = vld [vmem:[%s13181_s17] ss:$0 sm:$0xff] }
0x240a   :  { %10816 = vmatpush3.bf16.msra.mxu0 %v10813_v13  ;;  %v9416_v13 = vld [vmem:[%s13174_s27 + $0x38] sm:$0xff] }
0x240b   :  { %10818 = vmatprep.subr.bf16.mxu0 %v10817_v34  ;;  %v10833_v31 = vpack.c.bf16 %v9416_v13, %v9415_v28 }
0x240e   :  { %10820 = vmatpush3.bf16.msra.mxu0 %v10817_v34 }
0x240f   :  { %10822 = vmatprep.subr.bf16.mxu0 %v10821_v29 }
0x2412   :  { %10824 = vmatpush3.bf16.msra.mxu0 %v10821_v29 }
0x2413   :  { %10826 = vmatprep.subr.bf16.mxu0 %v10825_v32 }
0x2416   :  { %10828 = vmatpush3.bf16.msra.mxu0 %v10825_v32 }
0x24dc   :  { %v10311_v59 = vpop.f32.mrb[40].mxu0 }
0x24dd   :  { %v5997_v38 = vadd.f32 %v10311_v59, %v9405_v35  ;;  %v5979_v60 = vpop.f32.mrb[41].mxu0 }
0x24de   :  { %v5996_v15 = vadd.f32 %v9405_v35, %v5979_v60 }
0x24df   :  { %v5999_v49 = vadd.f32 %v5997_v38, %v12693_v56 }
0x24e0   :  { %v5998_v16 = vadd.f32 %v5996_v15, %v12689_v6 }
0x24e1   :  { %v6003_v62 = vsel %vm332_vm0, %v5999_v49, 0.0 }
0x24e2   :  { %6004 = vadd.xlane.f32.xlu1 %v6003_v62  ;;  %v6000_v63 = vsel %vm332_vm0, %v5998_v16, 0.0 }
0x24e3   :  { %6001 = vadd.xlane.f32.xlu0 %v6000_v63 }
0x256f   :  { %v6005_v0 = vpop.xlane.xlu1 %6004 }
0x2570   :  { %v6007_v1 = vmul.f32 0.03125, %v6005_v0  ;;  %v6002_v2 = vpop.xlane.xlu0 %6001 }
0x2571   :  { %v6006_v3 = vmul.f32 0.03125, %v6002_v2 }
0x2572   :  { %v6009_v4 = vsub.f32 %v5999_v49, %v6007_v1  ;;  %v9409_v49 = vld [vmem:[%s12072_s20] ss:$0 sm:$0xff] }
0x2573   :  { %v6008_v5 = vsub.f32 %v5998_v16, %v6006_v3 }
0x2574   :  { %v6011_v56 = vmul.f32 %v6009_v4, %v6009_v4 }
0x2575   :  { %v6010_v8 = vmul.f32 %v6008_v5, %v6008_v5 }
0x2576   :  { %v6015_v6 = vsel %vm332_vm0, %v6011_v56, 0.0 }
0x2577   :  { %v6012_v39 = vsel %vm332_vm0, %v6010_v8, 0.0 }
0x2578   :  { %6013 = vadd.xlane.f32.xlu0 %v6012_v39 }
0x257c   :  { %6016 = vadd.xlane.f32.xlu0 %v6015_v6 }
0x2605   :  { %v6014_v22 = vpop.xlane.xlu0 %6013 }
0x2606   :  { %v6018_v11 = vmul.f32 0.03125, %v6014_v22 }
0x2608   :  { %v6020_v55 = vadd.f32 1e-05, %v6018_v11 }
0x2609   :  { %v6017_v42 = vpop.xlane.xlu0 %6016 }
0x260a   :  { %11431 = vrsqrt.f32 %v6020_v55  ;;  %v6019_v61 = vmul.f32 0.03125, %v6017_v42  ;;  %v6258_v55 = vsub.s32 4, %v12336_v23  ;;  %v6264_v42 = vsub.s32 5, %v12336_v23 }
0x260c   :  { %v6021_v43 = vadd.f32 1e-05, %v6019_v61  ;;  %v6259_v61 = vrot.slane %v12683_v51, %v6258_v55 }
0x260e   :  { %11433 = vrsqrt.f32 %v6021_v43 }
0x2614   :  { %v11432_v7 = vpop.eup %11431 }
0x2615   :  { %v6024_v45 = vmul.f32 %v11432_v7, %v6008_v5  ;;  %v6265_v7 = vrot.slane %v12683_v51, %v6264_v42 }
0x2617   :  { %v6030_v47 = vmul.f32 %v6029_v44, %v6024_v45 }
0x2618   :  { %v11434_v48 = vpop.eup %11433 }
0x2619   :  { %v6025_v26 = vmul.f32 %v11434_v48, %v6009_v4  ;;  %v6036_v50 = vadd.f32 %v6035_v46, %v6030_v47 }
0x261b   :  { %v6031_v37 = vmul.f32 %v6029_v44, %v6025_v26  ;;  %10320 = vmatprep.mubr.msk.f32.mxu1 %vm332_vm0, %v6036_v50 }
0x261d   :  { %v6037_v52 = vadd.f32 %v6035_v46, %v6031_v37  ;;  %v9418_v37 = vld [vmem:[%s13175_s16 + $0x1] ss:$0 sm:$0xff] }
0x261f   :  { %10321 = vmatmul.mubr.msk.f32.vlgmr.msra.gmra.mrb[44].mxu1 %vm332_vm0, %v6037_v52 }
0x2620   :  { %10832 = vmatpush3.bf16.msra.mxu1 %v10829_v24 }
0x2621   :  { %10834 = vmatprep.subr.bf16.mxu1 %v10833_v31 }
0x2624   :  { %10836 = vmatpush3.bf16.msra.mxu1 %v10833_v31 }
0x26f2   :  { %v10322_v57 = vpop.f32.mrb[44].mxu1 }
0x26f3   :  { %v6136_v35 = vadd.f32 %v10322_v57, %v9406_v41  ;;  %v6130_v59 = vpop.f32.mrb[45].mxu1 }
0x26f4   :  { %v6131_v38 = vadd.f32 %v9406_v41, %v6130_v59 }
0x26f5   :  { %v6140_v15 = vmax.f32 %v6136_v35, 0.0 }
0x26f6   :  { %v6139_v60 = vmax.f32 %v6131_v38, 0.0 }
0x26f8   :  { %10339 = vmatprep.mubr.msk.f32.mxu0 %vm1722_vm4, %v6139_v60 }
0x26f9   :  { %10340 = vmatmul.mubr.msk.f32.vlgmr.msra.gmra.mrb[46].mxu0 %vm1722_vm4, %v6140_v15 }
0x27cc   :  { %v10341_v16 = vpop.f32.mrb[46].mxu0 }
0x27cd   :  { %v6219_v62 = vpop.f32.mrb[47].mxu0  ;;  %v6225_v63 = vadd.f32 %v10341_v16, %v9409_v49 }
0x27ce   :  { %v6220_v0 = vadd.f32 %v9409_v49, %v6219_v62 }
0x27cf   :  { %v6229_v2 = vadd.f32 %v6225_v63, %v6037_v52 }
0x27d0   :  { %v6228_v1 = vadd.f32 %v6220_v0, %v6036_v50 }
0x27d1   :  { %v6233_v4 = vsel %vm332_vm0, %v6229_v2, 0.0 }
0x27d2   :  { %v6230_v3 = vsel %vm332_vm0, %v6228_v1, 0.0 }
0x27d3   :  { %6231 = vadd.xlane.f32.xlu0 %v6230_v3 }
0x27d7   :  { %6234 = vadd.xlane.f32.xlu0 %v6233_v4 }
0x2860   :  { %v6232_v5 = vpop.xlane.xlu0 %6231 }
0x2861   :  { %v6236_v8 = vmul.f32 0.03125, %v6232_v5 }
0x2863   :  { %v6238_v39 = vsub.f32 %v6228_v1, %v6236_v8 }
0x2864   :  { %v6235_v56 = vpop.xlane.xlu0 %6234 }
0x2865   :  { %v6237_v6 = vmul.f32 0.03125, %v6235_v56  ;;  %v6240_v18 = vmul.f32 %v6238_v39, %v6238_v39 }
0x2867   :  { %v6239_v58 = vsub.f32 %v6229_v2, %v6237_v6  ;;  %v6242_v10 = vsel %vm332_vm0, %v6240_v18, 0.0  ;;  %v12897_v6 = vld [vmem:[#allocation8 + $0x8] sm:$0xff] }
0x2868   :  { %6243 = vadd.xlane.f32.xlu0 %v6242_v10 }
0x2869   :  { %v6241_v20 = vmul.f32 %v6239_v58, %v6239_v58 }
0x286b   :  { %v6245_v9 = vsel %vm332_vm0, %v6241_v20, 0.0 }
0x286c   :  { %6246 = vadd.xlane.f32.xlu0 %v6245_v9 }
0x28f5   :  { %v6244_v34 = vpop.xlane.xlu0 %6243 }
0x28f6   :  { %v6248_v36 = vmul.f32 0.03125, %v6244_v34 }
0x28f8   :  { %v6250_v40 = vadd.f32 1e-05, %v6248_v36 }
0x28f9   :  { %v6247_v29 = vpop.xlane.xlu0 %6246 }
0x28fa   :  { %11435 = vrsqrt.f32 %v6250_v40  ;;  %v6249_v22 = vmul.f32 0.03125, %v6247_v29 }
0x28fc   :  { %v6251_v11 = vadd.f32 1e-05, %v6249_v22 }
0x28fe   :  { %11437 = vrsqrt.f32 %v6251_v11 }
0x2904   :  { %v11436_v43 = vpop.eup %11435 }
0x2905   :  { %v6254_v44 = vmul.f32 %v11436_v43, %v6238_v39 }
0x2907   :  { %v6260_v45 = vmul.f32 %v6259_v61, %v6254_v44 }
0x2908   :  { %v11438_v46 = vpop.eup %11437 }
0x2909   :  { %v6255_v47 = vmul.f32 %v11438_v46, %v6239_v58  ;;  %v12846_v48 = vadd.f32 %v6265_v7, %v6260_v45  ;;  %v12900_v58 = vld [vmem:[#allocation8] sm:$0xff] }
0x290b   :  { %v6261_v26 = vmul.f32 %v6259_v61, %v6255_v47  ;;  %10350 = vmatprep.mubr.msk.f32.mxu1 %vm332_vm0, %v12846_v48 }
0x290d   :  { %v12850_v50 = vadd.f32 %v6265_v7, %v6261_v26 }
0x290f   :  { %10351 = vmatmul.mubr.msk.f32.vlgmr.msra.gmra.mrb[46].mxu1 %vm332_vm0, %v12850_v50 }
0x29e2   :  { %v10352_v52 = vpop.f32.mrb[46].mxu1 }
0x29e3   :  { %v12855_v53 = vadd.f32 %v10352_v52, %v9418_v37  ;;  %v6355_v54 = vpop.f32.mrb[47].mxu1 }
0x29e4   :  { %v12857_v51 = vadd.f32 %v9418_v37, %v6355_v54 }
0x29e6   :  { %10357 = vmatprep.mubr.msk.f32.mxu1 %vm425_vm1, %v12857_v51  ;;  %v12863_v32 = vpack.i.bf16 %v12855_v53, %v12857_v51 }
0x29e8   :  { %11214 = vrot.lane.b32.xlu1 %v12863_v32, %s11920_s19  ;;  %11209 = vrot.lane.b32.xlu0 %v12863_v32, %s11919_s5 }
0x29ec   :  { %11219 = vrot.lane.b32.xlu1 %v12863_v32, %s11922_s1  ;;  %6573 = vrot.lane.b32.xlu0 %v12857_v51, %s11918_s14 }
0x29f0   :  { %6941 = vrot.lane.b32.xlu1 %v12855_v53, %s11921_s13  ;;  %6575 = vrot.lane.b32.xlu0 %v12855_v53, %s11918_s14 }
0x29f4   :  { %6939 = vrot.lane.b32.xlu0 %v12857_v51, %s11921_s13 }
0x2a5a   :  { %v11215_v41 = vpop.permute.xlu1 %11214  ;;  %v11210_v57 = vpop.permute.xlu0 %11209 }
0x2a5b   :  { %v11217_v35 = vunpack.i.h.bf16 %v11215_v41  ;;  %v11216_v59 = vunpack.i.l.bf16 %v11215_v41  ;;  %v11212_v38 = vunpack.i.h.bf16 %v11210_v57  ;;  %v11211_v60 = vunpack.i.l.bf16 %v11210_v57 }
0x2a5d   :  { %v10837_v15 = vpack.c.bf16 %v11212_v38, %v11211_v60  ;;  %v10847_v49 = vpack.c.bf16 %v11217_v35, %v11216_v59 }
0x2a5e   :  { %v11220_v16 = vpop.permute.xlu1 %11219  ;;  %v6574_v0 = vpop.permute.xlu0 %6573 }
0x2a5f   :  { %10839 = vmatprep.subr.msk.bf16.mxu1 %vm12226_vm2, %v10837_v15  ;;  %v11222_v62 = vunpack.i.h.bf16 %v11220_v16  ;;  %v11221_v63 = vunpack.i.l.bf16 %v11220_v16 }
0x2a60   :  { %10842 = vmatpush3.bf16.xpose.msk.msra.mxu1 %vm12226_vm2, %v10837_v15 }
0x2a61   :  { %10849 = vmatprep.subr.msk.bf16.mxu1 %vm12226_vm2, %v10847_v49  ;;  %v10857_v1 = vpack.c.bf16 %v11222_v62, %v11221_v63 }
0x2a62   :  { %v6576_v2 = vpop.permute.xlu0 %6575  ;;  %v6942_v4 = vpop.permute.xlu1 %6941 }
0x2a66   :  { %v6940_v3 = vpop.permute.xlu0 %6939 }
0x2a67   :  { %10358 = vmatmul.mubr.msk.f32.vlgmr.msra.gmra.mrb[48].mxu1 %vm425_vm1, %v12855_v53 }
0x2a68   :  { %10852 = vmatpush3.bf16.xpose.msk.msra.mxu1 %vm12226_vm2, %v10847_v49  ;;  %10371 = vmatprep.mubr.msk.f32.mxu1 %vm425_vm1, %v6574_v0 }
0x2a69   :  { %10859 = vmatprep.subr.msk.bf16.mxu1 %vm12226_vm2, %v10857_v1 }
0x2a6f   :  { %10372 = vmatmul.mubr.msk.f32.vlgmr.msra.gmra.mrb[50].mxu1 %vm425_vm1, %v6576_v2 }
0x2a70   :  { %10862 = vmatpush3.bf16.xpose.msk.msra.mxu1 %vm12226_vm2, %v10857_v1  ;;  %10395 = vmatprep.mubr.msk.f32.mxu1 %vm425_vm1, %v6940_v3 }
0x2a77   :  { %10396 = vmatmul.mubr.msk.f32.vlgmr.msra.gmra.mrb[52].mxu1 %vm425_vm1, %v6942_v4 }
0x2b3a   :  { %v10359_v5 = vpop.f32.mrb[48].mxu1 }
0x2b3b   :  { %v6461_v8 = vmul.f32 0.35355338, %v10359_v5  ;;  %v6451_v39 = vpop.f32.mrb[49].mxu1 }
0x2b3c   :  { %v6460_v56 = vmul.f32 0.35355338, %v6451_v39 }
0x2b3d   :  { %v6463_v18 = vadd.f32 %v12897_v6, %v6461_v8 }
0x2b3e   :  { %v6462_v10 = vadd.f32 %v12900_v58, %v6460_v56 }
0x2b3f   :  { %v6467_v20 = vsel %vm513_vm3, %v6463_v18, -inf }
0x2b40   :  { %6468 = vmax.xlane.f32.xlu1 %v6467_v20  ;;  %v6464_v9 = vsel %vm513_vm3, %v6462_v10, -inf }
0x2b41   :  { %6465 = vmax.xlane.f32.xlu0 %v6464_v9 }
0x2b42   :  { %v10373_v14 = vpop.f32.mrb[50].mxu1 }
0x2b43   :  { %v6655_v21 = vpop.f32.mrb[51].mxu1  ;;  %v6665_v24 = vmul.f32 0.35355338, %v10373_v14 }
0x2b44   :  { %v6664_v28 = vmul.f32 0.35355338, %v6655_v21 }
0x2b45   :  { %v6667_v31 = vadd.f32 %v12897_v6, %v6665_v24 }
0x2b46   :  { %v6666_v13 = vadd.f32 %v12900_v58, %v6664_v28 }
0x2b47   :  { %v6671_v29 = vsel %vm513_vm3, %v6667_v31, -inf }
0x2b48   :  { %v6668_v34 = vsel %vm513_vm3, %v6666_v13, -inf }
0x2b49   :  { %6669 = vmax.xlane.f32.xlu0 %v6668_v34 }
0x2b4a   :  { %v10397_v36 = vpop.f32.mrb[52].mxu1 }
0x2b4b   :  { %v7021_v40 = vpop.f32.mrb[53].mxu1  ;;  %v7031_v49 = vmul.f32 0.35355338, %v10397_v36 }
0x2b4c   :  { %v7030_v16 = vmul.f32 0.35355338, %v7021_v40 }
0x2b4d   :  { %6672 = vmax.xlane.f32.xlu0 %v6671_v29  ;;  %v7033_v62 = vadd.f32 %v12897_v6, %v7031_v49 }
0x2b4e   :  { %v7032_v63 = vadd.f32 %v12900_v58, %v7030_v16 }
0x2b4f   :  { %v7037_v1 = vsel %vm513_vm3, %v7033_v62, -inf }
0x2b50   :  { %v7034_v0 = vsel %vm513_vm3, %v7032_v63, -inf }
0x2bcd   :  { %v6469_v22 = vpop.xlane.xlu1 %6468 }
0x2bce   :  { %v6471_v11 = vsub.f32 %v6463_v18, %v6469_v22  ;;  %v6466_v61 = vpop.xlane.xlu0 %6465 }
0x2bcf   :  { %v6470_v43 = vsub.f32 %v6462_v10, %v6466_v61 }
0x2bd0   :  { %v6474_v44 = vmul.f32 1.442695, %v6471_v11 }
0x2bd1   :  { %v6472_v7 = vmul.f32 1.442695, %v6470_v43 }
0x2bd2   :  { %11439 = vpow2.f32 %v6474_v44 }
0x2bd3   :  { %11441 = vpow2.f32 %v6472_v7 }
0x2bd6   :  { %v6670_v45 = vpop.xlane.xlu0 %6669 }
0x2bd7   :  { %v6674_v46 = vsub.f32 %v6666_v13, %v6670_v45 }
0x2bd9   :  { %v6676_v47 = vmul.f32 1.442695, %v6674_v46 }
0x2bda   :  { %v6673_v26 = vpop.xlane.xlu0 %6672 }
0x2bdb   :  { %11443 = vpow2.f32 %v6676_v47  ;;  %v6675_v37 = vsub.f32 %v6667_v31, %v6673_v26 }
0x2bdc   :  { %v11440_v52 = vpop.eup %11439 }
0x2bdd   :  { %v11442_v54 = vpop.eup %11441  ;;  %v6678_v41 = vmul.f32 1.442695, %v6675_v37  ;;  %v6479_v57 = vsel %vm513_vm3, %v11440_v52, 0.0 }
0x2bde   :  { %6480 = vadd.xlane.f32.xlu0 %v6479_v57  ;;  %v6476_v35 = vsel %vm513_vm3, %v11442_v54, 0.0  ;;  %v9421_v57 = vld [vmem:[%s13176_s23 + $0x20] sm:$0xff] }
0x2bdf   :  { %11445 = vpow2.f32 %v6678_v41  ;;  %6477 = vadd.xlane.f32.xlu1 %v6476_v35  ;;  %v9422_v41 = vld [vmem:[%s13176_s23 + $0x28] sm:$0xff] }
0x2be5   :  { %v11444_v59 = vpop.eup %11443 }
0x2be6   :  { %v6680_v38 = vsel %vm513_vm3, %v11444_v59, 0.0 }
0x2be7   :  { %6681 = vadd.xlane.f32.xlu1 %v6680_v38 }
0x2be9   :  { %v11446_v60 = vpop.eup %11445 }
0x2bea   :  { %v6683_v15 = vsel %vm513_vm3, %v11446_v60, 0.0 }
0x2beb   :  { %6684 = vadd.xlane.f32.xlu0 %v6683_v15 }
0x2bf8   :  { %11224 = vrot.lane.b32.xlu1 %v12863_v32, %s11907_s9 }
0x2bfc   :  { %11234 = vrot.lane.b32.xlu1 %v12863_v32, %s11924_s10 }
0x2c00   :  { %7226 = vrot.lane.b32.xlu1 %v12857_v51, %s11925_s11 }
0x2c01   :  { %11229 = vrot.lane.b32.xlu0 %v12863_v32, %s11923_s2 }
0x2c05   :  { %7228 = vrot.lane.b32.xlu0 %v12855_v53, %s11925_s11 }
0x2c24   :  { %7035 = vmax.xlane.f32.xlu1 %v7034_v0  ;;  %7038 = vmax.xlane.f32.xlu0 %v7037_v1 }
0x2c6b   :  { %v6481_v51 = vpop.xlane.xlu0 %6480 }
0x2c6c   :  { %v6478_v2 = vpop.xlane.xlu1 %6477 }
0x2c6d   :  { %11447 = vrcp.f32 %v6478_v2 }
0x2c6e   :  { %11449 = vrcp.f32 %v6481_v51 }
0x2c74   :  { %v6682_v3 = vpop.xlane.xlu1 %6681 }
0x2c75   :  { %11451 = vrcp.f32 %v6682_v3 }
0x2c77   :  { %v11448_v4 = vpop.eup %11447 }
0x2c78   :  { %v11225_v53 = vpop.permute.xlu1 %11224  ;;  %v6685_v5 = vpop.xlane.xlu0 %6684  ;;  %v6484_v8 = vmul.f32 %v11448_v4, %v11442_v54 }
0x2c79   :  { %v11227_v39 = vunpack.i.h.bf16 %v11225_v53  ;;  %v11226_v56 = vunpack.i.l.bf16 %v11225_v53  ;;  %11453 = vrcp.f32 %v6685_v5  ;;  %v11450_v10 = vpop.eup %11449 }
0x2c7a   :  { %10364 = vmatprep.mubr.msk.f32.mxu0 %vm513_vm3, %v6484_v8  ;;  %v6485_v31 = vmul.f32 %v11450_v10, %v11440_v52 }
0x2c7b   :  { %v10843_v18 = vpack.c.bf16 %v11227_v39, %v11226_v56 }
0x2c7c   :  { %v11235_v20 = vpop.permute.xlu1 %11234  ;;  %v11230_v9 = vpop.permute.xlu0 %11229 }
0x2c7d   :  { %v11237_v14 = vunpack.i.h.bf16 %v11235_v20  ;;  %v11236_v21 = vunpack.i.l.bf16 %v11235_v20  ;;  %v11232_v24 = vunpack.i.h.bf16 %v11230_v9  ;;  %v11231_v28 = vunpack.i.l.bf16 %v11230_v9  ;;  %10844 = vmatprep.subr.bf16.mxu0 %v10843_v18  ;;  %v9423_v20 = vld [vmem:[%s13176_s23 + $0x30] sm:$0xff] }
0x2c7e   :  { %10846 = vmatpush3.bf16.msra.mxu0 %v10843_v18 }
0x2c7f   :  { %v11452_v13 = vpop.eup %11451  ;;  %v10867_v34 = vpack.c.bf16 %v11237_v14, %v11236_v21  ;;  %v10853_v36 = vpack.c.bf16 %v11232_v24, %v11231_v28 }
0x2c80   :  { %v7227_v40 = vpop.permute.xlu1 %7226  ;;  %v6688_v29 = vmul.f32 %v11452_v13, %v11444_v59  ;;  %v7229_v61 = vpop.permute.xlu0 %7228 }
0x2c81   :  { %10365 = vmatmul.mubr.msk.f32.vlgmr.msra.gmra.mrb[48].mxu0 %vm513_vm3, %v6485_v31  ;;  %10854 = vmatprep.subr.bf16.mxu0 %v10853_v36 }
0x2c82   :  { %10869 = vmatprep.subr.msk.bf16.mxu1 %vm12226_vm2, %v10867_v34  ;;  %10414 = vmatprep.mubr.msk.f32.mxu1 %vm425_vm1, %v7227_v40 }
0x2c83   :  { %v11454_v22 = vpop.eup %11453  ;;  %10856 = vmatpush3.bf16.msra.mxu0 %v10853_v36  ;;  %10378 = vmatprep.mubr.msk.f32.mxu0 %vm513_vm3, %v6688_v29 }
0x2c84   :  { %v6689_v11 = vmul.f32 %v11454_v22, %v11446_v60  ;;  %10872 = vmatpush3.bf16.xpose.msk.msra.mxu1 %vm12226_vm2, %v10867_v34  ;;  %10381 = vmatprep.subr.mxu0 %v9422_v41 }
0x2c86   :  { %10379 = vmatmul.mubr.msk.f32.vlgmr.msra.gmra.mrb[50].mxu0 %vm513_vm3, %v6689_v11 }
0x2c87   :  { %10382 = vmatpush3.msra.mxu0 %v9422_v41  ;;  %v7659_v41 = vld [vmem:[#allocation20 + $0x38] sm:$0xff] }
0x2c88   :  { %10386 = vmatprep.subr.mxu0 %v9421_v57 }
0x2c8b   :  { %10415 = vmatmul.mubr.msk.f32.vlgmr.msra.gmra.mrb[54].mxu1 %vm425_vm1, %v7229_v61 }
0x2cb1   :  { %v7036_v43 = vpop.xlane.xlu1 %7035  ;;  %v7039_v44 = vpop.xlane.xlu0 %7038 }
0x2cb2   :  { %v7040_v7 = vsub.f32 %v7032_v63, %v7036_v43  ;;  %v7041_v45 = vsub.f32 %v7033_v62, %v7039_v44 }
0x2cb4   :  { %v7042_v46 = vmul.f32 1.442695, %v7040_v7  ;;  %v7044_v47 = vmul.f32 1.442695, %v7041_v45  ;;  %v9424_v7 = vld [vmem:[%s13176_s23 + $0x38] sm:$0xff] }
0x2cb6   :  { %11455 = vpow2.f32 %v7042_v46 }
0x2cb7   :  { %11457 = vpow2.f32 %v7044_v47 }
0x2cc0   :  { %v11456_v26 = vpop.eup %11455 }
0x2cc1   :  { %v11458_v37 = vpop.eup %11457  ;;  %v7046_v52 = vsel %vm513_vm3, %v11456_v26, 0.0 }
0x2cc2   :  { %7047 = vadd.xlane.f32.xlu0 %v7046_v52  ;;  %v7049_v54 = vsel %vm513_vm3, %v11458_v37, 0.0 }
0x2cc3   :  { %7050 = vadd.xlane.f32.xlu1 %v7049_v54  ;;  %v7658_v54 = vld [vmem:[#allocation20 + $0x30] sm:$0xff] }
0x2cd8   :  { %11239 = vrot.lane.b32.xlu0 %v12863_v32, %s11926_s15 }
0x2d4f   :  { %v7048_v35 = vpop.xlane.xlu0 %7047 }
0x2d50   :  { %v7051_v15 = vpop.xlane.xlu1 %7050  ;;  %11459 = vrcp.f32 %v7048_v35 }
0x2d51   :  { %11461 = vrcp.f32 %v7051_v15 }
0x2d53   :  { %v11240_v38 = vpop.permute.xlu0 %11239 }
0x2d54   :  { %v10366_v59 = vpop.f32.mrb[48].mxu0  ;;  %v11242_v49 = vunpack.i.h.bf16 %v11240_v38  ;;  %v11241_v16 = vunpack.i.l.bf16 %v11240_v38  ;;  %v7562_v38 = vld [vmem:[#allocation19 + $0x20] sm:$0xff] }
0x2d55   :  { %v6564_v60 = vpop.f32.mrb[49].mxu0 }
0x2d56   :  { %v10863_v0 = vpack.c.bf16 %v11242_v49, %v11241_v16  ;;  %v7564_v49 = vld [vmem:[#allocation19 + $0x30] sm:$0xff]  ;;  %v7565_v16 = vld [vmem:[#allocation19 + $0x38] sm:$0xff] }
0x2d59   :  { %v10380_v62 = vpop.f32.mrb[50].mxu0 }
0x2d5a   :  { %v6768_v63 = vpop.f32.mrb[51].mxu0  ;;  %v11460_v4 = vpop.eup %11459 }
0x2d5b   :  { %10383 = vmatprep.mubr.msk.f32.mxu0 %vm425_vm1, %v6768_v63  ;;  %v11462_v5 = vpop.eup %11461  ;;  %v7054_v56 = vmul.f32 %v11460_v4, %v11456_v26  ;;  %v7656_v26 = vld [vmem:[#allocation20 + $0x20] sm:$0xff] }
0x2d5c   :  { %10384 = vmatmul.mubr.msk.f32.vlgmr.msra.gmra.mrb[52].mxu0 %vm425_vm1, %v10380_v62  ;;  %v7055_v18 = vmul.f32 %v11462_v5, %v11458_v37  ;;  %v7657_v37 = vld [vmem:[#allocation20 + $0x28] sm:$0xff]  ;;  %v10881_v62 = vpack.c.bf16 %v7565_v16, %v7564_v49  ;;  %v9458_v63 = vld [vmem:[%s13177_s29 + $0x1] ss:$0 sm:$0xff] }
0x2d5d   :  { %10387 = vmatpush3.msra.mxu0 %v9421_v57  ;;  %10388 = vmatprep.mubr.msk.f32.mxu0 %vm425_vm1, %v6564_v60  ;;  %v10885_v52 = vpack.c.bf16 %v7657_v37, %v7656_v26  ;;  %v7563_v60 = vld [vmem:[#allocation19 + $0x28] sm:$0xff]  ;;  %v9464_v4 = vld [vmem:[%s13178_s30 + $0x1] ss:$0 sm:$0xff] }
0x2d5e   :  { %v10416_v1 = vpop.f32.mrb[54].mxu1  ;;  %10864 = vmatprep.subr.bf16.mxu0 %v10863_v0  ;;  %v10877_v15 = vpack.c.bf16 %v7563_v60, %v7562_v38 }
0x2d5f   :  { %v7308_v2 = vpop.f32.mrb[55].mxu1  ;;  %v7318_v51 = vmul.f32 0.35355338, %v10416_v1 }
0x2d60   :  { %v7317_v3 = vmul.f32 0.35355338, %v7308_v2  ;;  %10878 = vmatprep.subr.bf16.mxu1 %v10877_v15 }
0x2d61   :  { %v7320_v8 = vadd.f32 %v12897_v6, %v7318_v51  ;;  %10880 = vmatpush3.bf16.msra.mxu1 %v10877_v15 }
0x2d62   :  { %v7319_v53 = vadd.f32 %v12900_v58, %v7317_v3  ;;  %10882 = vmatprep.subr.bf16.mxu1 %v10881_v62 }
0x2d63   :  { %v7324_v10 = vsel %vm513_vm3, %v7320_v8, -inf }
0x2d64   :  { %v7321_v39 = vsel %vm513_vm3, %v7319_v53, -inf  ;;  %10389 = vmatmul.mubr.msk.f32.vlgmr.msra.gmra.mrb[52].mxu0 %vm425_vm1, %v10366_v59  ;;  %v10889_v59 = vpack.c.bf16 %v7659_v41, %v7658_v54 }
0x2d65   :  { %7322 = vmax.xlane.f32.xlu1 %v7321_v39  ;;  %10866 = vmatpush3.bf16.msra.mxu0 %v10863_v0 }
0x2d66   :  { %10402 = vmatprep.mubr.msk.f32.mxu0 %vm513_vm3, %v7054_v56  ;;  %10405 = vmatprep.subr.mxu0 %v9423_v20 }
0x2d67   :  { %10884 = vmatpush3.bf16.msra.mxu1 %v10881_v62 }
0x2d68   :  { %10403 = vmatmul.mubr.msk.f32.vlgmr.msra.gmra.mrb[54].mxu0 %vm513_vm3, %v7055_v18 }
0x2d69   :  { %7325 = vmax.xlane.f32.xlu1 %v7324_v10  ;;  %10406 = vmatpush3.msra.mxu0 %v9423_v20 }
0x2df2   :  { %v7323_v58 = vpop.xlane.xlu1 %7322 }
0x2df3   :  { %v7327_v6 = vsub.f32 %v7319_v53, %v7323_v58 }
0x2df5   :  { %v7329_v21 = vmul.f32 1.442695, %v7327_v6 }
0x2df6   :  { %v7326_v9 = vpop.xlane.xlu1 %7325 }
0x2df7   :  { %v7328_v14 = vsub.f32 %v7320_v8, %v7326_v9 }
0x2df9   :  { %v7331_v24 = vmul.f32 1.442695, %v7328_v14 }
0x2dfb   :  { %11463 = vpow2.f32 %v7331_v24 }
0x2dfc   :  { %11465 = vpow2.f32 %v7329_v21 }
0x2e05   :  { %v11464_v28 = vpop.eup %11463 }
0x2e06   :  { %v7336_v13 = vsel %vm513_vm3, %v11464_v28, 0.0  ;;  %v11466_v31 = vpop.eup %11465 }
0x2e07   :  { %7337 = vadd.xlane.f32.xlu1 %v7336_v13  ;;  %v7333_v34 = vsel %vm513_vm3, %v11466_v31, 0.0 }
0x2e0b   :  { %7334 = vadd.xlane.f32.xlu1 %v7333_v34 }
0x2e1c   :  { %11244 = vrot.lane.b32.xlu1 %v12863_v32, %s11927_s21 }
0x2e3b   :  { %v10404_v36 = vpop.f32.mrb[54].mxu0 }
0x2e3c   :  { %v7134_v40 = vpop.f32.mrb[55].mxu0 }
0x2e3d   :  { %10407 = vmatprep.mubr.msk.f32.mxu0 %vm425_vm1, %v7134_v40 }
0x2e3e   :  { %10408 = vmatmul.mubr.msk.f32.vlgmr.msra.gmra.mrb[52].mxu0 %vm425_vm1, %v10404_v36 }
0x2e94   :  { %v7338_v29 = vpop.xlane.xlu1 %7337 }
0x2e95   :  { %11467 = vrcp.f32 %v7338_v29 }
0x2e98   :  { %v7335_v22 = vpop.xlane.xlu1 %7334 }
0x2e99   :  { %11469 = vrcp.f32 %v7335_v22  ;;  %v12984_v22 = vld [vmem:[%s12077_s25 + $0x8] sm:$0x3f]  ;;  %s11928_s25 = smov [#allocation25]  }
0x2e9c   :  { %v11245_v11 = vpop.permute.xlu1 %11244 }
0x2e9d   :  { %v11247_v61 = vunpack.i.h.bf16 %v11245_v11  ;;  %v11246_v43 = vunpack.i.l.bf16 %v11245_v11  ;;  %v7552_v11 = vrot.slane %v12984_v22, %v12339_v25 }
0x2e9f   :  { %v10873_v44 = vpack.c.bf16 %v11247_v61, %v11246_v43  ;;  %v11468_v45 = vpop.eup %11467 }
0x2ea0   :  { %v7342_v47 = vmul.f32 %v11468_v45, %v11464_v28 }
0x2ea1   :  { %10874 = vmatprep.subr.bf16.mxu0 %v10873_v44 }
0x2ea2   :  { %10876 = vmatpush3.bf16.msra.mxu0 %v10873_v44  ;;  %v7558_v44 = vrot.slane %v12984_v22, %v12344_v27  ;;  %v9460_v27 = vld [vmem:[%s13179_s7 + $0x1] ss:$0 sm:$0xff] }
0x2ea3   :  { %v11470_v46 = vpop.eup %11469  ;;  %10424 = vmatprep.subr.mxu0 %v9424_v7 }
0x2ea4   :  { %v7341_v32 = vmul.f32 %v11470_v46, %v11466_v31 }
0x2ea6   :  { %10421 = vmatprep.mubr.msk.f32.mxu0 %vm513_vm3, %v7341_v32 }
0x2ea7   :  { %10422 = vmatmul.mubr.msk.f32.vlgmr.msra.gmra.mrb[56].mxu0 %vm513_vm3, %v7342_v47 }
0x2ea8   :  { %10425 = vmatpush3.msra.mxu0 %v9424_v7 }
0x2ea9   :  { %10886 = vmatprep.subr.bf16.mxu0 %v10885_v52 }
0x2f7a   :  { %v10423_v57 = vpop.f32.mrb[56].mxu0 }
0x2f7b   :  { %v7421_v35 = vpop.f32.mrb[57].mxu0 }
0x2f7c   :  { %10426 = vmatprep.mubr.msk.f32.mxu0 %vm425_vm1, %v7421_v35 }
0x2f7d   :  { %10427 = vmatmul.mubr.msk.f32.vlgmr.msra.gmra.mrb[52].mxu0 %vm425_vm1, %v10423_v57 }
0x2f7e   :  { %10888 = vmatpush3.bf16.msra.mxu0 %v10885_v52  ;;  %10448 = vmatprep.mubr.msk.f32.mxu0 %vm332_vm0, %v12674_v30 }
0x2f7f   :  { %10890 = vmatprep.subr.bf16.mxu0 %v10889_v59 }
0x2f82   :  { %10892 = vmatpush3.bf16.msra.mxu0 %v10889_v59 }
0x2f85   :  { %10449 = vmatmul.mubr.msk.f32.vlgmr.msra.gmra.mrb[58].mxu0 %vm332_vm0, %v12678_v33 }
0x3050   :  { %v10428_v0 = vpop.f32.mrb[52].mxu0 }
0x3051   :  { %v7520_v1 = vadd.f32 %v10428_v0, %v9458_v63  ;;  %v7502_v30 = vpop.f32.mrb[53].mxu0 }
0x3052   :  { %v7519_v2 = vadd.f32 %v9458_v63, %v7502_v30 }
0x3053   :  { %v7522_v51 = vadd.f32 %v7520_v1, %v12850_v50 }
0x3054   :  { %v7521_v33 = vadd.f32 %v7519_v2, %v12846_v48 }
0x3055   :  { %v7526_v3 = vsel %vm332_vm0, %v7522_v51, 0.0 }
0x3056   :  { %7527 = vadd.xlane.f32.xlu1 %v7526_v3  ;;  %v7523_v53 = vsel %vm332_vm0, %v7521_v33, 0.0 }
0x3057   :  { %7524 = vadd.xlane.f32.xlu0 %v7523_v53 }
0x3058   :  { %v10450_v5 = vpop.f32.mrb[58].mxu0 }
0x3059   :  { %v7740_v8 = vadd.f32 %v10450_v5, %v9464_v4  ;;  %v7734_v39 = vpop.f32.mrb[59].mxu0 }
0x305a   :  { %v7735_v56 = vadd.f32 %v9464_v4, %v7734_v39  ;;  %v13034_v4 = vld [vmem:[#allocation10] sm:$0xff] }
0x305c   :  { %v10893_v18 = vpack.c.bf16 %v7740_v8, %v7735_v56  ;;  %v12975_v10 = vpack.i.bf16 %v7740_v8, %v7735_v56 }
0x305e   :  { %10895 = vmatprep.subr.msk.bf16.mxu1 %vm12226_vm2, %v10893_v18 }
0x30e3   :  { %v7528_v50 = vpop.xlane.xlu1 %7527 }
0x30e4   :  { %v7530_v20 = vmul.f32 0.03125, %v7528_v50  ;;  %v7525_v48 = vpop.xlane.xlu0 %7524 }
0x30e5   :  { %v7529_v58 = vmul.f32 0.03125, %v7525_v48 }
0x30e6   :  { %v7532_v6 = vsub.f32 %v7522_v51, %v7530_v20 }
0x30e7   :  { %v7531_v9 = vsub.f32 %v7521_v33, %v7529_v58  ;;  %v13031_v33 = vld [vmem:[#allocation10 + $0x8] sm:$0xff] }
0x30e8   :  { %v7534_v24 = vmul.f32 %v7532_v6, %v7532_v6 }
0x30e9   :  { %v7533_v14 = vmul.f32 %v7531_v9, %v7531_v9 }
0x30ea   :  { %v7538_v28 = vsel %vm332_vm0, %v7534_v24, 0.0 }
0x30eb   :  { %v7535_v21 = vsel %vm332_vm0, %v7533_v14, 0.0 }
0x30ec   :  { %7536 = vadd.xlane.f32.xlu0 %v7535_v21 }
0x30f0   :  { %7539 = vadd.xlane.f32.xlu0 %v7538_v28 }
0x3106   :  { %11249 = vrot.lane.b32.xlu0 %v12975_v10, %s11918_s14 }
0x3179   :  { %v7537_v13 = vpop.xlane.xlu0 %7536 }
0x317a   :  { %v7541_v31 = vmul.f32 0.03125, %v7537_v13 }
0x317c   :  { %v7543_v34 = vadd.f32 1e-05, %v7541_v31 }
0x317d   :  { %v7540_v36 = vpop.xlane.xlu0 %7539 }
0x317e   :  { %11471 = vrsqrt.f32 %v7543_v34  ;;  %v7542_v40 = vmul.f32 0.03125, %v7540_v36 }
0x3180   :  { %v7544_v29 = vadd.f32 1e-05, %v7542_v40 }
0x3181   :  { %v11250_v46 = vpop.permute.xlu0 %11249 }
0x3182   :  { %11473 = vrsqrt.f32 %v7544_v29  ;;  %v11252_v26 = vunpack.i.h.bf16 %v11250_v46  ;;  %v11251_v37 = vunpack.i.l.bf16 %v11250_v46 }
0x3184   :  { %v10903_v25 = vpack.c.bf16 %v11252_v26, %v11251_v37 }
0x3188   :  { %v11472_v61 = vpop.eup %11471 }
0x3189   :  { %v7547_v43 = vmul.f32 %v11472_v61, %v7531_v9 }
0x318b   :  { %v7553_v7 = vmul.f32 %v7552_v11, %v7547_v43 }
0x318c   :  { %v11474_v45 = vpop.eup %11473 }
0x318d   :  { %v7548_v32 = vmul.f32 %v11474_v45, %v7532_v6  ;;  %v12990_v47 = vadd.f32 %v7558_v44, %v7553_v7 }
0x318f   :  { %v7554_v52 = vmul.f32 %v7552_v11, %v7548_v32  ;;  %10437 = vmatprep.mubr.msk.f32.mxu1 %vm332_vm0, %v12990_v47 }
0x3191   :  { %v12994_v54 = vadd.f32 %v7558_v44, %v7554_v52 }
0x3193   :  { %10438 = vmatmul.mubr.msk.f32.vlgmr.msra.gmra.mrb[56].mxu1 %vm332_vm0, %v12994_v54 }
0x3194   :  { %10898 = vmatpush3.bf16.xpose.msk.msra.mxu1 %vm12226_vm2, %v10893_v18 }
0x3195   :  { %10905 = vmatprep.subr.msk.bf16.mxu1 %vm12226_vm2, %v10903_v25 }
0x3266   :  { %v10439_v41 = vpop.f32.mrb[56].mxu1 }
0x3267   :  { %v13003_v57 = vadd.f32 %v10439_v41, %v9460_v27  ;;  %v7646_v35 = vpop.f32.mrb[57].mxu1 }
0x3268   :  { %v13005_v59 = vadd.f32 %v9460_v27, %v7646_v35 }
0x3269   :  { %7952 = vrot.lane.b32.xlu0 %v13003_v57, %s11918_s14 }
0x326a   :  { %7950 = vrot.lane.b32.xlu1 %v13005_v59, %s11918_s14  ;;  %10455 = vmatprep.mubr.msk.f32.mxu1 %vm425_vm1, %v13005_v59 }
0x326b   :  { %10456 = vmatmul.mubr.msk.f32.vlgmr.msra.gmra.mrb[58].mxu1 %vm425_vm1, %v13003_v57 }
0x326c   :  { %10908 = vmatpush3.bf16.xpose.msk.msra.mxu1 %vm12226_vm2, %v10903_v25 }
0x326d   :  { %11254 = vrot.lane.b32.xlu0 %v12975_v10, %s11921_s13 }
0x326e   :  { %8316 = vrot.lane.b32.xlu1 %v13005_v59, %s11921_s13 }
0x3271   :  { %8318 = vrot.lane.b32.xlu0 %v13003_v57, %s11921_s13 }
0x32db   :  { %v7953_v38 = vpop.permute.xlu0 %7952 }
0x32dc   :  { %v7951_v60 = vpop.permute.xlu1 %7950 }
0x32dd   :  { %10469 = vmatprep.mubr.msk.f32.mxu1 %vm425_vm1, %v7951_v60 }
0x32de   :  { %10470 = vmatmul.mubr.msk.f32.vlgmr.msra.gmra.mrb[60].mxu1 %vm425_vm1, %v7953_v38 }
0x32df   :  { %v11255_v15 = vpop.permute.xlu0 %11254 }
0x32e0   :  { %v11257_v49 = vunpack.i.h.bf16 %v11255_v15  ;;  %v11256_v16 = vunpack.i.l.bf16 %v11255_v15  ;;  %v8317_v62 = vpop.permute.xlu1 %8316 }
0x32e1   :  { %10493 = vmatprep.mubr.msk.f32.mxu1 %vm425_vm1, %v8317_v62 }
0x32e2   :  { %v10913_v63 = vpack.c.bf16 %v11257_v49, %v11256_v16 }
0x32e3   :  { %v8319_v0 = vpop.permute.xlu0 %8318 }
0x32e4   :  { %10915 = vmatprep.subr.msk.bf16.mxu1 %vm12226_vm2, %v10913_v63 }
0x32e5   :  { %10918 = vmatpush3.bf16.xpose.msk.msra.mxu1 %vm12226_vm2, %v10913_v63 }
0x32ec   :  { %10494 = vmatmul.mubr.msk.f32.vlgmr.msra.gmra.mrb[62].mxu1 %vm425_vm1, %v8319_v0 }
0x333e   :  { %v10457_v1 = vpop.f32.mrb[58].mxu1 }
0x333f   :  { %v7838_v30 = vmul.f32 0.35355338, %v10457_v1  ;;  %v7828_v2 = vpop.f32.mrb[59].mxu1 }
0x3340   :  { %v7837_v51 = vmul.f32 0.35355338, %v7828_v2 }
0x3341   :  { %v7840_v3 = vadd.f32 %v13031_v33, %v7838_v30 }
0x3342   :  { %v7839_v53 = vadd.f32 %v13034_v4, %v7837_v51 }
0x3343   :  { %v7844_v5 = vsel %vm513_vm3, %v7840_v3, -inf }
0x3344   :  { %7845 = vmax.xlane.f32.xlu0 %v7844_v5  ;;  %v7841_v8 = vsel %vm513_vm3, %v7839_v53, -inf }
0x3345   :  { %7842 = vmax.xlane.f32.xlu1 %v7841_v8 }
0x33b1   :  { %v10471_v39 = vpop.f32.mrb[60].mxu1 }
0x33b2   :  { %v8042_v56 = vmul.f32 0.35355338, %v10471_v39  ;;  %v8032_v18 = vpop.f32.mrb[61].mxu1 }
0x33b3   :  { %v8041_v50 = vmul.f32 0.35355338, %v8032_v18 }
0x33b4   :  { %v8044_v20 = vadd.f32 %v13031_v33, %v8042_v56 }
0x33b5   :  { %v8043_v48 = vadd.f32 %v13034_v4, %v8041_v50 }
0x33b6   :  { %v8048_v58 = vsel %vm513_vm3, %v8044_v20, -inf }
0x33b7   :  { %8049 = vmax.xlane.f32.xlu1 %v8048_v58  ;;  %v8045_v6 = vsel %vm513_vm3, %v8043_v48, -inf }
0x33b8   :  { %8046 = vmax.xlane.f32.xlu0 %v8045_v6 }
0x33bf   :  { %v10495_v9 = vpop.f32.mrb[62].mxu1 }
0x33c0   :  { %v8398_v14 = vpop.f32.mrb[63].mxu1  ;;  %v8408_v38 = vmul.f32 0.35355338, %v10495_v9 }
0x33c1   :  { %v8407_v35 = vmul.f32 0.35355338, %v8398_v14 }
0x33c2   :  { %v8410_v15 = vadd.f32 %v13031_v33, %v8408_v38 }
0x33c3   :  { %v8409_v60 = vadd.f32 %v13034_v4, %v8407_v35 }
0x33c5   :  { %v8411_v49 = vsel %vm513_vm3, %v8409_v60, -inf }
0x33d1   :  { %v7846_v21 = vpop.xlane.xlu0 %7845 }
0x33d2   :  { %v7848_v24 = vsub.f32 %v7840_v3, %v7846_v21  ;;  %v7843_v28 = vpop.xlane.xlu1 %7842 }
0x33d3   :  { %v7847_v13 = vsub.f32 %v7839_v53, %v7843_v28 }
0x33d4   :  { %v7851_v31 = vmul.f32 1.442695, %v7848_v24 }
0x33d5   :  { %v7849_v34 = vmul.f32 1.442695, %v7847_v13 }
0x33d6   :  { %11475 = vpow2.f32 %v7851_v31 }
0x33d7   :  { %11477 = vpow2.f32 %v7849_v34 }
0x33e0   :  { %v13043_v36 = vpop.eup %11475 }
0x33e1   :  { %v11478_v40 = vpop.eup %11477  ;;  %v7856_v29 = vsel %vm513_vm3, %v13043_v36, 0.0 }
0x33e2   :  { %7857 = vadd.xlane.f32.xlu1 %v7856_v29  ;;  %v7853_v11 = vsel %vm513_vm3, %v11478_v40, 0.0 }
0x33e3   :  { %7854 = vadd.xlane.f32.xlu0 %v7853_v11  ;;  %v7745_v11 = vld [vmem:[#allocation22 + $0x28] sm:$0xff] }
0x3444   :  { %v8050_v61 = vpop.xlane.xlu1 %8049 }
0x3445   :  { %v8052_v43 = vsub.f32 %v8044_v20, %v8050_v61  ;;  %v8047_v44 = vpop.xlane.xlu0 %8046  ;;  %v7744_v61 = vld [vmem:[#allocation22 + $0x20] sm:$0xff] }
0x3446   :  { %v8051_v7 = vsub.f32 %v8043_v48, %v8047_v44 }
0x3447   :  { %v8055_v45 = vmul.f32 1.442695, %v8052_v43 }
0x3448   :  { %v8053_v46 = vmul.f32 1.442695, %v8051_v7 }
0x3449   :  { %11479 = vpow2.f32 %v8055_v45 }
0x344a   :  { %11481 = vpow2.f32 %v8053_v46 }
0x3453   :  { %v11480_v32 = vpop.eup %11479 }
0x3454   :  { %v11482_v26 = vpop.eup %11481  ;;  %v8060_v37 = vsel %vm513_vm3, %v11480_v32, 0.0 }
0x3455   :  { %8061 = vadd.xlane.f32.xlu1 %v8060_v37  ;;  %v8057_v52 = vsel %vm513_vm3, %v11482_v26, 0.0 }
0x3456   :  { %8058 = vadd.xlane.f32.xlu0 %v8057_v52 }
0x3466   :  { %11264 = vrot.lane.b32.xlu1 %v12975_v10, %s11920_s19 }
0x346a   :  { %11269 = vrot.lane.b32.xlu1 %v12975_v10, %s11925_s11 }
0x346c   :  { %11259 = vrot.lane.b32.xlu0 %v12975_v10, %s11919_s5 }
0x346e   :  { %8605 = vrot.lane.b32.xlu1 %v13003_v57, %s11925_s11  ;;  %v8414_v57 = vsel %vm513_vm3, %v8410_v15, -inf }
0x3470   :  { %8603 = vrot.lane.b32.xlu0 %v13005_v59, %s11925_s11  ;;  %v7855_v25 = vpop.xlane.xlu0 %7854  ;;  %v7858_v59 = vpop.xlane.xlu1 %7857 }
0x3471   :  { %11483 = vrcp.f32 %v7855_v25 }
0x3472   :  { %11485 = vrcp.f32 %v7858_v59 }
0x347b   :  { %v11484_v27 = vpop.eup %11483 }
0x347c   :  { %v7861_v41 = vmul.f32 %v11484_v27, %v11478_v40  ;;  %v11486_v5 = vpop.eup %11485 }
0x347d   :  { %v7862_v48 = vmul.f32 %v11486_v5, %v13043_v36 }
0x347e   :  { %10462 = vmatprep.mubr.msk.f32.mxu0 %vm513_vm3, %v7861_v41 }
0x348f   :  { %8412 = vmax.xlane.f32.xlu0 %v8411_v49 }
0x3492   :  { %8415 = vmax.xlane.f32.xlu1 %v8414_v57 }
0x34a3   :  { %11274 = vrot.lane.b32.xlu1 %v12975_v10, %s11922_s1 }
0x34e2   :  { %v8062_v16 = vpop.xlane.xlu1 %8061 }
0x34e3   :  { %v8059_v62 = vpop.xlane.xlu0 %8058 }
0x34e4   :  { %11487 = vrcp.f32 %v8059_v62 }
0x34e5   :  { %11489 = vrcp.f32 %v8062_v16 }
0x34e6   :  { %v11265_v63 = vpop.permute.xlu1 %11264 }
0x34e7   :  { %v11260_v0 = vpop.permute.xlu0 %11259  ;;  %v11267_v1 = vunpack.i.h.bf16 %v11265_v63  ;;  %v11266_v30 = vunpack.i.l.bf16 %v11265_v63 }
0x34e8   :  { %v11262_v2 = vunpack.i.h.bf16 %v11260_v0  ;;  %v11261_v51 = vunpack.i.l.bf16 %v11260_v0  ;;  %v7746_v0 = vld [vmem:[#allocation22 + $0x30] sm:$0xff] }
0x34e9   :  { %v10909_v18 = vpack.c.bf16 %v11267_v1, %v11266_v30 }
0x34ea   :  { %v10899_v3 = vpack.c.bf16 %v11262_v2, %v11261_v51  ;;  %v11270_v53 = vpop.permute.xlu1 %11269 }
0x34eb   :  { %v11272_v8 = vunpack.i.h.bf16 %v11270_v53  ;;  %v11271_v39 = vunpack.i.l.bf16 %v11270_v53  ;;  %v8604_v56 = vpop.permute.xlu0 %8603 }
0x34ec   :  { %10900 = vmatprep.subr.bf16.mxu0 %v10899_v3  ;;  %10512 = vmatprep.mubr.msk.f32.mxu1 %vm425_vm1, %v8604_v56 }
0x34ed   :  { %v10923_v50 = vpack.c.bf16 %v11272_v8, %v11271_v39  ;;  %10902 = vmatpush3.bf16.msra.mxu0 %v10899_v3 }
0x34ee   :  { %v11488_v20 = vpop.eup %11487  ;;  %10910 = vmatprep.subr.bf16.mxu0 %v10909_v18  ;;  %v8606_v14 = vpop.permute.xlu1 %8605 }
0x34ef   :  { %v11490_v58 = vpop.eup %11489  ;;  %10925 = vmatprep.subr.msk.bf16.mxu1 %vm12226_vm2, %v10923_v50  ;;  %v8065_v6 = vmul.f32 %v11488_v20, %v11482_v26 }
0x34f0   :  { %10463 = vmatmul.mubr.msk.f32.vlgmr.msra.gmra.mrb[60].mxu0 %vm513_vm3, %v7862_v48  ;;  %10928 = vmatpush3.bf16.xpose.msk.msra.mxu1 %vm12226_vm2, %v10923_v50  ;;  %v8066_v9 = vmul.f32 %v11490_v58, %v11480_v32 }
0x34f1   :  { %10912 = vmatpush3.bf16.msra.mxu0 %v10909_v18  ;;  %10476 = vmatprep.mubr.msk.f32.mxu0 %vm513_vm3, %v8065_v6 }
0x34f2   :  { %10479 = vmatprep.subr.mxu0 %v7745_v11 }
0x34f4   :  { %10477 = vmatmul.mubr.msk.f32.vlgmr.msra.gmra.mrb[62].mxu0 %vm513_vm3, %v8066_v9  ;;  %v7747_v9 = vld [vmem:[#allocation22 + $0x38] sm:$0xff] }
0x34f5   :  { %10480 = vmatpush3.msra.mxu0 %v7745_v11 }
0x34f6   :  { %10484 = vmatprep.subr.mxu0 %v7744_v61 }
0x34f7   :  { %10513 = vmatmul.mubr.msk.f32.vlgmr.msra.gmra.mrb[64].mxu1 %vm425_vm1, %v8606_v14 }
0x351c   :  { %v8413_v21 = vpop.xlane.xlu0 %8412 }
0x351d   :  { %v8417_v24 = vsub.f32 %v8409_v60, %v8413_v21 }
0x351f   :  { %v8419_v28 = vmul.f32 1.442695, %v8417_v24  ;;  %v8416_v13 = vpop.xlane.xlu1 %8415 }
0x3520   :  { %v8418_v31 = vsub.f32 %v8410_v15, %v8416_v13 }
0x3521   :  { %11491 = vpow2.f32 %v8419_v28 }
0x3522   :  { %v8421_v34 = vmul.f32 1.442695, %v8418_v31  ;;  %v9500_v31 = vld [vmem:[%s13180_s12 + $0x1] ss:$0 sm:$0xff] }
0x3523   :  { %v11275_v44 = vpop.permute.xlu1 %11274 }
0x3524   :  { %11493 = vpow2.f32 %v8421_v34  ;;  %v11277_v32 = vunpack.i.h.bf16 %v11275_v44  ;;  %v11276_v26 = vunpack.i.l.bf16 %v11275_v44 }
0x3526   :  { %v10919_v25 = vpack.c.bf16 %v11277_v32, %v11276_v26 }
0x352b   :  { %v11492_v36 = vpop.eup %11491 }
0x352c   :  { %v8423_v17 = vsel %vm513_vm3, %v11492_v36, 0.0 }
0x352d   :  { %8424 = vadd.xlane.f32.xlu0 %v8423_v17 }
0x352e   :  { %v11494_v40 = vpop.eup %11493 }
0x352f   :  { %v8426_v29 = vsel %vm513_vm3, %v11494_v40, 0.0 }
0x3531   :  { %8427 = vadd.xlane.f32.xlu0 %v8426_v29 }
0x35ba   :  { %v8425_v43 = vpop.xlane.xlu0 %8424 }
0x35bb   :  { %11495 = vrcp.f32 %v8425_v43 }
0x35be   :  { %v8428_v45 = vpop.xlane.xlu0 %8427 }
0x35bf   :  { %11497 = vrcp.f32 %v8428_v45 }
0x35c3   :  { %v10464_v7 = vpop.f32.mrb[60].mxu0 }
0x35c4   :  { %v7941_v46 = vpop.f32.mrb[61].mxu0 }
0x35c5   :  { %v11496_v60 = vpop.eup %11495 }
0x35c6   :  { %v8431_v16 = vmul.f32 %v11496_v60, %v11492_v36 }
0x35c7   :  { %v10478_v37 = vpop.f32.mrb[62].mxu0 }
0x35c8   :  { %v8145_v52 = vpop.f32.mrb[63].mxu0 }
0x35c9   :  { %10481 = vmatprep.mubr.msk.f32.mxu0 %vm425_vm1, %v8145_v52  ;;  %v11498_v59 = vpop.eup %11497 }
0x35ca   :  { %10482 = vmatmul.mubr.msk.f32.vlgmr.msra.gmra.mrb[64].mxu0 %vm425_vm1, %v10478_v37  ;;  %v10514_v27 = vpop.f32.mrb[64].mxu1  ;;  %v8432_v62 = vmul.f32 %v11498_v59, %v11494_v40 }
0x35cb   :  { %10485 = vmatpush3.msra.mxu0 %v7744_v61  ;;  %10486 = vmatprep.mubr.msk.f32.mxu0 %vm425_vm1, %v7941_v46  ;;  %v8685_v41 = vpop.f32.mrb[65].mxu1  ;;  %v8695_v35 = vmul.f32 0.35355338, %v10514_v27  ;;  %v8940_v27 = vld [vmem:[#allocation23 + $0x28] sm:$0xff] }
0x35cc   :  { %10920 = vmatprep.subr.bf16.mxu0 %v10919_v25  ;;  %v8694_v38 = vmul.f32 0.35355338, %v8685_v41 }
0x35cd   :  { %v8697_v49 = vadd.f32 %v13031_v33, %v8695_v35  ;;  %v8941_v35 = vld [vmem:[#allocation23 + $0x30] sm:$0xff] }
0x35ce   :  { %v8696_v15 = vadd.f32 %v13034_v4, %v8694_v38  ;;  %v8942_v38 = vld [vmem:[#allocation23 + $0x38] sm:$0xff] }
0x35cf   :  { %v8701_v63 = vsel %vm513_vm3, %v8697_v49, -inf  ;;  %v10937_v60 = vpack.c.bf16 %v8942_v38, %v8941_v35 }
0x35d0   :  { %v8698_v57 = vsel %vm513_vm3, %v8696_v15, -inf }
0x35d1   :  { %8699 = vmax.xlane.f32.xlu0 %v8698_v57  ;;  %v9504_v57 = vld [vmem:[%s12067_s3 + $0x50] sm:$0xff] }
0x35d2   :  { %10487 = vmatmul.mubr.msk.f32.vlgmr.msra.gmra.mrb[64].mxu0 %vm425_vm1, %v10464_v7 }
0x35d3   :  { %10922 = vmatpush3.bf16.msra.mxu0 %v10919_v25  ;;  %10500 = vmatprep.mubr.msk.f32.mxu0 %vm513_vm3, %v8431_v16  ;;  %v8939_v25 = vld [vmem:[#allocation23 + $0x20] sm:$0xff]  ;;  %v9505_v16 = vld [vmem:[%s12067_s3 + $0x58] sm:$0xff] }
0x35d4   :  { %10503 = vmatprep.subr.mxu0 %v7746_v0  ;;  %v10933_v41 = vpack.c.bf16 %v8940_v27, %v8939_v25 }
0x35d5   :  { %8702 = vmax.xlane.f32.xlu0 %v8701_v63  ;;  %v9506_v63 = vld [vmem:[%s12067_s3 + $0x60] sm:$0xff] }
0x35d6   :  { %10501 = vmatmul.mubr.msk.f32.vlgmr.msra.gmra.mrb[66].mxu0 %vm513_vm3, %v8432_v62  ;;  %10934 = vmatprep.subr.bf16.mxu1 %v10933_v41  ;;  %v10945_v62 = vpack.c.bf16 %v9505_v16, %v9504_v57 }
0x35d7   :  { %10504 = vmatpush3.msra.mxu0 %v7746_v0  ;;  %10936 = vmatpush3.bf16.msra.mxu1 %v10933_v41  ;;  %v9507_v0 = vld [vmem:[%s12067_s3 + $0x68] sm:$0xff] }
0x35d8   :  { %10938 = vmatprep.subr.bf16.mxu1 %v10937_v60 }
0x35db   :  { %10940 = vmatpush3.bf16.msra.mxu1 %v10937_v60 }
0x365e   :  { %v8700_v33 = vpop.xlane.xlu0 %8699 }
0x365f   :  { %v8704_v4 = vsub.f32 %v8696_v15, %v8700_v33  ;;  %v9502_v15 = vld [vmem:[%s12067_s3 + $0x40] sm:$0xff]  ;;  %v10949_v33 = vpack.c.bf16 %v9507_v0, %v9506_v63 }
0x3661   :  { %v8706_v2 = vmul.f32 1.442695, %v8704_v4 }
0x3662   :  { %v8703_v1 = vpop.xlane.xlu0 %8702 }
0x3663   :  { %v8705_v30 = vsub.f32 %v8697_v49, %v8703_v1  ;;  %v9503_v49 = vld [vmem:[%s12067_s3 + $0x48] sm:$0xff] }
0x3664   :  { %v10941_v59 = vpack.c.bf16 %v9503_v49, %v9502_v15  ;;  %v9163_v15 = vrot.slane %v12984_v22, %v6258_v55 }
0x3665   :  { %v8708_v51 = vmul.f32 1.442695, %v8705_v30 }
0x3667   :  { %11499 = vpow2.f32 %v8708_v51 }
0x3668   :  { %11501 = vpow2.f32 %v8706_v2 }
0x3671   :  { %v11500_v3 = vpop.eup %11499 }
0x3672   :  { %v8713_v53 = vsel %vm513_vm3, %v11500_v3, 0.0  ;;  %v11502_v5 = vpop.eup %11501 }
0x3673   :  { %8714 = vadd.xlane.f32.xlu0 %v8713_v53  ;;  %v8710_v8 = vsel %vm513_vm3, %v11502_v5, 0.0  ;;  %v8929_v53 = vrot.slane %v12984_v22, %v12365_v12 }
0x3677   :  { %8711 = vadd.xlane.f32.xlu0 %v8710_v8 }
0x368d   :  { %11279 = vrot.lane.b32.xlu0 %v12975_v10, %s11924_s10 }
0x36a9   :  { %v10502_v39 = vpop.f32.mrb[66].mxu0 }
0x36aa   :  { %v8511_v56 = vpop.f32.mrb[67].mxu0 }
0x36ab   :  { %10505 = vmatprep.mubr.msk.f32.mxu0 %vm425_vm1, %v8511_v56 }
0x36ac   :  { %10506 = vmatmul.mubr.msk.f32.vlgmr.msra.gmra.mrb[64].mxu0 %vm425_vm1, %v10502_v39  ;;  %v8935_v39 = vrot.slane %v12984_v22, %v12368_v19 }
0x3700   :  { %v8715_v18 = vpop.xlane.xlu0 %8714 }
0x3701   :  { %11503 = vrcp.f32 %v8715_v18 }
0x3704   :  { %v8712_v50 = vpop.xlane.xlu0 %8711 }
0x3705   :  { %11505 = vrcp.f32 %v8712_v50 }
0x3708   :  { %v11280_v20 = vpop.permute.xlu0 %11279 }
0x3709   :  { %v11282_v48 = vunpack.i.h.bf16 %v11280_v20  ;;  %v11281_v58 = vunpack.i.l.bf16 %v11280_v20 }
0x370b   :  { %v10929_v6 = vpack.c.bf16 %v11282_v48, %v11281_v58  ;;  %v11504_v14 = vpop.eup %11503 }
0x370c   :  { %v8719_v24 = vmul.f32 %v11504_v14, %v11500_v3  ;;  %v9511_v14 = vld [vmem:[%s13181_s17 + $0x1] ss:$0 sm:$0xff] }
0x370d   :  { %10930 = vmatprep.subr.bf16.mxu0 %v10929_v6 }
0x370e   :  { %10932 = vmatpush3.bf16.msra.mxu0 %v10929_v6  ;;  %v9508_v6 = vld [vmem:[%s12067_s3 + $0x70] sm:$0xff] }
0x370f   :  { %v11506_v10 = vpop.eup %11505  ;;  %10522 = vmatprep.subr.mxu0 %v7747_v9 }
0x3710   :  { %v8718_v21 = vmul.f32 %v11506_v10, %v11502_v5 }
0x3712   :  { %10519 = vmatprep.mubr.msk.f32.mxu0 %vm513_vm3, %v8718_v21 }
0x3713   :  { %10520 = vmatmul.mubr.msk.f32.vlgmr.msra.gmra.mrb[68].mxu0 %vm513_vm3, %v8719_v24 }
0x3714   :  { %10523 = vmatpush3.msra.mxu0 %v7747_v9  ;;  %v9509_v9 = vld [vmem:[%s12067_s3 + $0x78] sm:$0xff]  ;;  %s9179_s3 = sshll.u32 %s11928_s25, 4  ;;  %s9180_s3 = int_to_ptr.vmem [resolvable:$true] %s9179_s3 }
0x3715   :  { %10942 = vmatprep.subr.bf16.mxu0 %v10941_v59  ;;  %v10953_v12 = vpack.c.bf16 %v9509_v9, %v9508_v6  ;;  %p11834_p1 = scmp.lt.s32.totalorder %s9180_s3, %s9180_s3 }
0x37e6   :  { %v10521_v28 = vpop.f32.mrb[68].mxu0 }
0x37e7   :  { %v8798_v13 = vpop.f32.mrb[69].mxu0 }
0x37e8   :  { %10524 = vmatprep.mubr.msk.f32.mxu0 %vm425_vm1, %v8798_v13 }
0x37e9   :  { %10525 = vmatmul.mubr.msk.f32.vlgmr.msra.gmra.mrb[64].mxu0 %vm425_vm1, %v10521_v28 }
0x37ea   :  { %10944 = vmatpush3.bf16.msra.mxu0 %v10941_v59  ;;  %v9169_v59 = vrot.slane %v12984_v22, %v6264_v42 }
0x37eb   :  { %10946 = vmatprep.subr.bf16.mxu0 %v10945_v62 }
0x37ee   :  { %10948 = vmatpush3.bf16.msra.mxu0 %v10945_v62 }
0x37ef   :  { %10950 = vmatprep.subr.bf16.mxu0 %v10949_v33 }
0x37f2   :  { %10952 = vmatpush3.bf16.msra.mxu0 %v10949_v33 }
0x37f3   :  { %10954 = vmatprep.subr.bf16.mxu0 %v10953_v12 }
0x37f6   :  { %10956 = vmatpush3.bf16.msra.mxu0 %v10953_v12 }
0x38bc   :  { %v10526_v34 = vpop.f32.mrb[64].mxu0 }
0x38bd   :  { %v8897_v36 = vadd.f32 %v10526_v34, %v9500_v31  ;;  %v8879_v17 = vpop.f32.mrb[65].mxu0 }
0x38be   :  { %v8896_v40 = vadd.f32 %v9500_v31, %v8879_v17  ;;  %v9514_v31 = vld [vmem:[%s12072_s20 + $0x1] ss:$0 sm:$0xff]  ;;  %s11829_s20 = scalar_lea.vmem %s9180_s3, 256 }
0x38bf   :  { %v8899_v29 = vadd.f32 %v8897_v36, %v12994_v54  ;;  %p11830_p0 = scmp.ne.s32.totalorder %s9180_s3, %s11829_s20  ;;  %p11835_p2 = scmp.lt.s32.totalorder %s11829_s20, %s11829_s20 }
0x38c0   :  { %v8898_v11 = vadd.f32 %v8896_v40, %v12990_v47 }
0x38c1   :  { %v8903_v61 = vsel %vm332_vm0, %v8899_v29, 0.0  ;;  %p11836_p3 = por %p11835_p2, %p11834_p1 }
0x38c2   :  { %8904 = vadd.xlane.f32.xlu0 %v8903_v61  ;;  %v8900_v43 = vsel %vm332_vm0, %v8898_v11, 0.0 }
0x38c3   :  { %8901 = vadd.xlane.f32.xlu1 %v8900_v43  ;;  %p11837_p4 = pnand %p11836_p3, %p11830_p0 }
0x394f   :  { %v8905_v44 = vpop.xlane.xlu0 %8904 }
0x3950   :  { %v8907_v7 = vmul.f32 0.03125, %v8905_v44  ;;  %v8902_v45 = vpop.xlane.xlu1 %8901 }
0x3951   :  { %v8906_v46 = vmul.f32 0.03125, %v8902_v45 }
0x3952   :  { %v8909_v32 = vsub.f32 %v8899_v29, %v8907_v7 }
0x3953   :  { %v8908_v26 = vsub.f32 %v8898_v11, %v8906_v46 }
0x3954   :  { %v8911_v54 = vmul.f32 %v8909_v32, %v8909_v32 }
0x3955   :  { %v8910_v37 = vmul.f32 %v8908_v26, %v8908_v26 }
0x3956   :  { %v8915_v47 = vsel %vm332_vm0, %v8911_v54, 0.0 }
0x3957   :  { %v8912_v52 = vsel %vm332_vm0, %v8910_v37, 0.0 }
0x3958   :  { %8913 = vadd.xlane.f32.xlu1 %v8912_v52 }
0x395c   :  { %8916 = vadd.xlane.f32.xlu1 %v8915_v47 }
0x39e5   :  { %v8914_v4 = vpop.xlane.xlu1 %8913 }
0x39e6   :  { %v8918_v1 = vmul.f32 0.03125, %v8914_v4 }
0x39e8   :  { %v8920_v30 = vadd.f32 1e-05, %v8918_v1 }
0x39e9   :  { %v8917_v2 = vpop.xlane.xlu1 %8916 }
0x39ea   :  { %11507 = vrsqrt.f32 %v8920_v30  ;;  %v8919_v51 = vmul.f32 0.03125, %v8917_v2 }
0x39ec   :  { %v8921_v3 = vadd.f32 1e-05, %v8919_v51 }
0x39ee   :  { %11509 = vrsqrt.f32 %v8921_v3 }
0x39f4   :  { %v11508_v5 = vpop.eup %11507 }
0x39f5   :  { %v8924_v8 = vmul.f32 %v11508_v5, %v8908_v26 }
0x39f7   :  { %v8930_v56 = vmul.f32 %v8929_v53, %v8924_v8 }
0x39f8   :  { %v11510_v18 = vpop.eup %11509 }
0x39f9   :  { %v8925_v50 = vmul.f32 %v11510_v18, %v8909_v32  ;;  %v8936_v20 = vadd.f32 %v8935_v39, %v8930_v56 }
0x39fb   :  { %v8931_v48 = vmul.f32 %v8929_v53, %v8925_v50  ;;  %10535 = vmatprep.mubr.msk.f32.mxu1 %vm332_vm0, %v8936_v20 }
0x39fd   :  { %v8937_v58 = vadd.f32 %v8935_v39, %v8931_v48 }
0x39ff   :  { %10536 = vmatmul.mubr.msk.f32.vlgmr.msra.gmra.mrb[66].mxu1 %vm332_vm0, %v8937_v58 }
0x3ad2   :  { %v10537_v10 = vpop.f32.mrb[66].mxu1 }
0x3ad3   :  { %v9040_v21 = vadd.f32 %v10537_v10, %v9511_v14  ;;  %v9034_v19 = vpop.f32.mrb[67].mxu1 }
0x3ad4   :  { %v9035_v24 = vadd.f32 %v9511_v14, %v9034_v19 }
0x3ad5   :  { %v9044_v13 = vmax.f32 %v9040_v21, 0.0 }
0x3ad6   :  { %v9043_v28 = vmax.f32 %v9035_v24, 0.0 }
0x3ad8   :  { %10554 = vmatprep.mubr.msk.f32.mxu0 %vm1722_vm4, %v9043_v28 }
0x3ad9   :  { %10555 = vmatmul.mubr.msk.f32.vlgmr.msra.gmra.mrb[70].mxu0 %vm1722_vm4, %v9044_v13 }
0x3bac   :  { %v10556_v34 = vpop.f32.mrb[70].mxu0 }
0x3bad   :  { %v9123_v36 = vpop.f32.mrb[71].mxu0  ;;  %v9129_v17 = vadd.f32 %v10556_v34, %v9514_v31 }
0x3bae   :  { %v9124_v40 = vadd.f32 %v9514_v31, %v9123_v36 }
0x3baf   :  { %v9133_v11 = vadd.f32 %v9129_v17, %v8937_v58 }
0x3bb0   :  { %v9132_v29 = vadd.f32 %v9124_v40, %v8936_v20 }
0x3bb1   :  { %v9137_v43 = vsel %vm332_vm0, %v9133_v11, 0.0 }
0x3bb2   :  { %v9134_v61 = vsel %vm332_vm0, %v9132_v29, 0.0 }
0x3bb3   :  { %9135 = vadd.xlane.f32.xlu1 %v9134_v61 }
0x3bb7   :  { %9138 = vadd.xlane.f32.xlu1 %v9137_v43 }
0x3c40   :  { %v9136_v44 = vpop.xlane.xlu1 %9135 }
0x3c41   :  { %v9140_v7 = vmul.f32 0.03125, %v9136_v44 }
0x3c43   :  { %v9142_v45 = vsub.f32 %v9132_v29, %v9140_v7 }
0x3c44   :  { %v9139_v46 = vpop.xlane.xlu1 %9138 }
0x3c45   :  { %v9141_v32 = vmul.f32 0.03125, %v9139_v46  ;;  %v9144_v26 = vmul.f32 %v9142_v45, %v9142_v45 }
0x3c47   :  { %v9143_v37 = vsub.f32 %v9133_v11, %v9141_v32  ;;  %v9146_v52 = vsel %vm332_vm0, %v9144_v26, 0.0 }
0x3c48   :  { %9147 = vadd.xlane.f32.xlu1 %v9146_v52 }
0x3c49   :  { %v9145_v54 = vmul.f32 %v9143_v37, %v9143_v37 }
0x3c4b   :  { %v9149_v47 = vsel %vm332_vm0, %v9145_v54, 0.0 }
0x3c4c   :  { %9150 = vadd.xlane.f32.xlu0 %v9149_v47 }
0x3cd5   :  { %v9148_v25 = vpop.xlane.xlu1 %9147 }
0x3cd6   :  { %v9152_v27 = vmul.f32 0.03125, %v9148_v25 }
0x3cd8   :  { %v9154_v41 = vadd.f32 1e-05, %v9152_v27 }
0x3cd9   :  { %v9151_v35 = vpop.xlane.xlu0 %9150 }
0x3cda   :  { %11511 = vrsqrt.f32 %v9154_v41  ;;  %v9153_v38 = vmul.f32 0.03125, %v9151_v35 }
0x3cdc   :  { %v9155_v60 = vadd.f32 1e-05, %v9153_v38 }
0x3cde   :  { %11513 = vrsqrt.f32 %v9155_v60 }
0x3ce4   :  { %v11512_v49 = vpop.eup %11511 }
0x3ce5   :  { %v9158_v57 = vmul.f32 %v11512_v49, %v9142_v45 }
0x3ce7   :  { %v9164_v16 = vmul.f32 %v9163_v15, %v9158_v57 }
0x3ce8   :  { %v11514_v62 = vpop.eup %11513 }
0x3ce9   :  { %v9159_v63 = vmul.f32 %v11514_v62, %v9143_v37  ;;  %v9170_v0 = vadd.f32 %v9169_v59, %v9164_v16 }
0x3ceb   :  { %v9165_v33 = vmul.f32 %v9163_v15, %v9159_v63  ;;  %9172 = vst.msk [vmem:[#allocation25] sm:$0xff] %vm332_vm0, %v9170_v0 }
0x3ced   :  { %v9171_v4 = vadd.f32 %v9169_v59, %v9165_v33 }
0x3cef   :  { %9173 = vst.msk [vmem:[#allocation25 + $0x8] sm:$0xff] %vm332_vm0, %v9171_v4 }
0x3cf0   :  { %11840 = shalt.err (!%p11837_p4)
}
0x3cf1   :  { %s11841_s9 = scalar_lea.hbm %s12082_s4, 256 }
0x3cf2   :  { %p11842_p5 = scmp.ne.s32.totalorder %s12082_s4, %s11841_s9  ;;  %p11845_p6 = scmp.lt.u32.totalorder %s11841_s9, %s12082_s4 }
0x3cf4   :  { %p11847_p7 = pnand %p11845_p6, %p11842_p5 }
0x3cf6   :  { %11850 = shalt.err (!%p11847_p7)
}
0x3cf7   :  { %9185 = dma.vmem_to_hbm [thread:$0]  %s9180_s3, 256, %s12082_s4, [#allocation4], %s11900_s18, %s11900_s18, %s11901_s22  }
0x3cf8   :  { %11867 = dma.done.wait [#allocation4], 256  }
0x3cf9   :  { %11868 = vsyncadd [#allocation4], 4294967040 }
0x3cfa   :  { %9189 = vsyncpa [#allocation3], 1 }
0x3cfb   :  { %9190 = vsyncpa [#allocation6], 1 }
0x3cfc   :  { %9191 = vsyncpa [#allocation9], 1 }
0x3cfd   :  { %9192 = vsyncpa [#allocation12], 1 }
0x3cfe   :  { %9193 = vsyncpa [#allocation15], 1 }
0x3cff   :  { %9194 = vsyncpa [#allocation18], 1 }
0x3d00   :  { %9195 = vsyncpa [#allocation21], 1 }
0x3d01   :  { %9196 = vsyncpa [#allocation24], 1 }
0x3d02   :  { %9197 = vsyncpa [#allocation4], 1 }

</bundles_post_ra>
